<compile_context>
chip_gen: v7x
topology: tpu7x:2x2x1
jax: 0.10.0
libtpu: 0.0.40
codegen_flags: <defaults>
</compile_context>

<pallas_src>
import math
import jax
import jax.numpy as jnp
from jax.experimental import pallas as pl
from jax.experimental.pallas import tpu as pltpu

# --- hyperparameters (small, consistent with the module's __init__) ---
PAD = 0            # onmt.Constants.PAD
VOCAB = 32         # dicts.size()
D_MODEL = 32       # opt.model_size
N_HEADS = 4        # opt.n_heads
D_HEAD = D_MODEL // N_HEADS
INNER = 64         # opt.inner_size
N_LAYERS = 2       # opt.layers
B = 2              # batch_size
T = 8              # len_tgt
S = 8              # len_src
LN_EPS = 1e-5

BT = B * T
BS = B * S

# Per-layer vector-parameter packing order (rows of the vec slab, each padded to INNER lanes).
VEC_ORDER = ['ln_attn_g', 'ln_attn_b', 'bq', 'bk', 'bv', 'bo',
             'ln_src_g', 'ln_src_b', 'bq2', 'bk2', 'bv2', 'bo2',
             'ln_ffn_g', 'ln_ffn_b', 'b1', 'b2']
N_VEC = len(VEC_ORDER)  # 16


def _layer_norm(x, g, b):
    mu = jnp.mean(x, axis=-1, keepdims=True)
    xc = x - mu
    var = jnp.mean(xc * xc, axis=-1, keepdims=True)
    return xc * jax.lax.rsqrt(var + LN_EPS) * g + b


def _softmax_rows(s):
    s = s - jnp.max(s, axis=-1, keepdims=True)
    p = jnp.exp(s)
    denom = jnp.sum(p, axis=-1, keepdims=True)
    return p * pl.reciprocal(denom, approx=True)   # EUP approx reciprocal (free slot)


# ---------------- fused Pallas kernel: whole decoder ----------------

def decoder_kernel(x_ref, ctx_ref, bias_ref, wsq_ref, wffn_ref, vec_ref, o_ref):
    """Full N_LAYERS decoder stack + final LayerNorm, everything resident in VMEM.

    x_ref    : (B*T, D)            target activations (flattened batch*time slab)
    ctx_ref  : (B*S, D)            encoder context (flattened)
    bias_ref : (B*T, B*T + B*S)    [self | cross] additive biases; block-diagonal over batch,
                                   with PAD + causal masking already folded in (-1e9 elsewhere)
    wsq_ref  : (L, D, 8D)          per layer: [wq|wk|wv | wo | wq2 | wk2|wv2 | wo2]
    wffn_ref : (L, D+INNER, INNER) rows [0:D)=w1, rows [D:D+INNER) cols [0:D)=w2
    vec_ref  : (L*16+2, INNER)     all LN gains/biases + linear biases + final LN (rows padded)
    o_ref    : (B*T, D)            output
    """
    x = x_ref[...]                       # (B*T, D) f32
    ctx = ctx_ref[...]                   # (B*S, D) f32
    bias_all = bias_ref[...]             # (B*T, B*T + B*S)
    bias_self = bias_all[:, 0:BT]        # (B*T, B*T)
    bias_cross = bias_all[:, BT:BT + BS] # (B*T, B*S)
    scale = 1.0 / math.sqrt(D_HEAD)

    def vrow(i, w=D_MODEL):
        return vec_ref[i:i + 1, 0:w]     # (1, w) broadcastable row

    def mha(q, k, v, bias):
        # q: (B*T, D); k, v: (B*kv, D).  Batch dimension handled in ONE matmul per head via
        # the block-diagonal additive bias; head outputs assembled in registers (no scratch).
        heads = []
        for h in range(N_HEADS):
            lo = h * D_HEAD
            qh = q[:, lo:lo + D_HEAD]                                  # (B*T, Dh)
            kh = k[:, lo:lo + D_HEAD]                                  # (B*kv, Dh)
            vh = v[:, lo:lo + D_HEAD]                                  # (B*kv, Dh)
            s = jax.lax.dot_general(                                   # (B*T, B*kv) = q @ k^T
                qh, kh, (((1,), (1,)), ((), ())),
                preferred_element_type=jnp.float32) * scale + bias
            p = _softmax_rows(s)
            # TODO(synk): attn_dropout skipped (eval mode -> identity)
            heads.append(jnp.dot(p, vh, preferred_element_type=jnp.float32))
        return jnp.concatenate(heads, axis=-1)                         # (B*T, D), registers only

    for l in range(N_LAYERS):            # static unroll; all weights already in VMEM
        base = l * N_VEC
        Wl = wsq_ref[l]                  # (D, 8D) — one load, sliced in registers
        Fl = wffn_ref[l]                 # (D+INNER, INNER)
        wqkv = Wl[:, 0:3 * D_MODEL]
        wo = Wl[:, 3 * D_MODEL:4 * D_MODEL]
        wq2 = Wl[:, 4 * D_MODEL:5 * D_MODEL]
        wkv2 = Wl[:, 5 * D_MODEL:7 * D_MODEL]
        wo2 = Wl[:, 7 * D_MODEL:8 * D_MODEL]
        w1 = Fl[0:D_MODEL, :]
        w2 = Fl[D_MODEL:D_MODEL + INNER, 0:D_MODEL]

        # --- masked self-attention sub-layer: preprocess (LN) -> MHA -> residual ---
        h = _layer_norm(x, vrow(base + 0), vrow(base + 1))
        qkv = jnp.dot(h, wqkv, preferred_element_type=jnp.float32)     # fused QKV matmul
        q = qkv[:, 0:D_MODEL] + vrow(base + 2)
        k = qkv[:, D_MODEL:2 * D_MODEL] + vrow(base + 3)
        v = qkv[:, 2 * D_MODEL:3 * D_MODEL] + vrow(base + 4)
        a = mha(q, k, v, bias_self)
        x = x + jnp.dot(a, wo, preferred_element_type=jnp.float32) + vrow(base + 5)

        # --- cross-attention sub-layer (keys/values from encoder context) ---
        h = _layer_norm(x, vrow(base + 6), vrow(base + 7))
        q = jnp.dot(h, wq2, preferred_element_type=jnp.float32) + vrow(base + 8)
        kv = jnp.dot(ctx, wkv2, preferred_element_type=jnp.float32)    # fused K2/V2 matmul
        k = kv[:, 0:D_MODEL] + vrow(base + 9)
        v = kv[:, D_MODEL:2 * D_MODEL] + vrow(base + 10)
        a = mha(q, k, v, bias_cross)
        x = x + jnp.dot(a, wo2, preferred_element_type=jnp.float32) + vrow(base + 11)

        # --- feed-forward sub-layer: LN -> Linear -> ReLU -> Linear -> residual ---
        h = _layer_norm(x, vrow(base + 12), vrow(base + 13))
        f = jnp.dot(h, w1, preferred_element_type=jnp.float32) + vrow(base + 14, INNER)
        f = jnp.maximum(f, 0.0)
        f = jnp.dot(f, w2, preferred_element_type=jnp.float32) + vrow(base + 15)
        x = x + f

    # postprocess_layer: final LayerNorm, fused (no extra pallas_call / HBM round trip)
    o_ref[...] = _layer_norm(x, vrow(N_LAYERS * N_VEC), vrow(N_LAYERS * N_VEC + 1))


# ---------------- wrappers ----------------

def run_decoder_stack(x2d, ctx2d, bias_both, wsq, wffn, vec):
    # Single grid-less call: default BlockSpecs place every (tiny) array fully in VMEM.
    # TODO(synk): add a "parallel" grid axis over B*H (v7x megacore) for production sizes only.
    return pl.pallas_call(
        decoder_kernel,
        out_shape=jax.ShapeDtypeStruct((BT, D_MODEL), jnp.float32),
    )(x2d, ctx2d, bias_both, wsq, wffn, vec)


def sinusoidal_pe(length, d_model):
    pos = jnp.arange(length, dtype=jnp.float32)[:, None]
    i = jnp.arange(d_model // 2, dtype=jnp.float32)[None, :]
    angle = pos / jnp.power(10000.0, (2.0 * i) / d_model)
    pe = jnp.zeros((length, d_model), jnp.float32)
    pe = pe.at[:, 0::2].set(jnp.sin(angle))
    pe = pe.at[:, 1::2].set(jnp.cos(angle))
    return pe


def init_layer_params(key):
    ks = jax.random.split(key, 10)

    def lin(k, fan_in, fan_out):
        return (jax.random.normal(k, (fan_in, fan_out), jnp.float32)
                / math.sqrt(fan_in)).astype(jnp.float32)

    zeros = lambda n: jnp.zeros((1, n), jnp.float32)
    ones = lambda n: jnp.ones((1, n), jnp.float32)
    return {
        'ln_attn_g': ones(D_MODEL), 'ln_attn_b': zeros(D_MODEL),
        'wq': lin(ks[0], D_MODEL, D_MODEL), 'bq': zeros(D_MODEL),
        'wk': lin(ks[1], D_MODEL, D_MODEL), 'bk': zeros(D_MODEL),
        'wv': lin(ks[2], D_MODEL, D_MODEL), 'bv': zeros(D_MODEL),
        'wo': lin(ks[3], D_MODEL, D_MODEL), 'bo': zeros(D_MODEL),
        'ln_src_g': ones(D_MODEL), 'ln_src_b': zeros(D_MODEL),
        'wq2': lin(ks[4], D_MODEL, D_MODEL), 'bq2': zeros(D_MODEL),
        'wk2': lin(ks[5], D_MODEL, D_MODEL), 'bk2': zeros(D_MODEL),
        'wv2': lin(ks[6], D_MODEL, D_MODEL), 'bv2': zeros(D_MODEL),
        'wo2': lin(ks[7], D_MODEL, D_MODEL), 'bo2': zeros(D_MODEL),
        'ln_ffn_g': ones(D_MODEL), 'ln_ffn_b': zeros(D_MODEL),
        'w1': lin(ks[8], D_MODEL, INNER), 'b1': zeros(INNER),
        'w2': lin(ks[9], INNER, D_MODEL), 'b2': zeros(D_MODEL),
    }


def pack_params(layers, lnf_g, lnf_b):
    """Pack all per-layer parameters into 3 DMA-friendly slabs."""
    # (L, D, 8D): [wq|wk|wv | wo | wq2 | wk2|wv2 | wo2]  (QKV / KV2 pre-fused along lanes)
    wsq = jnp.stack([jnp.concatenate(
        [lp['wq'], lp['wk'], lp['wv'], lp['wo'],
         lp['wq2'], lp['wk2'], lp['wv2'], lp['wo2']], axis=1) for lp in layers], axis=0)
    # (L, D+INNER, INNER): rows [0:D) = w1, rows [D:D+INNER) cols [0:D) = w2
    ffn_list = []
    for lp in layers:
        f = jnp.zeros((D_MODEL + INNER, INNER), jnp.float32)
        f = f.at[:D_MODEL, :].set(lp['w1'])
        f = f.at[D_MODEL:, :D_MODEL].set(lp['w2'])
        ffn_list.append(f)
    wffn = jnp.stack(ffn_list, axis=0)
    # (L*16 + 2, INNER): every LN gain/bias + linear bias, then final LN gain/bias
    rows = []
    for lp in layers:
        for name in VEC_ORDER:
            v = lp[name]
            rows.append(jnp.zeros((1, INNER), jnp.float32).at[:, :v.shape[1]].set(v))
    rows.append(jnp.zeros((1, INNER), jnp.float32).at[:, :D_MODEL].set(lnf_g))
    rows.append(jnp.zeros((1, INNER), jnp.float32).at[:, :D_MODEL].set(lnf_b))
    vec = jnp.concatenate(rows, axis=0)
    return wsq, wffn, vec


def init_params(key):
    k_emb, k_layers = jax.random.split(key)
    emb = jax.random.normal(k_emb, (VOCAB, D_MODEL), jnp.float32) * 0.1
    emb = emb.at[PAD].set(0.0)   # nn.Embedding(padding_idx=PAD)
    layer_keys = jax.random.split(k_layers, N_LAYERS)
    layers = [init_layer_params(k) for k in layer_keys]
    lnf_g = jnp.ones((1, D_MODEL), jnp.float32)
    lnf_b = jnp.zeros((1, D_MODEL), jnp.float32)
    wsq, wffn, vec = pack_params(layers, lnf_g, lnf_b)
    return {'emb': emb, 'wsq': wsq, 'wffn': wffn, 'vec': vec}


@jax.jit
def transformer_decoder(tgt_ids, context, src_ids, params):
    """Eval-mode forward of TransformerDecoder.

    tgt_ids: (B, T) int32; context: (B, S, D) f32 (encoder output); src_ids: (B, S) int32.
    Returns (output, None) with output time-first (T, B, D), matching the PyTorch code path
    (emb.transpose(0,1) with no re-transpose).
    """
    # Embedding (word_dropout -> identity at eval), scale by sqrt(d_model), add sinusoidal PE.
    emb = params['emb'][tgt_ids] * math.sqrt(D_MODEL)                  # (B, T, D)
    emb = emb + sinusoidal_pe(T, D_MODEL)[None]
    # preprocess_layer: emb_dropout -> identity at eval

    # Additive biases with batch-block-diagonal structure folded in:
    #   self : allowed iff same batch AND key<=query (causal) AND target key != PAD
    #   cross: allowed iff same batch AND source key != PAD
    row_b = jnp.arange(BT) // T
    row_t = jnp.arange(BT) % T
    col_t = row_t
    tgt_key_pad = (tgt_ids.reshape(-1) == PAD)                         # (B*T,)
    src_key_pad = (src_ids.reshape(-1) == PAD)                         # (B*S,)
    same_b_self = row_b[:, None] == row_b[None, :]
    causal_ok = col_t[None, :] <= row_t[:, None]
    allow_self = same_b_self & causal_ok & (~tgt_key_pad)[None, :]     # (B*T, B*T)
    col_b_src = jnp.arange(BS) // S
    same_b_cross = row_b[:, None] == col_b_src[None, :]
    allow_cross = same_b_cross & (~src_key_pad)[None, :]               # (B*T, B*S)
    bias_self = jnp.where(allow_self, 0.0, -1e9).astype(jnp.float32)
    bias_cross = jnp.where(allow_cross, 0.0, -1e9).astype(jnp.float32)
    bias_both = jnp.concatenate([bias_self, bias_cross], axis=1)       # (B*T, B*T + B*S)

    x2d = emb.reshape(BT, D_MODEL).astype(jnp.float32)
    ctx2d = context.reshape(BS, D_MODEL).astype(jnp.float32)

    out2d = run_decoder_stack(x2d, ctx2d, bias_both,
                              params['wsq'], params['wffn'], params['vec'])

    out = jnp.transpose(out2d.reshape(B, T, D_MODEL), (1, 0, 2))       # (T, B, D) time-first
    return out, None                                                   # coverage not returned


if __name__ == "__main__":
    key = jax.random.PRNGKey(0)
    k_params, k_tgt, k_src, k_ctx = jax.random.split(key, 4)
    params = init_params(k_params)

    # target / source token ids with trailing PAD, plus a random encoder context
    tgt_ids = jax.random.randint(k_tgt, (B, T), 1, VOCAB)
    tgt_ids = tgt_ids.at[0, T - 2:].set(PAD)
    tgt_ids = tgt_ids.at[1, T - 1:].set(PAD)

    src_ids = jax.random.randint(k_src, (B, S), 1, VOCAB)
    src_ids = src_ids.at[0, S - 3:].set(PAD)
    src_ids = src_ids.at[1, S - 1:].set(PAD)

    context = jax.random.normal(k_ctx, (B, S, D_MODEL), jnp.float32)

    out, coverage = transformer_decoder(tgt_ids, context, src_ids, params)
    jax.block_until_ready(out)

    assert out.shape == (T, B, D_MODEL)
    assert coverage is None
    assert bool(jnp.all(jnp.isfinite(out)))
    print("KERNEL_OK")
</pallas_src>

<mosaic_0001>
module attributes {stable_mosaic.version = 11 : i64} {
  func.func @decoder_kernel(%arg0: memref<16x32xf32, #tpu.memory_space<vmem>>, %arg1: memref<16x32xf32, #tpu.memory_space<vmem>>, %arg2: memref<16x32xf32, #tpu.memory_space<vmem>>, %arg3: memref<2x32x256xf32, #tpu.memory_space<vmem>>, %arg4: memref<2x96x64xf32, #tpu.memory_space<vmem>>, %arg5: memref<34x64xf32, #tpu.memory_space<vmem>>, %arg6: memref<16x32xf32, #tpu.memory_space<vmem>>) attributes {dimension_semantics = [], scalar_prefetch = 0 : i64, scratch_operands = 0 : i64, tpu.core_type = #tpu.core_type<tc>} {
    %c0 = arith.constant 0 : index
    %c0_0 = arith.constant 0 : index
    %0 = vector.load %arg0[%c0, %c0_0] : memref<16x32xf32, #tpu.memory_space<vmem>>, vector<16x32xf32>
    %c0_1 = arith.constant 0 : index
    %c0_2 = arith.constant 0 : index
    %1 = vector.load %arg1[%c0_1, %c0_2] : memref<16x32xf32, #tpu.memory_space<vmem>>, vector<16x32xf32>
    %c0_3 = arith.constant 0 : index
    %c0_4 = arith.constant 0 : index
    %2 = vector.load %arg2[%c0_3, %c0_4] : memref<16x32xf32, #tpu.memory_space<vmem>>, vector<16x32xf32>
    %3 = vector.extract_strided_slice %2 {offsets = [0, 0], sizes = [16, 16], strides = [1, 1]} : vector<16x32xf32> to vector<16x16xf32>
    %4 = vector.extract_strided_slice %2 {offsets = [0, 16], sizes = [16, 16], strides = [1, 1]} : vector<16x32xf32> to vector<16x16xf32>
    %c0_5 = arith.constant 0 : index
    %c0_6 = arith.constant 0 : index
    %c0_7 = arith.constant 0 : index
    %5 = vector.load %arg3[%c0_5, %c0_6, %c0_7] : memref<2x32x256xf32, #tpu.memory_space<vmem>>, vector<1x32x256xf32>
    %6 = vector.shape_cast %5 : vector<1x32x256xf32> to vector<32x256xf32>
    %c0_8 = arith.constant 0 : index
    %c0_9 = arith.constant 0 : index
    %c0_10 = arith.constant 0 : index
    %7 = vector.load %arg4[%c0_8, %c0_9, %c0_10] : memref<2x96x64xf32, #tpu.memory_space<vmem>>, vector<1x96x64xf32>
    %8 = vector.shape_cast %7 : vector<1x96x64xf32> to vector<96x64xf32>
    %9 = vector.extract_strided_slice %6 {offsets = [0, 0], sizes = [32, 96], strides = [1, 1]} : vector<32x256xf32> to vector<32x96xf32>
    %10 = vector.extract_strided_slice %6 {offsets = [0, 96], sizes = [32, 32], strides = [1, 1]} : vector<32x256xf32> to vector<32x32xf32>
    %11 = vector.extract_strided_slice %6 {offsets = [0, 128], sizes = [32, 32], strides = [1, 1]} : vector<32x256xf32> to vector<32x32xf32>
    %12 = vector.extract_strided_slice %6 {offsets = [0, 160], sizes = [32, 64], strides = [1, 1]} : vector<32x256xf32> to vector<32x64xf32>
    %13 = vector.extract_strided_slice %6 {offsets = [0, 224], sizes = [32, 32], strides = [1, 1]} : vector<32x256xf32> to vector<32x32xf32>
    %14 = vector.extract_strided_slice %8 {offsets = [0, 0], sizes = [32, 64], strides = [1, 1]} : vector<96x64xf32> to vector<32x64xf32>
    %15 = vector.extract_strided_slice %8 {offsets = [32, 0], sizes = [64, 32], strides = [1, 1]} : vector<96x64xf32> to vector<64x32xf32>
    %c0_11 = arith.constant 0 : index
    %c0_12 = arith.constant 0 : index
    %16 = vector.load %arg5[%c0_11, %c0_12] : memref<34x64xf32, #tpu.memory_space<vmem>>, vector<1x32xf32>
    %c1 = arith.constant 1 : index
    %c0_13 = arith.constant 0 : index
    %17 = vector.load %arg5[%c1, %c0_13] : memref<34x64xf32, #tpu.memory_space<vmem>>, vector<1x32xf32>
    %cst = arith.constant dense<0.000000e+00> : vector<16xf32>
    %18 = vector.multi_reduction <add>, %0, %cst [1] : vector<16x32xf32> to vector<16xf32>
    %19 = vector.shape_cast %18 : vector<16xf32> to vector<16x1xf32>
    %cst_14 = arith.constant 3.200000e+01 : f32
    %20 = vector.broadcast %cst_14 : f32 to vector<16x1xf32>
    %21 = arith.divf %19, %20 : vector<16x1xf32>
    %22 = vector.broadcast %21 : vector<16x1xf32> to vector<16x32xf32>
    %23 = arith.subf %0, %22 : vector<16x32xf32>
    %24 = arith.mulf %23, %23 : vector<16x32xf32>
    %cst_15 = arith.constant dense<0.000000e+00> : vector<16xf32>
    %25 = vector.multi_reduction <add>, %24, %cst_15 [1] : vector<16x32xf32> to vector<16xf32>
    %26 = vector.shape_cast %25 : vector<16xf32> to vector<16x1xf32>
    %cst_16 = arith.constant 3.200000e+01 : f32
    %27 = vector.broadcast %cst_16 : f32 to vector<16x1xf32>
    %28 = arith.divf %26, %27 : vector<16x1xf32>
    %cst_17 = arith.constant 9.99999974E-6 : f32
    %29 = vector.broadcast %cst_17 : f32 to vector<16x1xf32>
    %30 = arith.addf %28, %29 : vector<16x1xf32>
    %31 = math.rsqrt %30 : vector<16x1xf32>
    %32 = vector.broadcast %31 : vector<16x1xf32> to vector<16x32xf32>
    %33 = arith.mulf %23, %32 : vector<16x32xf32>
    %34 = vector.broadcast %16 : vector<1x32xf32> to vector<16x32xf32>
    %35 = arith.mulf %33, %34 : vector<16x32xf32>
    %36 = vector.broadcast %17 : vector<1x32xf32> to vector<16x32xf32>
    %37 = arith.addf %35, %36 : vector<16x32xf32>
    %cst_18 = arith.constant dense<0.000000e+00> : vector<16x96xf32>
    %38 = tpu.matmul %37, %9, %cst_18 {dimension_numbers = #tpu.dot_dimension_numbers<[1], [0], [0], [1], [0, 0, 1, 1], [], []>} : vector<16x32xf32>, vector<32x96xf32>, vector<16x96xf32> -> vector<16x96xf32>
    %39 = vector.extract_strided_slice %38 {offsets = [0, 0], sizes = [16, 32], strides = [1, 1]} : vector<16x96xf32> to vector<16x32xf32>
    %c2 = arith.constant 2 : index
    %c0_19 = arith.constant 0 : index
    %40 = vector.load %arg5[%c2, %c0_19] : memref<34x64xf32, #tpu.memory_space<vmem>>, vector<1x32xf32>
    %41 = vector.broadcast %40 : vector<1x32xf32> to vector<16x32xf32>
    %42 = arith.addf %39, %41 : vector<16x32xf32>
    %43 = vector.extract_strided_slice %38 {offsets = [0, 32], sizes = [16, 32], strides = [1, 1]} : vector<16x96xf32> to vector<16x32xf32>
    %c3 = arith.constant 3 : index
    %c0_20 = arith.constant 0 : index
    %44 = vector.load %arg5[%c3, %c0_20] : memref<34x64xf32, #tpu.memory_space<vmem>>, vector<1x32xf32>
    %45 = vector.broadcast %44 : vector<1x32xf32> to vector<16x32xf32>
    %46 = arith.addf %43, %45 : vector<16x32xf32>
    %47 = vector.extract_strided_slice %38 {offsets = [0, 64], sizes = [16, 32], strides = [1, 1]} : vector<16x96xf32> to vector<16x32xf32>
    %c4 = arith.constant 4 : index
    %c0_21 = arith.constant 0 : index
    %48 = vector.load %arg5[%c4, %c0_21] : memref<34x64xf32, #tpu.memory_space<vmem>>, vector<1x32xf32>
    %49 = vector.broadcast %48 : vector<1x32xf32> to vector<16x32xf32>
    %50 = arith.addf %47, %49 : vector<16x32xf32>
    %51 = vector.extract_strided_slice %42 {offsets = [0, 0], sizes = [16, 8], strides = [1, 1]} : vector<16x32xf32> to vector<16x8xf32>
    %52 = vector.extract_strided_slice %46 {offsets = [0, 0], sizes = [16, 8], strides = [1, 1]} : vector<16x32xf32> to vector<16x8xf32>
    %53 = vector.extract_strided_slice %50 {offsets = [0, 0], sizes = [16, 8], strides = [1, 1]} : vector<16x32xf32> to vector<16x8xf32>
    %cst_22 = arith.constant dense<0.000000e+00> : vector<16x16xf32>
    %54 = tpu.matmul %51, %52, %cst_22 {dimension_numbers = #tpu.dot_dimension_numbers<[1], [1], [0], [0], [0, 0, 1, 0], [], []>} : vector<16x8xf32>, vector<16x8xf32>, vector<16x16xf32> -> vector<16x16xf32>
    %cst_23 = arith.constant 0.353553385 : f32
    %55 = vector.broadcast %cst_23 : f32 to vector<16x16xf32>
    %56 = arith.mulf %54, %55 : vector<16x16xf32>
    %57 = arith.addf %56, %3 : vector<16x16xf32>
    %cst_24 = arith.constant dense<0xFF800000> : vector<16xf32>
    %58 = vector.multi_reduction <maximumf>, %57, %cst_24 [1] : vector<16x16xf32> to vector<16xf32>
    %59 = vector.shape_cast %58 : vector<16xf32> to vector<16x1xf32>
    %60 = vector.broadcast %59 : vector<16x1xf32> to vector<16x16xf32>
    %61 = arith.subf %57, %60 : vector<16x16xf32>
    %62 = math.exp %61 : vector<16x16xf32>
    %cst_25 = arith.constant dense<0.000000e+00> : vector<16xf32>
    %63 = vector.multi_reduction <add>, %62, %cst_25 [1] : vector<16x16xf32> to vector<16xf32>
    %64 = vector.shape_cast %63 : vector<16xf32> to vector<16x1xf32>
    %65 = tpu.reciprocal %64 {approx = true} : vector<16x1xf32> -> vector<16x1xf32>
    %66 = vector.broadcast %65 : vector<16x1xf32> to vector<16x16xf32>
    %67 = arith.mulf %62, %66 : vector<16x16xf32>
    %cst_26 = arith.constant dense<0.000000e+00> : vector<16x8xf32>
    %68 = tpu.matmul %67, %53, %cst_26 {dimension_numbers = #tpu.dot_dimension_numbers<[1], [0], [0], [1], [0, 0, 1, 1], [], []>} : vector<16x16xf32>, vector<16x8xf32>, vector<16x8xf32> -> vector<16x8xf32>
    %69 = vector.extract_strided_slice %42 {offsets = [0, 8], sizes = [16, 8], strides = [1, 1]} : vector<16x32xf32> to vector<16x8xf32>
    %70 = vector.extract_strided_slice %46 {offsets = [0, 8], sizes = [16, 8], strides = [1, 1]} : vector<16x32xf32> to vector<16x8xf32>
    %71 = vector.extract_strided_slice %50 {offsets = [0, 8], sizes = [16, 8], strides = [1, 1]} : vector<16x32xf32> to vector<16x8xf32>
    %cst_27 = arith.constant dense<0.000000e+00> : vector<16x16xf32>
    %72 = tpu.matmul %69, %70, %cst_27 {dimension_numbers = #tpu.dot_dimension_numbers<[1], [1], [0], [0], [0, 0, 1, 0], [], []>} : vector<16x8xf32>, vector<16x8xf32>, vector<16x16xf32> -> vector<16x16xf32>
    %cst_28 = arith.constant 0.353553385 : f32
    %73 = vector.broadcast %cst_28 : f32 to vector<16x16xf32>
    %74 = arith.mulf %72, %73 : vector<16x16xf32>
    %75 = arith.addf %74, %3 : vector<16x16xf32>
    %cst_29 = arith.constant dense<0xFF800000> : vector<16xf32>
    %76 = vector.multi_reduction <maximumf>, %75, %cst_29 [1] : vector<16x16xf32> to vector<16xf32>
    %77 = vector.shape_cast %76 : vector<16xf32> to vector<16x1xf32>
    %78 = vector.broadcast %77 : vector<16x1xf32> to vector<16x16xf32>
    %79 = arith.subf %75, %78 : vector<16x16xf32>
    %80 = math.exp %79 : vector<16x16xf32>
    %cst_30 = arith.constant dense<0.000000e+00> : vector<16xf32>
    %81 = vector.multi_reduction <add>, %80, %cst_30 [1] : vector<16x16xf32> to vector<16xf32>
    %82 = vector.shape_cast %81 : vector<16xf32> to vector<16x1xf32>
    %83 = tpu.reciprocal %82 {approx = true} : vector<16x1xf32> -> vector<16x1xf32>
    %84 = vector.broadcast %83 : vector<16x1xf32> to vector<16x16xf32>
    %85 = arith.mulf %80, %84 : vector<16x16xf32>
    %cst_31 = arith.constant dense<0.000000e+00> : vector<16x8xf32>
    %86 = tpu.matmul %85, %71, %cst_31 {dimension_numbers = #tpu.dot_dimension_numbers<[1], [0], [0], [1], [0, 0, 1, 1], [], []>} : vector<16x16xf32>, vector<16x8xf32>, vector<16x8xf32> -> vector<16x8xf32>
    %87 = vector.extract_strided_slice %42 {offsets = [0, 16], sizes = [16, 8], strides = [1, 1]} : vector<16x32xf32> to vector<16x8xf32>
    %88 = vector.extract_strided_slice %46 {offsets = [0, 16], sizes = [16, 8], strides = [1, 1]} : vector<16x32xf32> to vector<16x8xf32>
    %89 = vector.extract_strided_slice %50 {offsets = [0, 16], sizes = [16, 8], strides = [1, 1]} : vector<16x32xf32> to vector<16x8xf32>
    %cst_32 = arith.constant dense<0.000000e+00> : vector<16x16xf32>
    %90 = tpu.matmul %87, %88, %cst_32 {dimension_numbers = #tpu.dot_dimension_numbers<[1], [1], [0], [0], [0, 0, 1, 0], [], []>} : vector<16x8xf32>, vector<16x8xf32>, vector<16x16xf32> -> vector<16x16xf32>
    %cst_33 = arith.constant 0.353553385 : f32
    %91 = vector.broadcast %cst_33 : f32 to vector<16x16xf32>
    %92 = arith.mulf %90, %91 : vector<16x16xf32>
    %93 = arith.addf %92, %3 : vector<16x16xf32>
    %cst_34 = arith.constant dense<0xFF800000> : vector<16xf32>
    %94 = vector.multi_reduction <maximumf>, %93, %cst_34 [1] : vector<16x16xf32> to vector<16xf32>
    %95 = vector.shape_cast %94 : vector<16xf32> to vector<16x1xf32>
    %96 = vector.broadcast %95 : vector<16x1xf32> to vector<16x16xf32>
    %97 = arith.subf %93, %96 : vector<16x16xf32>
    %98 = math.exp %97 : vector<16x16xf32>
    %cst_35 = arith.constant dense<0.000000e+00> : vector<16xf32>
    %99 = vector.multi_reduction <add>, %98, %cst_35 [1] : vector<16x16xf32> to vector<16xf32>
    %100 = vector.shape_cast %99 : vector<16xf32> to vector<16x1xf32>
    %101 = tpu.reciprocal %100 {approx = true} : vector<16x1xf32> -> vector<16x1xf32>
    %102 = vector.broadcast %101 : vector<16x1xf32> to vector<16x16xf32>
    %103 = arith.mulf %98, %102 : vector<16x16xf32>
    %cst_36 = arith.constant dense<0.000000e+00> : vector<16x8xf32>
    %104 = tpu.matmul %103, %89, %cst_36 {dimension_numbers = #tpu.dot_dimension_numbers<[1], [0], [0], [1], [0, 0, 1, 1], [], []>} : vector<16x16xf32>, vector<16x8xf32>, vector<16x8xf32> -> vector<16x8xf32>
    %105 = vector.extract_strided_slice %42 {offsets = [0, 24], sizes = [16, 8], strides = [1, 1]} : vector<16x32xf32> to vector<16x8xf32>
    %106 = vector.extract_strided_slice %46 {offsets = [0, 24], sizes = [16, 8], strides = [1, 1]} : vector<16x32xf32> to vector<16x8xf32>
    %107 = vector.extract_strided_slice %50 {offsets = [0, 24], sizes = [16, 8], strides = [1, 1]} : vector<16x32xf32> to vector<16x8xf32>
    %cst_37 = arith.constant dense<0.000000e+00> : vector<16x16xf32>
    %108 = tpu.matmul %105, %106, %cst_37 {dimension_numbers = #tpu.dot_dimension_numbers<[1], [1], [0], [0], [0, 0, 1, 0], [], []>} : vector<16x8xf32>, vector<16x8xf32>, vector<16x16xf32> -> vector<16x16xf32>
    %cst_38 = arith.constant 0.353553385 : f32
    %109 = vector.broadcast %cst_38 : f32 to vector<16x16xf32>
    %110 = arith.mulf %108, %109 : vector<16x16xf32>
    %111 = arith.addf %110, %3 : vector<16x16xf32>
    %cst_39 = arith.constant dense<0xFF800000> : vector<16xf32>
    %112 = vector.multi_reduction <maximumf>, %111, %cst_39 [1] : vector<16x16xf32> to vector<16xf32>
    %113 = vector.shape_cast %112 : vector<16xf32> to vector<16x1xf32>
    %114 = vector.broadcast %113 : vector<16x1xf32> to vector<16x16xf32>
    %115 = arith.subf %111, %114 : vector<16x16xf32>
    %116 = math.exp %115 : vector<16x16xf32>
    %cst_40 = arith.constant dense<0.000000e+00> : vector<16xf32>
    %117 = vector.multi_reduction <add>, %116, %cst_40 [1] : vector<16x16xf32> to vector<16xf32>
    %118 = vector.shape_cast %117 : vector<16xf32> to vector<16x1xf32>
    %119 = tpu.reciprocal %118 {approx = true} : vector<16x1xf32> -> vector<16x1xf32>
    %120 = vector.broadcast %119 : vector<16x1xf32> to vector<16x16xf32>
    %121 = arith.mulf %116, %120 : vector<16x16xf32>
    %cst_41 = arith.constant dense<0.000000e+00> : vector<16x8xf32>
    %122 = tpu.matmul %121, %107, %cst_41 {dimension_numbers = #tpu.dot_dimension_numbers<[1], [0], [0], [1], [0, 0, 1, 1], [], []>} : vector<16x16xf32>, vector<16x8xf32>, vector<16x8xf32> -> vector<16x8xf32>
    %123 = tpu.concatenate %68, %86, %104, %122 in 1 : vector<16x8xf32>, vector<16x8xf32>, vector<16x8xf32>, vector<16x8xf32> -> vector<16x32xf32>
    %cst_42 = arith.constant dense<0.000000e+00> : vector<16x32xf32>
    %124 = tpu.matmul %123, %10, %cst_42 {dimension_numbers = #tpu.dot_dimension_numbers<[1], [0], [0], [1], [0, 0, 1, 1], [], []>} : vector<16x32xf32>, vector<32x32xf32>, vector<16x32xf32> -> vector<16x32xf32>
    %125 = arith.addf %0, %124 : vector<16x32xf32>
    %c5 = arith.constant 5 : index
    %c0_43 = arith.constant 0 : index
    %126 = vector.load %arg5[%c5, %c0_43] : memref<34x64xf32, #tpu.memory_space<vmem>>, vector<1x32xf32>
    %127 = vector.broadcast %126 : vector<1x32xf32> to vector<16x32xf32>
    %128 = arith.addf %125, %127 : vector<16x32xf32>
    %c6 = arith.constant 6 : index
    %c0_44 = arith.constant 0 : index
    %129 = vector.load %arg5[%c6, %c0_44] : memref<34x64xf32, #tpu.memory_space<vmem>>, vector<1x32xf32>
    %c7 = arith.constant 7 : index
    %c0_45 = arith.constant 0 : index
    %130 = vector.load %arg5[%c7, %c0_45] : memref<34x64xf32, #tpu.memory_space<vmem>>, vector<1x32xf32>
    %cst_46 = arith.constant dense<0.000000e+00> : vector<16xf32>
    %131 = vector.multi_reduction <add>, %128, %cst_46 [1] : vector<16x32xf32> to vector<16xf32>
    %132 = vector.shape_cast %131 : vector<16xf32> to vector<16x1xf32>
    %cst_47 = arith.constant 3.200000e+01 : f32
    %133 = vector.broadcast %cst_47 : f32 to vector<16x1xf32>
    %134 = arith.divf %132, %133 : vector<16x1xf32>
    %135 = vector.broadcast %134 : vector<16x1xf32> to vector<16x32xf32>
    %136 = arith.subf %128, %135 : vector<16x32xf32>
    %137 = arith.mulf %136, %136 : vector<16x32xf32>
    %cst_48 = arith.constant dense<0.000000e+00> : vector<16xf32>
    %138 = vector.multi_reduction <add>, %137, %cst_48 [1] : vector<16x32xf32> to vector<16xf32>
    %139 = vector.shape_cast %138 : vector<16xf32> to vector<16x1xf32>
    %cst_49 = arith.constant 3.200000e+01 : f32
    %140 = vector.broadcast %cst_49 : f32 to vector<16x1xf32>
    %141 = arith.divf %139, %140 : vector<16x1xf32>
    %cst_50 = arith.constant 9.99999974E-6 : f32
    %142 = vector.broadcast %cst_50 : f32 to vector<16x1xf32>
    %143 = arith.addf %141, %142 : vector<16x1xf32>
    %144 = math.rsqrt %143 : vector<16x1xf32>
    %145 = vector.broadcast %144 : vector<16x1xf32> to vector<16x32xf32>
    %146 = arith.mulf %136, %145 : vector<16x32xf32>
    %147 = vector.broadcast %129 : vector<1x32xf32> to vector<16x32xf32>
    %148 = arith.mulf %146, %147 : vector<16x32xf32>
    %149 = vector.broadcast %130 : vector<1x32xf32> to vector<16x32xf32>
    %150 = arith.addf %148, %149 : vector<16x32xf32>
    %cst_51 = arith.constant dense<0.000000e+00> : vector<16x32xf32>
    %151 = tpu.matmul %150, %11, %cst_51 {dimension_numbers = #tpu.dot_dimension_numbers<[1], [0], [0], [1], [0, 0, 1, 1], [], []>} : vector<16x32xf32>, vector<32x32xf32>, vector<16x32xf32> -> vector<16x32xf32>
    %c8 = arith.constant 8 : index
    %c0_52 = arith.constant 0 : index
    %152 = vector.load %arg5[%c8, %c0_52] : memref<34x64xf32, #tpu.memory_space<vmem>>, vector<1x32xf32>
    %153 = vector.broadcast %152 : vector<1x32xf32> to vector<16x32xf32>
    %154 = arith.addf %151, %153 : vector<16x32xf32>
    %cst_53 = arith.constant dense<0.000000e+00> : vector<16x64xf32>
    %155 = tpu.matmul %1, %12, %cst_53 {dimension_numbers = #tpu.dot_dimension_numbers<[1], [0], [0], [1], [0, 0, 1, 1], [], []>} : vector<16x32xf32>, vector<32x64xf32>, vector<16x64xf32> -> vector<16x64xf32>
    %156 = vector.extract_strided_slice %155 {offsets = [0, 0], sizes = [16, 32], strides = [1, 1]} : vector<16x64xf32> to vector<16x32xf32>
    %c9 = arith.constant 9 : index
    %c0_54 = arith.constant 0 : index
    %157 = vector.load %arg5[%c9, %c0_54] : memref<34x64xf32, #tpu.memory_space<vmem>>, vector<1x32xf32>
    %158 = vector.broadcast %157 : vector<1x32xf32> to vector<16x32xf32>
    %159 = arith.addf %156, %158 : vector<16x32xf32>
    %160 = vector.extract_strided_slice %155 {offsets = [0, 32], sizes = [16, 32], strides = [1, 1]} : vector<16x64xf32> to vector<16x32xf32>
    %c10 = arith.constant 10 : index
    %c0_55 = arith.constant 0 : index
    %161 = vector.load %arg5[%c10, %c0_55] : memref<34x64xf32, #tpu.memory_space<vmem>>, vector<1x32xf32>
    %162 = vector.broadcast %161 : vector<1x32xf32> to vector<16x32xf32>
    %163 = arith.addf %160, %162 : vector<16x32xf32>
    %164 = vector.extract_strided_slice %154 {offsets = [0, 0], sizes = [16, 8], strides = [1, 1]} : vector<16x32xf32> to vector<16x8xf32>
    %165 = vector.extract_strided_slice %159 {offsets = [0, 0], sizes = [16, 8], strides = [1, 1]} : vector<16x32xf32> to vector<16x8xf32>
    %166 = vector.extract_strided_slice %163 {offsets = [0, 0], sizes = [16, 8], strides = [1, 1]} : vector<16x32xf32> to vector<16x8xf32>
    %cst_56 = arith.constant dense<0.000000e+00> : vector<16x16xf32>
    %167 = tpu.matmul %164, %165, %cst_56 {dimension_numbers = #tpu.dot_dimension_numbers<[1], [1], [0], [0], [0, 0, 1, 0], [], []>} : vector<16x8xf32>, vector<16x8xf32>, vector<16x16xf32> -> vector<16x16xf32>
    %cst_57 = arith.constant 0.353553385 : f32
    %168 = vector.broadcast %cst_57 : f32 to vector<16x16xf32>
    %169 = arith.mulf %167, %168 : vector<16x16xf32>
    %170 = arith.addf %169, %4 : vector<16x16xf32>
    %cst_58 = arith.constant dense<0xFF800000> : vector<16xf32>
    %171 = vector.multi_reduction <maximumf>, %170, %cst_58 [1] : vector<16x16xf32> to vector<16xf32>
    %172 = vector.shape_cast %171 : vector<16xf32> to vector<16x1xf32>
    %173 = vector.broadcast %172 : vector<16x1xf32> to vector<16x16xf32>
    %174 = arith.subf %170, %173 : vector<16x16xf32>
    %175 = math.exp %174 : vector<16x16xf32>
    %cst_59 = arith.constant dense<0.000000e+00> : vector<16xf32>
    %176 = vector.multi_reduction <add>, %175, %cst_59 [1] : vector<16x16xf32> to vector<16xf32>
    %177 = vector.shape_cast %176 : vector<16xf32> to vector<16x1xf32>
    %178 = tpu.reciprocal %177 {approx = true} : vector<16x1xf32> -> vector<16x1xf32>
    %179 = vector.broadcast %178 : vector<16x1xf32> to vector<16x16xf32>
    %180 = arith.mulf %175, %179 : vector<16x16xf32>
    %cst_60 = arith.constant dense<0.000000e+00> : vector<16x8xf32>
    %181 = tpu.matmul %180, %166, %cst_60 {dimension_numbers = #tpu.dot_dimension_numbers<[1], [0], [0], [1], [0, 0, 1, 1], [], []>} : vector<16x16xf32>, vector<16x8xf32>, vector<16x8xf32> -> vector<16x8xf32>
    %182 = vector.extract_strided_slice %154 {offsets = [0, 8], sizes = [16, 8], strides = [1, 1]} : vector<16x32xf32> to vector<16x8xf32>
    %183 = vector.extract_strided_slice %159 {offsets = [0, 8], sizes = [16, 8], strides = [1, 1]} : vector<16x32xf32> to vector<16x8xf32>
    %184 = vector.extract_strided_slice %163 {offsets = [0, 8], sizes = [16, 8], strides = [1, 1]} : vector<16x32xf32> to vector<16x8xf32>
    %cst_61 = arith.constant dense<0.000000e+00> : vector<16x16xf32>
    %185 = tpu.matmul %182, %183, %cst_61 {dimension_numbers = #tpu.dot_dimension_numbers<[1], [1], [0], [0], [0, 0, 1, 0], [], []>} : vector<16x8xf32>, vector<16x8xf32>, vector<16x16xf32> -> vector<16x16xf32>
    %cst_62 = arith.constant 0.353553385 : f32
    %186 = vector.broadcast %cst_62 : f32 to vector<16x16xf32>
    %187 = arith.mulf %185, %186 : vector<16x16xf32>
    %188 = arith.addf %187, %4 : vector<16x16xf32>
    %cst_63 = arith.constant dense<0xFF800000> : vector<16xf32>
    %189 = vector.multi_reduction <maximumf>, %188, %cst_63 [1] : vector<16x16xf32> to vector<16xf32>
    %190 = vector.shape_cast %189 : vector<16xf32> to vector<16x1xf32>
    %191 = vector.broadcast %190 : vector<16x1xf32> to vector<16x16xf32>
    %192 = arith.subf %188, %191 : vector<16x16xf32>
    %193 = math.exp %192 : vector<16x16xf32>
    %cst_64 = arith.constant dense<0.000000e+00> : vector<16xf32>
    %194 = vector.multi_reduction <add>, %193, %cst_64 [1] : vector<16x16xf32> to vector<16xf32>
    %195 = vector.shape_cast %194 : vector<16xf32> to vector<16x1xf32>
    %196 = tpu.reciprocal %195 {approx = true} : vector<16x1xf32> -> vector<16x1xf32>
    %197 = vector.broadcast %196 : vector<16x1xf32> to vector<16x16xf32>
    %198 = arith.mulf %193, %197 : vector<16x16xf32>
    %cst_65 = arith.constant dense<0.000000e+00> : vector<16x8xf32>
    %199 = tpu.matmul %198, %184, %cst_65 {dimension_numbers = #tpu.dot_dimension_numbers<[1], [0], [0], [1], [0, 0, 1, 1], [], []>} : vector<16x16xf32>, vector<16x8xf32>, vector<16x8xf32> -> vector<16x8xf32>
    %200 = vector.extract_strided_slice %154 {offsets = [0, 16], sizes = [16, 8], strides = [1, 1]} : vector<16x32xf32> to vector<16x8xf32>
    %201 = vector.extract_strided_slice %159 {offsets = [0, 16], sizes = [16, 8], strides = [1, 1]} : vector<16x32xf32> to vector<16x8xf32>
    %202 = vector.extract_strided_slice %163 {offsets = [0, 16], sizes = [16, 8], strides = [1, 1]} : vector<16x32xf32> to vector<16x8xf32>
    %cst_66 = arith.constant dense<0.000000e+00> : vector<16x16xf32>
    %203 = tpu.matmul %200, %201, %cst_66 {dimension_numbers = #tpu.dot_dimension_numbers<[1], [1], [0], [0], [0, 0, 1, 0], [], []>} : vector<16x8xf32>, vector<16x8xf32>, vector<16x16xf32> -> vector<16x16xf32>
    %cst_67 = arith.constant 0.353553385 : f32
    %204 = vector.broadcast %cst_67 : f32 to vector<16x16xf32>
    %205 = arith.mulf %203, %204 : vector<16x16xf32>
    %206 = arith.addf %205, %4 : vector<16x16xf32>
    %cst_68 = arith.constant dense<0xFF800000> : vector<16xf32>
    %207 = vector.multi_reduction <maximumf>, %206, %cst_68 [1] : vector<16x16xf32> to vector<16xf32>
    %208 = vector.shape_cast %207 : vector<16xf32> to vector<16x1xf32>
    %209 = vector.broadcast %208 : vector<16x1xf32> to vector<16x16xf32>
    %210 = arith.subf %206, %209 : vector<16x16xf32>
    %211 = math.exp %210 : vector<16x16xf32>
    %cst_69 = arith.constant dense<0.000000e+00> : vector<16xf32>
    %212 = vector.multi_reduction <add>, %211, %cst_69 [1] : vector<16x16xf32> to vector<16xf32>
    %213 = vector.shape_cast %212 : vector<16xf32> to vector<16x1xf32>
    %214 = tpu.reciprocal %213 {approx = true} : vector<16x1xf32> -> vector<16x1xf32>
    %215 = vector.broadcast %214 : vector<16x1xf32> to vector<16x16xf32>
    %216 = arith.mulf %211, %215 : vector<16x16xf32>
    %cst_70 = arith.constant dense<0.000000e+00> : vector<16x8xf32>
    %217 = tpu.matmul %216, %202, %cst_70 {dimension_numbers = #tpu.dot_dimension_numbers<[1], [0], [0], [1], [0, 0, 1, 1], [], []>} : vector<16x16xf32>, vector<16x8xf32>, vector<16x8xf32> -> vector<16x8xf32>
    %218 = vector.extract_strided_slice %154 {offsets = [0, 24], sizes = [16, 8], strides = [1, 1]} : vector<16x32xf32> to vector<16x8xf32>
    %219 = vector.extract_strided_slice %159 {offsets = [0, 24], sizes = [16, 8], strides = [1, 1]} : vector<16x32xf32> to vector<16x8xf32>
    %220 = vector.extract_strided_slice %163 {offsets = [0, 24], sizes = [16, 8], strides = [1, 1]} : vector<16x32xf32> to vector<16x8xf32>
    %cst_71 = arith.constant dense<0.000000e+00> : vector<16x16xf32>
    %221 = tpu.matmul %218, %219, %cst_71 {dimension_numbers = #tpu.dot_dimension_numbers<[1], [1], [0], [0], [0, 0, 1, 0], [], []>} : vector<16x8xf32>, vector<16x8xf32>, vector<16x16xf32> -> vector<16x16xf32>
    %cst_72 = arith.constant 0.353553385 : f32
    %222 = vector.broadcast %cst_72 : f32 to vector<16x16xf32>
    %223 = arith.mulf %221, %222 : vector<16x16xf32>
    %224 = arith.addf %223, %4 : vector<16x16xf32>
    %cst_73 = arith.constant dense<0xFF800000> : vector<16xf32>
    %225 = vector.multi_reduction <maximumf>, %224, %cst_73 [1] : vector<16x16xf32> to vector<16xf32>
    %226 = vector.shape_cast %225 : vector<16xf32> to vector<16x1xf32>
    %227 = vector.broadcast %226 : vector<16x1xf32> to vector<16x16xf32>
    %228 = arith.subf %224, %227 : vector<16x16xf32>
    %229 = math.exp %228 : vector<16x16xf32>
    %cst_74 = arith.constant dense<0.000000e+00> : vector<16xf32>
    %230 = vector.multi_reduction <add>, %229, %cst_74 [1] : vector<16x16xf32> to vector<16xf32>
    %231 = vector.shape_cast %230 : vector<16xf32> to vector<16x1xf32>
    %232 = tpu.reciprocal %231 {approx = true} : vector<16x1xf32> -> vector<16x1xf32>
    %233 = vector.broadcast %232 : vector<16x1xf32> to vector<16x16xf32>
    %234 = arith.mulf %229, %233 : vector<16x16xf32>
    %cst_75 = arith.constant dense<0.000000e+00> : vector<16x8xf32>
    %235 = tpu.matmul %234, %220, %cst_75 {dimension_numbers = #tpu.dot_dimension_numbers<[1], [0], [0], [1], [0, 0, 1, 1], [], []>} : vector<16x16xf32>, vector<16x8xf32>, vector<16x8xf32> -> vector<16x8xf32>
    %236 = tpu.concatenate %181, %199, %217, %235 in 1 : vector<16x8xf32>, vector<16x8xf32>, vector<16x8xf32>, vector<16x8xf32> -> vector<16x32xf32>
    %cst_76 = arith.constant dense<0.000000e+00> : vector<16x32xf32>
    %237 = tpu.matmul %236, %13, %cst_76 {dimension_numbers = #tpu.dot_dimension_numbers<[1], [0], [0], [1], [0, 0, 1, 1], [], []>} : vector<16x32xf32>, vector<32x32xf32>, vector<16x32xf32> -> vector<16x32xf32>
    %238 = arith.addf %128, %237 : vector<16x32xf32>
    %c11 = arith.constant 11 : index
    %c0_77 = arith.constant 0 : index
    %239 = vector.load %arg5[%c11, %c0_77] : memref<34x64xf32, #tpu.memory_space<vmem>>, vector<1x32xf32>
    %240 = vector.broadcast %239 : vector<1x32xf32> to vector<16x32xf32>
    %241 = arith.addf %238, %240 : vector<16x32xf32>
    %c12 = arith.constant 12 : index
    %c0_78 = arith.constant 0 : index
    %242 = vector.load %arg5[%c12, %c0_78] : memref<34x64xf32, #tpu.memory_space<vmem>>, vector<1x32xf32>
    %c13 = arith.constant 13 : index
    %c0_79 = arith.constant 0 : index
    %243 = vector.load %arg5[%c13, %c0_79] : memref<34x64xf32, #tpu.memory_space<vmem>>, vector<1x32xf32>
    %cst_80 = arith.constant dense<0.000000e+00> : vector<16xf32>
    %244 = vector.multi_reduction <add>, %241, %cst_80 [1] : vector<16x32xf32> to vector<16xf32>
    %245 = vector.shape_cast %244 : vector<16xf32> to vector<16x1xf32>
    %cst_81 = arith.constant 3.200000e+01 : f32
    %246 = vector.broadcast %cst_81 : f32 to vector<16x1xf32>
    %247 = arith.divf %245, %246 : vector<16x1xf32>
    %248 = vector.broadcast %247 : vector<16x1xf32> to vector<16x32xf32>
    %249 = arith.subf %241, %248 : vector<16x32xf32>
    %250 = arith.mulf %249, %249 : vector<16x32xf32>
    %cst_82 = arith.constant dense<0.000000e+00> : vector<16xf32>
    %251 = vector.multi_reduction <add>, %250, %cst_82 [1] : vector<16x32xf32> to vector<16xf32>
    %252 = vector.shape_cast %251 : vector<16xf32> to vector<16x1xf32>
    %cst_83 = arith.constant 3.200000e+01 : f32
    %253 = vector.broadcast %cst_83 : f32 to vector<16x1xf32>
    %254 = arith.divf %252, %253 : vector<16x1xf32>
    %cst_84 = arith.constant 9.99999974E-6 : f32
    %255 = vector.broadcast %cst_84 : f32 to vector<16x1xf32>
    %256 = arith.addf %254, %255 : vector<16x1xf32>
    %257 = math.rsqrt %256 : vector<16x1xf32>
    %258 = vector.broadcast %257 : vector<16x1xf32> to vector<16x32xf32>
    %259 = arith.mulf %249, %258 : vector<16x32xf32>
    %260 = vector.broadcast %242 : vector<1x32xf32> to vector<16x32xf32>
    %261 = arith.mulf %259, %260 : vector<16x32xf32>
    %262 = vector.broadcast %243 : vector<1x32xf32> to vector<16x32xf32>
    %263 = arith.addf %261, %262 : vector<16x32xf32>
    %cst_85 = arith.constant dense<0.000000e+00> : vector<16x64xf32>
    %264 = tpu.matmul %263, %14, %cst_85 {dimension_numbers = #tpu.dot_dimension_numbers<[1], [0], [0], [1], [0, 0, 1, 1], [], []>} : vector<16x32xf32>, vector<32x64xf32>, vector<16x64xf32> -> vector<16x64xf32>
    %c14 = arith.constant 14 : index
    %c0_86 = arith.constant 0 : index
    %265 = vector.load %arg5[%c14, %c0_86] : memref<34x64xf32, #tpu.memory_space<vmem>>, vector<1x64xf32>
    %266 = vector.broadcast %265 : vector<1x64xf32> to vector<16x64xf32>
    %267 = arith.addf %264, %266 : vector<16x64xf32>
    %cst_87 = arith.constant 0.000000e+00 : f32
    %268 = vector.broadcast %cst_87 : f32 to vector<16x64xf32>
    %269 = arith.maximumf %267, %268 : vector<16x64xf32>
    %cst_88 = arith.constant dense<0.000000e+00> : vector<16x32xf32>
    %270 = tpu.matmul %269, %15, %cst_88 {dimension_numbers = #tpu.dot_dimension_numbers<[1], [0], [0], [1], [0, 0, 1, 1], [], []>} : vector<16x64xf32>, vector<64x32xf32>, vector<16x32xf32> -> vector<16x32xf32>
    %c15 = arith.constant 15 : index
    %c0_89 = arith.constant 0 : index
    %271 = vector.load %arg5[%c15, %c0_89] : memref<34x64xf32, #tpu.memory_space<vmem>>, vector<1x32xf32>
    %272 = vector.broadcast %271 : vector<1x32xf32> to vector<16x32xf32>
    %273 = arith.addf %270, %272 : vector<16x32xf32>
    %274 = arith.addf %241, %273 : vector<16x32xf32>
    %c1_90 = arith.constant 1 : index
    %c0_91 = arith.constant 0 : index
    %c0_92 = arith.constant 0 : index
    %275 = vector.load %arg3[%c1_90, %c0_91, %c0_92] : memref<2x32x256xf32, #tpu.memory_space<vmem>>, vector<1x32x256xf32>
    %276 = vector.shape_cast %275 : vector<1x32x256xf32> to vector<32x256xf32>
    %c1_93 = arith.constant 1 : index
    %c0_94 = arith.constant 0 : index
    %c0_95 = arith.constant 0 : index
    %277 = vector.load %arg4[%c1_93, %c0_94, %c0_95] : memref<2x96x64xf32, #tpu.memory_space<vmem>>, vector<1x96x64xf32>
    %278 = vector.shape_cast %277 : vector<1x96x64xf32> to vector<96x64xf32>
    %279 = vector.extract_strided_slice %276 {offsets = [0, 0], sizes = [32, 96], strides = [1, 1]} : vector<32x256xf32> to vector<32x96xf32>
    %280 = vector.extract_strided_slice %276 {offsets = [0, 96], sizes = [32, 32], strides = [1, 1]} : vector<32x256xf32> to vector<32x32xf32>
    %281 = vector.extract_strided_slice %276 {offsets = [0, 128], sizes = [32, 32], strides = [1, 1]} : vector<32x256xf32> to vector<32x32xf32>
    %282 = vector.extract_strided_slice %276 {offsets = [0, 160], sizes = [32, 64], strides = [1, 1]} : vector<32x256xf32> to vector<32x64xf32>
    %283 = vector.extract_strided_slice %276 {offsets = [0, 224], sizes = [32, 32], strides = [1, 1]} : vector<32x256xf32> to vector<32x32xf32>
    %284 = vector.extract_strided_slice %278 {offsets = [0, 0], sizes = [32, 64], strides = [1, 1]} : vector<96x64xf32> to vector<32x64xf32>
    %285 = vector.extract_strided_slice %278 {offsets = [32, 0], sizes = [64, 32], strides = [1, 1]} : vector<96x64xf32> to vector<64x32xf32>
    %c16 = arith.constant 16 : index
    %c0_96 = arith.constant 0 : index
    %286 = vector.load %arg5[%c16, %c0_96] : memref<34x64xf32, #tpu.memory_space<vmem>>, vector<1x32xf32>
    %c17 = arith.constant 17 : index
    %c0_97 = arith.constant 0 : index
    %287 = vector.load %arg5[%c17, %c0_97] : memref<34x64xf32, #tpu.memory_space<vmem>>, vector<1x32xf32>
    %cst_98 = arith.constant dense<0.000000e+00> : vector<16xf32>
    %288 = vector.multi_reduction <add>, %274, %cst_98 [1] : vector<16x32xf32> to vector<16xf32>
    %289 = vector.shape_cast %288 : vector<16xf32> to vector<16x1xf32>
    %cst_99 = arith.constant 3.200000e+01 : f32
    %290 = vector.broadcast %cst_99 : f32 to vector<16x1xf32>
    %291 = arith.divf %289, %290 : vector<16x1xf32>
    %292 = vector.broadcast %291 : vector<16x1xf32> to vector<16x32xf32>
    %293 = arith.subf %274, %292 : vector<16x32xf32>
    %294 = arith.mulf %293, %293 : vector<16x32xf32>
    %cst_100 = arith.constant dense<0.000000e+00> : vector<16xf32>
    %295 = vector.multi_reduction <add>, %294, %cst_100 [1] : vector<16x32xf32> to vector<16xf32>
    %296 = vector.shape_cast %295 : vector<16xf32> to vector<16x1xf32>
    %cst_101 = arith.constant 3.200000e+01 : f32
    %297 = vector.broadcast %cst_101 : f32 to vector<16x1xf32>
    %298 = arith.divf %296, %297 : vector<16x1xf32>
    %cst_102 = arith.constant 9.99999974E-6 : f32
    %299 = vector.broadcast %cst_102 : f32 to vector<16x1xf32>
    %300 = arith.addf %298, %299 : vector<16x1xf32>
    %301 = math.rsqrt %300 : vector<16x1xf32>
    %302 = vector.broadcast %301 : vector<16x1xf32> to vector<16x32xf32>
    %303 = arith.mulf %293, %302 : vector<16x32xf32>
    %304 = vector.broadcast %286 : vector<1x32xf32> to vector<16x32xf32>
    %305 = arith.mulf %303, %304 : vector<16x32xf32>
    %306 = vector.broadcast %287 : vector<1x32xf32> to vector<16x32xf32>
    %307 = arith.addf %305, %306 : vector<16x32xf32>
    %cst_103 = arith.constant dense<0.000000e+00> : vector<16x96xf32>
    %308 = tpu.matmul %307, %279, %cst_103 {dimension_numbers = #tpu.dot_dimension_numbers<[1], [0], [0], [1], [0, 0, 1, 1], [], []>} : vector<16x32xf32>, vector<32x96xf32>, vector<16x96xf32> -> vector<16x96xf32>
    %309 = vector.extract_strided_slice %308 {offsets = [0, 0], sizes = [16, 32], strides = [1, 1]} : vector<16x96xf32> to vector<16x32xf32>
    %c18 = arith.constant 18 : index
    %c0_104 = arith.constant 0 : index
    %310 = vector.load %arg5[%c18, %c0_104] : memref<34x64xf32, #tpu.memory_space<vmem>>, vector<1x32xf32>
    %311 = vector.broadcast %310 : vector<1x32xf32> to vector<16x32xf32>
    %312 = arith.addf %309, %311 : vector<16x32xf32>
    %313 = vector.extract_strided_slice %308 {offsets = [0, 32], sizes = [16, 32], strides = [1, 1]} : vector<16x96xf32> to vector<16x32xf32>
    %c19 = arith.constant 19 : index
    %c0_105 = arith.constant 0 : index
    %314 = vector.load %arg5[%c19, %c0_105] : memref<34x64xf32, #tpu.memory_space<vmem>>, vector<1x32xf32>
    %315 = vector.broadcast %314 : vector<1x32xf32> to vector<16x32xf32>
    %316 = arith.addf %313, %315 : vector<16x32xf32>
    %317 = vector.extract_strided_slice %308 {offsets = [0, 64], sizes = [16, 32], strides = [1, 1]} : vector<16x96xf32> to vector<16x32xf32>
    %c20 = arith.constant 20 : index
    %c0_106 = arith.constant 0 : index
    %318 = vector.load %arg5[%c20, %c0_106] : memref<34x64xf32, #tpu.memory_space<vmem>>, vector<1x32xf32>
    %319 = vector.broadcast %318 : vector<1x32xf32> to vector<16x32xf32>
    %320 = arith.addf %317, %319 : vector<16x32xf32>
    %321 = vector.extract_strided_slice %312 {offsets = [0, 0], sizes = [16, 8], strides = [1, 1]} : vector<16x32xf32> to vector<16x8xf32>
    %322 = vector.extract_strided_slice %316 {offsets = [0, 0], sizes = [16, 8], strides = [1, 1]} : vector<16x32xf32> to vector<16x8xf32>
    %323 = vector.extract_strided_slice %320 {offsets = [0, 0], sizes = [16, 8], strides = [1, 1]} : vector<16x32xf32> to vector<16x8xf32>
    %cst_107 = arith.constant dense<0.000000e+00> : vector<16x16xf32>
    %324 = tpu.matmul %321, %322, %cst_107 {dimension_numbers = #tpu.dot_dimension_numbers<[1], [1], [0], [0], [0, 0, 1, 0], [], []>} : vector<16x8xf32>, vector<16x8xf32>, vector<16x16xf32> -> vector<16x16xf32>
    %cst_108 = arith.constant 0.353553385 : f32
    %325 = vector.broadcast %cst_108 : f32 to vector<16x16xf32>
    %326 = arith.mulf %324, %325 : vector<16x16xf32>
    %327 = arith.addf %326, %3 : vector<16x16xf32>
    %cst_109 = arith.constant dense<0xFF800000> : vector<16xf32>
    %328 = vector.multi_reduction <maximumf>, %327, %cst_109 [1] : vector<16x16xf32> to vector<16xf32>
    %329 = vector.shape_cast %328 : vector<16xf32> to vector<16x1xf32>
    %330 = vector.broadcast %329 : vector<16x1xf32> to vector<16x16xf32>
    %331 = arith.subf %327, %330 : vector<16x16xf32>
    %332 = math.exp %331 : vector<16x16xf32>
    %cst_110 = arith.constant dense<0.000000e+00> : vector<16xf32>
    %333 = vector.multi_reduction <add>, %332, %cst_110 [1] : vector<16x16xf32> to vector<16xf32>
    %334 = vector.shape_cast %333 : vector<16xf32> to vector<16x1xf32>
    %335 = tpu.reciprocal %334 {approx = true} : vector<16x1xf32> -> vector<16x1xf32>
    %336 = vector.broadcast %335 : vector<16x1xf32> to vector<16x16xf32>
    %337 = arith.mulf %332, %336 : vector<16x16xf32>
    %cst_111 = arith.constant dense<0.000000e+00> : vector<16x8xf32>
    %338 = tpu.matmul %337, %323, %cst_111 {dimension_numbers = #tpu.dot_dimension_numbers<[1], [0], [0], [1], [0, 0, 1, 1], [], []>} : vector<16x16xf32>, vector<16x8xf32>, vector<16x8xf32> -> vector<16x8xf32>
    %339 = vector.extract_strided_slice %312 {offsets = [0, 8], sizes = [16, 8], strides = [1, 1]} : vector<16x32xf32> to vector<16x8xf32>
    %340 = vector.extract_strided_slice %316 {offsets = [0, 8], sizes = [16, 8], strides = [1, 1]} : vector<16x32xf32> to vector<16x8xf32>
    %341 = vector.extract_strided_slice %320 {offsets = [0, 8], sizes = [16, 8], strides = [1, 1]} : vector<16x32xf32> to vector<16x8xf32>
    %cst_112 = arith.constant dense<0.000000e+00> : vector<16x16xf32>
    %342 = tpu.matmul %339, %340, %cst_112 {dimension_numbers = #tpu.dot_dimension_numbers<[1], [1], [0], [0], [0, 0, 1, 0], [], []>} : vector<16x8xf32>, vector<16x8xf32>, vector<16x16xf32> -> vector<16x16xf32>
    %cst_113 = arith.constant 0.353553385 : f32
    %343 = vector.broadcast %cst_113 : f32 to vector<16x16xf32>
    %344 = arith.mulf %342, %343 : vector<16x16xf32>
    %345 = arith.addf %344, %3 : vector<16x16xf32>
    %cst_114 = arith.constant dense<0xFF800000> : vector<16xf32>
    %346 = vector.multi_reduction <maximumf>, %345, %cst_114 [1] : vector<16x16xf32> to vector<16xf32>
    %347 = vector.shape_cast %346 : vector<16xf32> to vector<16x1xf32>
    %348 = vector.broadcast %347 : vector<16x1xf32> to vector<16x16xf32>
    %349 = arith.subf %345, %348 : vector<16x16xf32>
    %350 = math.exp %349 : vector<16x16xf32>
    %cst_115 = arith.constant dense<0.000000e+00> : vector<16xf32>
    %351 = vector.multi_reduction <add>, %350, %cst_115 [1] : vector<16x16xf32> to vector<16xf32>
    %352 = vector.shape_cast %351 : vector<16xf32> to vector<16x1xf32>
    %353 = tpu.reciprocal %352 {approx = true} : vector<16x1xf32> -> vector<16x1xf32>
    %354 = vector.broadcast %353 : vector<16x1xf32> to vector<16x16xf32>
    %355 = arith.mulf %350, %354 : vector<16x16xf32>
    %cst_116 = arith.constant dense<0.000000e+00> : vector<16x8xf32>
    %356 = tpu.matmul %355, %341, %cst_116 {dimension_numbers = #tpu.dot_dimension_numbers<[1], [0], [0], [1], [0, 0, 1, 1], [], []>} : vector<16x16xf32>, vector<16x8xf32>, vector<16x8xf32> -> vector<16x8xf32>
    %357 = vector.extract_strided_slice %312 {offsets = [0, 16], sizes = [16, 8], strides = [1, 1]} : vector<16x32xf32> to vector<16x8xf32>
    %358 = vector.extract_strided_slice %316 {offsets = [0, 16], sizes = [16, 8], strides = [1, 1]} : vector<16x32xf32> to vector<16x8xf32>
    %359 = vector.extract_strided_slice %320 {offsets = [0, 16], sizes = [16, 8], strides = [1, 1]} : vector<16x32xf32> to vector<16x8xf32>
    %cst_117 = arith.constant dense<0.000000e+00> : vector<16x16xf32>
    %360 = tpu.matmul %357, %358, %cst_117 {dimension_numbers = #tpu.dot_dimension_numbers<[1], [1], [0], [0], [0, 0, 1, 0], [], []>} : vector<16x8xf32>, vector<16x8xf32>, vector<16x16xf32> -> vector<16x16xf32>
    %cst_118 = arith.constant 0.353553385 : f32
    %361 = vector.broadcast %cst_118 : f32 to vector<16x16xf32>
    %362 = arith.mulf %360, %361 : vector<16x16xf32>
    %363 = arith.addf %362, %3 : vector<16x16xf32>
    %cst_119 = arith.constant dense<0xFF800000> : vector<16xf32>
    %364 = vector.multi_reduction <maximumf>, %363, %cst_119 [1] : vector<16x16xf32> to vector<16xf32>
    %365 = vector.shape_cast %364 : vector<16xf32> to vector<16x1xf32>
    %366 = vector.broadcast %365 : vector<16x1xf32> to vector<16x16xf32>
    %367 = arith.subf %363, %366 : vector<16x16xf32>
    %368 = math.exp %367 : vector<16x16xf32>
    %cst_120 = arith.constant dense<0.000000e+00> : vector<16xf32>
    %369 = vector.multi_reduction <add>, %368, %cst_120 [1] : vector<16x16xf32> to vector<16xf32>
    %370 = vector.shape_cast %369 : vector<16xf32> to vector<16x1xf32>
    %371 = tpu.reciprocal %370 {approx = true} : vector<16x1xf32> -> vector<16x1xf32>
    %372 = vector.broadcast %371 : vector<16x1xf32> to vector<16x16xf32>
    %373 = arith.mulf %368, %372 : vector<16x16xf32>
    %cst_121 = arith.constant dense<0.000000e+00> : vector<16x8xf32>
    %374 = tpu.matmul %373, %359, %cst_121 {dimension_numbers = #tpu.dot_dimension_numbers<[1], [0], [0], [1], [0, 0, 1, 1], [], []>} : vector<16x16xf32>, vector<16x8xf32>, vector<16x8xf32> -> vector<16x8xf32>
    %375 = vector.extract_strided_slice %312 {offsets = [0, 24], sizes = [16, 8], strides = [1, 1]} : vector<16x32xf32> to vector<16x8xf32>
    %376 = vector.extract_strided_slice %316 {offsets = [0, 24], sizes = [16, 8], strides = [1, 1]} : vector<16x32xf32> to vector<16x8xf32>
    %377 = vector.extract_strided_slice %320 {offsets = [0, 24], sizes = [16, 8], strides = [1, 1]} : vector<16x32xf32> to vector<16x8xf32>
    %cst_122 = arith.constant dense<0.000000e+00> : vector<16x16xf32>
    %378 = tpu.matmul %375, %376, %cst_122 {dimension_numbers = #tpu.dot_dimension_numbers<[1], [1], [0], [0], [0, 0, 1, 0], [], []>} : vector<16x8xf32>, vector<16x8xf32>, vector<16x16xf32> -> vector<16x16xf32>
    %cst_123 = arith.constant 0.353553385 : f32
    %379 = vector.broadcast %cst_123 : f32 to vector<16x16xf32>
    %380 = arith.mulf %378, %379 : vector<16x16xf32>
    %381 = arith.addf %380, %3 : vector<16x16xf32>
    %cst_124 = arith.constant dense<0xFF800000> : vector<16xf32>
    %382 = vector.multi_reduction <maximumf>, %381, %cst_124 [1] : vector<16x16xf32> to vector<16xf32>
    %383 = vector.shape_cast %382 : vector<16xf32> to vector<16x1xf32>
    %384 = vector.broadcast %383 : vector<16x1xf32> to vector<16x16xf32>
    %385 = arith.subf %381, %384 : vector<16x16xf32>
    %386 = math.exp %385 : vector<16x16xf32>
    %cst_125 = arith.constant dense<0.000000e+00> : vector<16xf32>
    %387 = vector.multi_reduction <add>, %386, %cst_125 [1] : vector<16x16xf32> to vector<16xf32>
    %388 = vector.shape_cast %387 : vector<16xf32> to vector<16x1xf32>
    %389 = tpu.reciprocal %388 {approx = true} : vector<16x1xf32> -> vector<16x1xf32>
    %390 = vector.broadcast %389 : vector<16x1xf32> to vector<16x16xf32>
    %391 = arith.mulf %386, %390 : vector<16x16xf32>
    %cst_126 = arith.constant dense<0.000000e+00> : vector<16x8xf32>
    %392 = tpu.matmul %391, %377, %cst_126 {dimension_numbers = #tpu.dot_dimension_numbers<[1], [0], [0], [1], [0, 0, 1, 1], [], []>} : vector<16x16xf32>, vector<16x8xf32>, vector<16x8xf32> -> vector<16x8xf32>
    %393 = tpu.concatenate %338, %356, %374, %392 in 1 : vector<16x8xf32>, vector<16x8xf32>, vector<16x8xf32>, vector<16x8xf32> -> vector<16x32xf32>
    %cst_127 = arith.constant dense<0.000000e+00> : vector<16x32xf32>
    %394 = tpu.matmul %393, %280, %cst_127 {dimension_numbers = #tpu.dot_dimension_numbers<[1], [0], [0], [1], [0, 0, 1, 1], [], []>} : vector<16x32xf32>, vector<32x32xf32>, vector<16x32xf32> -> vector<16x32xf32>
    %395 = arith.addf %274, %394 : vector<16x32xf32>
    %c21 = arith.constant 21 : index
    %c0_128 = arith.constant 0 : index
    %396 = vector.load %arg5[%c21, %c0_128] : memref<34x64xf32, #tpu.memory_space<vmem>>, vector<1x32xf32>
    %397 = vector.broadcast %396 : vector<1x32xf32> to vector<16x32xf32>
    %398 = arith.addf %395, %397 : vector<16x32xf32>
    %c22 = arith.constant 22 : index
    %c0_129 = arith.constant 0 : index
    %399 = vector.load %arg5[%c22, %c0_129] : memref<34x64xf32, #tpu.memory_space<vmem>>, vector<1x32xf32>
    %c23 = arith.constant 23 : index
    %c0_130 = arith.constant 0 : index
    %400 = vector.load %arg5[%c23, %c0_130] : memref<34x64xf32, #tpu.memory_space<vmem>>, vector<1x32xf32>
    %cst_131 = arith.constant dense<0.000000e+00> : vector<16xf32>
    %401 = vector.multi_reduction <add>, %398, %cst_131 [1] : vector<16x32xf32> to vector<16xf32>
    %402 = vector.shape_cast %401 : vector<16xf32> to vector<16x1xf32>
    %cst_132 = arith.constant 3.200000e+01 : f32
    %403 = vector.broadcast %cst_132 : f32 to vector<16x1xf32>
    %404 = arith.divf %402, %403 : vector<16x1xf32>
    %405 = vector.broadcast %404 : vector<16x1xf32> to vector<16x32xf32>
    %406 = arith.subf %398, %405 : vector<16x32xf32>
    %407 = arith.mulf %406, %406 : vector<16x32xf32>
    %cst_133 = arith.constant dense<0.000000e+00> : vector<16xf32>
    %408 = vector.multi_reduction <add>, %407, %cst_133 [1] : vector<16x32xf32> to vector<16xf32>
    %409 = vector.shape_cast %408 : vector<16xf32> to vector<16x1xf32>
    %cst_134 = arith.constant 3.200000e+01 : f32
    %410 = vector.broadcast %cst_134 : f32 to vector<16x1xf32>
    %411 = arith.divf %409, %410 : vector<16x1xf32>
    %cst_135 = arith.constant 9.99999974E-6 : f32
    %412 = vector.broadcast %cst_135 : f32 to vector<16x1xf32>
    %413 = arith.addf %411, %412 : vector<16x1xf32>
    %414 = math.rsqrt %413 : vector<16x1xf32>
    %415 = vector.broadcast %414 : vector<16x1xf32> to vector<16x32xf32>
    %416 = arith.mulf %406, %415 : vector<16x32xf32>
    %417 = vector.broadcast %399 : vector<1x32xf32> to vector<16x32xf32>
    %418 = arith.mulf %416, %417 : vector<16x32xf32>
    %419 = vector.broadcast %400 : vector<1x32xf32> to vector<16x32xf32>
    %420 = arith.addf %418, %419 : vector<16x32xf32>
    %cst_136 = arith.constant dense<0.000000e+00> : vector<16x32xf32>
    %421 = tpu.matmul %420, %281, %cst_136 {dimension_numbers = #tpu.dot_dimension_numbers<[1], [0], [0], [1], [0, 0, 1, 1], [], []>} : vector<16x32xf32>, vector<32x32xf32>, vector<16x32xf32> -> vector<16x32xf32>
    %c24 = arith.constant 24 : index
    %c0_137 = arith.constant 0 : index
    %422 = vector.load %arg5[%c24, %c0_137] : memref<34x64xf32, #tpu.memory_space<vmem>>, vector<1x32xf32>
    %423 = vector.broadcast %422 : vector<1x32xf32> to vector<16x32xf32>
    %424 = arith.addf %421, %423 : vector<16x32xf32>
    %cst_138 = arith.constant dense<0.000000e+00> : vector<16x64xf32>
    %425 = tpu.matmul %1, %282, %cst_138 {dimension_numbers = #tpu.dot_dimension_numbers<[1], [0], [0], [1], [0, 0, 1, 1], [], []>} : vector<16x32xf32>, vector<32x64xf32>, vector<16x64xf32> -> vector<16x64xf32>
    %426 = vector.extract_strided_slice %425 {offsets = [0, 0], sizes = [16, 32], strides = [1, 1]} : vector<16x64xf32> to vector<16x32xf32>
    %c25 = arith.constant 25 : index
    %c0_139 = arith.constant 0 : index
    %427 = vector.load %arg5[%c25, %c0_139] : memref<34x64xf32, #tpu.memory_space<vmem>>, vector<1x32xf32>
    %428 = vector.broadcast %427 : vector<1x32xf32> to vector<16x32xf32>
    %429 = arith.addf %426, %428 : vector<16x32xf32>
    %430 = vector.extract_strided_slice %425 {offsets = [0, 32], sizes = [16, 32], strides = [1, 1]} : vector<16x64xf32> to vector<16x32xf32>
    %c26 = arith.constant 26 : index
    %c0_140 = arith.constant 0 : index
    %431 = vector.load %arg5[%c26, %c0_140] : memref<34x64xf32, #tpu.memory_space<vmem>>, vector<1x32xf32>
    %432 = vector.broadcast %431 : vector<1x32xf32> to vector<16x32xf32>
    %433 = arith.addf %430, %432 : vector<16x32xf32>
    %434 = vector.extract_strided_slice %424 {offsets = [0, 0], sizes = [16, 8], strides = [1, 1]} : vector<16x32xf32> to vector<16x8xf32>
    %435 = vector.extract_strided_slice %429 {offsets = [0, 0], sizes = [16, 8], strides = [1, 1]} : vector<16x32xf32> to vector<16x8xf32>
    %436 = vector.extract_strided_slice %433 {offsets = [0, 0], sizes = [16, 8], strides = [1, 1]} : vector<16x32xf32> to vector<16x8xf32>
    %cst_141 = arith.constant dense<0.000000e+00> : vector<16x16xf32>
    %437 = tpu.matmul %434, %435, %cst_141 {dimension_numbers = #tpu.dot_dimension_numbers<[1], [1], [0], [0], [0, 0, 1, 0], [], []>} : vector<16x8xf32>, vector<16x8xf32>, vector<16x16xf32> -> vector<16x16xf32>
    %cst_142 = arith.constant 0.353553385 : f32
    %438 = vector.broadcast %cst_142 : f32 to vector<16x16xf32>
    %439 = arith.mulf %437, %438 : vector<16x16xf32>
    %440 = arith.addf %439, %4 : vector<16x16xf32>
    %cst_143 = arith.constant dense<0xFF800000> : vector<16xf32>
    %441 = vector.multi_reduction <maximumf>, %440, %cst_143 [1] : vector<16x16xf32> to vector<16xf32>
    %442 = vector.shape_cast %441 : vector<16xf32> to vector<16x1xf32>
    %443 = vector.broadcast %442 : vector<16x1xf32> to vector<16x16xf32>
    %444 = arith.subf %440, %443 : vector<16x16xf32>
    %445 = math.exp %444 : vector<16x16xf32>
    %cst_144 = arith.constant dense<0.000000e+00> : vector<16xf32>
    %446 = vector.multi_reduction <add>, %445, %cst_144 [1] : vector<16x16xf32> to vector<16xf32>
    %447 = vector.shape_cast %446 : vector<16xf32> to vector<16x1xf32>
    %448 = tpu.reciprocal %447 {approx = true} : vector<16x1xf32> -> vector<16x1xf32>
    %449 = vector.broadcast %448 : vector<16x1xf32> to vector<16x16xf32>
    %450 = arith.mulf %445, %449 : vector<16x16xf32>
    %cst_145 = arith.constant dense<0.000000e+00> : vector<16x8xf32>
    %451 = tpu.matmul %450, %436, %cst_145 {dimension_numbers = #tpu.dot_dimension_numbers<[1], [0], [0], [1], [0, 0, 1, 1], [], []>} : vector<16x16xf32>, vector<16x8xf32>, vector<16x8xf32> -> vector<16x8xf32>
    %452 = vector.extract_strided_slice %424 {offsets = [0, 8], sizes = [16, 8], strides = [1, 1]} : vector<16x32xf32> to vector<16x8xf32>
    %453 = vector.extract_strided_slice %429 {offsets = [0, 8], sizes = [16, 8], strides = [1, 1]} : vector<16x32xf32> to vector<16x8xf32>
    %454 = vector.extract_strided_slice %433 {offsets = [0, 8], sizes = [16, 8], strides = [1, 1]} : vector<16x32xf32> to vector<16x8xf32>
    %cst_146 = arith.constant dense<0.000000e+00> : vector<16x16xf32>
    %455 = tpu.matmul %452, %453, %cst_146 {dimension_numbers = #tpu.dot_dimension_numbers<[1], [1], [0], [0], [0, 0, 1, 0], [], []>} : vector<16x8xf32>, vector<16x8xf32>, vector<16x16xf32> -> vector<16x16xf32>
    %cst_147 = arith.constant 0.353553385 : f32
    %456 = vector.broadcast %cst_147 : f32 to vector<16x16xf32>
    %457 = arith.mulf %455, %456 : vector<16x16xf32>
    %458 = arith.addf %457, %4 : vector<16x16xf32>
    %cst_148 = arith.constant dense<0xFF800000> : vector<16xf32>
    %459 = vector.multi_reduction <maximumf>, %458, %cst_148 [1] : vector<16x16xf32> to vector<16xf32>
    %460 = vector.shape_cast %459 : vector<16xf32> to vector<16x1xf32>
    %461 = vector.broadcast %460 : vector<16x1xf32> to vector<16x16xf32>
    %462 = arith.subf %458, %461 : vector<16x16xf32>
    %463 = math.exp %462 : vector<16x16xf32>
    %cst_149 = arith.constant dense<0.000000e+00> : vector<16xf32>
    %464 = vector.multi_reduction <add>, %463, %cst_149 [1] : vector<16x16xf32> to vector<16xf32>
    %465 = vector.shape_cast %464 : vector<16xf32> to vector<16x1xf32>
    %466 = tpu.reciprocal %465 {approx = true} : vector<16x1xf32> -> vector<16x1xf32>
    %467 = vector.broadcast %466 : vector<16x1xf32> to vector<16x16xf32>
    %468 = arith.mulf %463, %467 : vector<16x16xf32>
    %cst_150 = arith.constant dense<0.000000e+00> : vector<16x8xf32>
    %469 = tpu.matmul %468, %454, %cst_150 {dimension_numbers = #tpu.dot_dimension_numbers<[1], [0], [0], [1], [0, 0, 1, 1], [], []>} : vector<16x16xf32>, vector<16x8xf32>, vector<16x8xf32> -> vector<16x8xf32>
    %470 = vector.extract_strided_slice %424 {offsets = [0, 16], sizes = [16, 8], strides = [1, 1]} : vector<16x32xf32> to vector<16x8xf32>
    %471 = vector.extract_strided_slice %429 {offsets = [0, 16], sizes = [16, 8], strides = [1, 1]} : vector<16x32xf32> to vector<16x8xf32>
    %472 = vector.extract_strided_slice %433 {offsets = [0, 16], sizes = [16, 8], strides = [1, 1]} : vector<16x32xf32> to vector<16x8xf32>
    %cst_151 = arith.constant dense<0.000000e+00> : vector<16x16xf32>
    %473 = tpu.matmul %470, %471, %cst_151 {dimension_numbers = #tpu.dot_dimension_numbers<[1], [1], [0], [0], [0, 0, 1, 0], [], []>} : vector<16x8xf32>, vector<16x8xf32>, vector<16x16xf32> -> vector<16x16xf32>
    %cst_152 = arith.constant 0.353553385 : f32
    %474 = vector.broadcast %cst_152 : f32 to vector<16x16xf32>
    %475 = arith.mulf %473, %474 : vector<16x16xf32>
    %476 = arith.addf %475, %4 : vector<16x16xf32>
    %cst_153 = arith.constant dense<0xFF800000> : vector<16xf32>
    %477 = vector.multi_reduction <maximumf>, %476, %cst_153 [1] : vector<16x16xf32> to vector<16xf32>
    %478 = vector.shape_cast %477 : vector<16xf32> to vector<16x1xf32>
    %479 = vector.broadcast %478 : vector<16x1xf32> to vector<16x16xf32>
    %480 = arith.subf %476, %479 : vector<16x16xf32>
    %481 = math.exp %480 : vector<16x16xf32>
    %cst_154 = arith.constant dense<0.000000e+00> : vector<16xf32>
    %482 = vector.multi_reduction <add>, %481, %cst_154 [1] : vector<16x16xf32> to vector<16xf32>
    %483 = vector.shape_cast %482 : vector<16xf32> to vector<16x1xf32>
    %484 = tpu.reciprocal %483 {approx = true} : vector<16x1xf32> -> vector<16x1xf32>
    %485 = vector.broadcast %484 : vector<16x1xf32> to vector<16x16xf32>
    %486 = arith.mulf %481, %485 : vector<16x16xf32>
    %cst_155 = arith.constant dense<0.000000e+00> : vector<16x8xf32>
    %487 = tpu.matmul %486, %472, %cst_155 {dimension_numbers = #tpu.dot_dimension_numbers<[1], [0], [0], [1], [0, 0, 1, 1], [], []>} : vector<16x16xf32>, vector<16x8xf32>, vector<16x8xf32> -> vector<16x8xf32>
    %488 = vector.extract_strided_slice %424 {offsets = [0, 24], sizes = [16, 8], strides = [1, 1]} : vector<16x32xf32> to vector<16x8xf32>
    %489 = vector.extract_strided_slice %429 {offsets = [0, 24], sizes = [16, 8], strides = [1, 1]} : vector<16x32xf32> to vector<16x8xf32>
    %490 = vector.extract_strided_slice %433 {offsets = [0, 24], sizes = [16, 8], strides = [1, 1]} : vector<16x32xf32> to vector<16x8xf32>
    %cst_156 = arith.constant dense<0.000000e+00> : vector<16x16xf32>
    %491 = tpu.matmul %488, %489, %cst_156 {dimension_numbers = #tpu.dot_dimension_numbers<[1], [1], [0], [0], [0, 0, 1, 0], [], []>} : vector<16x8xf32>, vector<16x8xf32>, vector<16x16xf32> -> vector<16x16xf32>
    %cst_157 = arith.constant 0.353553385 : f32
    %492 = vector.broadcast %cst_157 : f32 to vector<16x16xf32>
    %493 = arith.mulf %491, %492 : vector<16x16xf32>
    %494 = arith.addf %493, %4 : vector<16x16xf32>
    %cst_158 = arith.constant dense<0xFF800000> : vector<16xf32>
    %495 = vector.multi_reduction <maximumf>, %494, %cst_158 [1] : vector<16x16xf32> to vector<16xf32>
    %496 = vector.shape_cast %495 : vector<16xf32> to vector<16x1xf32>
    %497 = vector.broadcast %496 : vector<16x1xf32> to vector<16x16xf32>
    %498 = arith.subf %494, %497 : vector<16x16xf32>
    %499 = math.exp %498 : vector<16x16xf32>
    %cst_159 = arith.constant dense<0.000000e+00> : vector<16xf32>
    %500 = vector.multi_reduction <add>, %499, %cst_159 [1] : vector<16x16xf32> to vector<16xf32>
    %501 = vector.shape_cast %500 : vector<16xf32> to vector<16x1xf32>
    %502 = tpu.reciprocal %501 {approx = true} : vector<16x1xf32> -> vector<16x1xf32>
    %503 = vector.broadcast %502 : vector<16x1xf32> to vector<16x16xf32>
    %504 = arith.mulf %499, %503 : vector<16x16xf32>
    %cst_160 = arith.constant dense<0.000000e+00> : vector<16x8xf32>
    %505 = tpu.matmul %504, %490, %cst_160 {dimension_numbers = #tpu.dot_dimension_numbers<[1], [0], [0], [1], [0, 0, 1, 1], [], []>} : vector<16x16xf32>, vector<16x8xf32>, vector<16x8xf32> -> vector<16x8xf32>
    %506 = tpu.concatenate %451, %469, %487, %505 in 1 : vector<16x8xf32>, vector<16x8xf32>, vector<16x8xf32>, vector<16x8xf32> -> vector<16x32xf32>
    %cst_161 = arith.constant dense<0.000000e+00> : vector<16x32xf32>
    %507 = tpu.matmul %506, %283, %cst_161 {dimension_numbers = #tpu.dot_dimension_numbers<[1], [0], [0], [1], [0, 0, 1, 1], [], []>} : vector<16x32xf32>, vector<32x32xf32>, vector<16x32xf32> -> vector<16x32xf32>
    %508 = arith.addf %398, %507 : vector<16x32xf32>
    %c27 = arith.constant 27 : index
    %c0_162 = arith.constant 0 : index
    %509 = vector.load %arg5[%c27, %c0_162] : memref<34x64xf32, #tpu.memory_space<vmem>>, vector<1x32xf32>
    %510 = vector.broadcast %509 : vector<1x32xf32> to vector<16x32xf32>
    %511 = arith.addf %508, %510 : vector<16x32xf32>
    %c28 = arith.constant 28 : index
    %c0_163 = arith.constant 0 : index
    %512 = vector.load %arg5[%c28, %c0_163] : memref<34x64xf32, #tpu.memory_space<vmem>>, vector<1x32xf32>
    %c29 = arith.constant 29 : index
    %c0_164 = arith.constant 0 : index
    %513 = vector.load %arg5[%c29, %c0_164] : memref<34x64xf32, #tpu.memory_space<vmem>>, vector<1x32xf32>
    %cst_165 = arith.constant dense<0.000000e+00> : vector<16xf32>
    %514 = vector.multi_reduction <add>, %511, %cst_165 [1] : vector<16x32xf32> to vector<16xf32>
    %515 = vector.shape_cast %514 : vector<16xf32> to vector<16x1xf32>
    %cst_166 = arith.constant 3.200000e+01 : f32
    %516 = vector.broadcast %cst_166 : f32 to vector<16x1xf32>
    %517 = arith.divf %515, %516 : vector<16x1xf32>
    %518 = vector.broadcast %517 : vector<16x1xf32> to vector<16x32xf32>
    %519 = arith.subf %511, %518 : vector<16x32xf32>
    %520 = arith.mulf %519, %519 : vector<16x32xf32>
    %cst_167 = arith.constant dense<0.000000e+00> : vector<16xf32>
    %521 = vector.multi_reduction <add>, %520, %cst_167 [1] : vector<16x32xf32> to vector<16xf32>
    %522 = vector.shape_cast %521 : vector<16xf32> to vector<16x1xf32>
    %cst_168 = arith.constant 3.200000e+01 : f32
    %523 = vector.broadcast %cst_168 : f32 to vector<16x1xf32>
    %524 = arith.divf %522, %523 : vector<16x1xf32>
    %cst_169 = arith.constant 9.99999974E-6 : f32
    %525 = vector.broadcast %cst_169 : f32 to vector<16x1xf32>
    %526 = arith.addf %524, %525 : vector<16x1xf32>
    %527 = math.rsqrt %526 : vector<16x1xf32>
    %528 = vector.broadcast %527 : vector<16x1xf32> to vector<16x32xf32>
    %529 = arith.mulf %519, %528 : vector<16x32xf32>
    %530 = vector.broadcast %512 : vector<1x32xf32> to vector<16x32xf32>
    %531 = arith.mulf %529, %530 : vector<16x32xf32>
    %532 = vector.broadcast %513 : vector<1x32xf32> to vector<16x32xf32>
    %533 = arith.addf %531, %532 : vector<16x32xf32>
    %cst_170 = arith.constant dense<0.000000e+00> : vector<16x64xf32>
    %534 = tpu.matmul %533, %284, %cst_170 {dimension_numbers = #tpu.dot_dimension_numbers<[1], [0], [0], [1], [0, 0, 1, 1], [], []>} : vector<16x32xf32>, vector<32x64xf32>, vector<16x64xf32> -> vector<16x64xf32>
    %c30 = arith.constant 30 : index
    %c0_171 = arith.constant 0 : index
    %535 = vector.load %arg5[%c30, %c0_171] : memref<34x64xf32, #tpu.memory_space<vmem>>, vector<1x64xf32>
    %536 = vector.broadcast %535 : vector<1x64xf32> to vector<16x64xf32>
    %537 = arith.addf %534, %536 : vector<16x64xf32>
    %cst_172 = arith.constant 0.000000e+00 : f32
    %538 = vector.broadcast %cst_172 : f32 to vector<16x64xf32>
    %539 = arith.maximumf %537, %538 : vector<16x64xf32>
    %cst_173 = arith.constant dense<0.000000e+00> : vector<16x32xf32>
    %540 = tpu.matmul %539, %285, %cst_173 {dimension_numbers = #tpu.dot_dimension_numbers<[1], [0], [0], [1], [0, 0, 1, 1], [], []>} : vector<16x64xf32>, vector<64x32xf32>, vector<16x32xf32> -> vector<16x32xf32>
    %c31 = arith.constant 31 : index
    %c0_174 = arith.constant 0 : index
    %541 = vector.load %arg5[%c31, %c0_174] : memref<34x64xf32, #tpu.memory_space<vmem>>, vector<1x32xf32>
    %542 = vector.broadcast %541 : vector<1x32xf32> to vector<16x32xf32>
    %543 = arith.addf %540, %542 : vector<16x32xf32>
    %544 = arith.addf %511, %543 : vector<16x32xf32>
    %c32 = arith.constant 32 : index
    %c0_175 = arith.constant 0 : index
    %545 = vector.load %arg5[%c32, %c0_175] : memref<34x64xf32, #tpu.memory_space<vmem>>, vector<1x32xf32>
    %c33 = arith.constant 33 : index
    %c0_176 = arith.constant 0 : index
    %546 = vector.load %arg5[%c33, %c0_176] : memref<34x64xf32, #tpu.memory_space<vmem>>, vector<1x32xf32>
    %cst_177 = arith.constant dense<0.000000e+00> : vector<16xf32>
    %547 = vector.multi_reduction <add>, %544, %cst_177 [1] : vector<16x32xf32> to vector<16xf32>
    %548 = vector.shape_cast %547 : vector<16xf32> to vector<16x1xf32>
    %cst_178 = arith.constant 3.200000e+01 : f32
    %549 = vector.broadcast %cst_178 : f32 to vector<16x1xf32>
    %550 = arith.divf %548, %549 : vector<16x1xf32>
    %551 = vector.broadcast %550 : vector<16x1xf32> to vector<16x32xf32>
    %552 = arith.subf %544, %551 : vector<16x32xf32>
    %553 = arith.mulf %552, %552 : vector<16x32xf32>
    %cst_179 = arith.constant dense<0.000000e+00> : vector<16xf32>
    %554 = vector.multi_reduction <add>, %553, %cst_179 [1] : vector<16x32xf32> to vector<16xf32>
    %555 = vector.shape_cast %554 : vector<16xf32> to vector<16x1xf32>
    %cst_180 = arith.constant 3.200000e+01 : f32
    %556 = vector.broadcast %cst_180 : f32 to vector<16x1xf32>
    %557 = arith.divf %555, %556 : vector<16x1xf32>
    %cst_181 = arith.constant 9.99999974E-6 : f32
    %558 = vector.broadcast %cst_181 : f32 to vector<16x1xf32>
    %559 = arith.addf %557, %558 : vector<16x1xf32>
    %560 = math.rsqrt %559 : vector<16x1xf32>
    %561 = vector.broadcast %560 : vector<16x1xf32> to vector<16x32xf32>
    %562 = arith.mulf %552, %561 : vector<16x32xf32>
    %563 = vector.broadcast %545 : vector<1x32xf32> to vector<16x32xf32>
    %564 = arith.mulf %562, %563 : vector<16x32xf32>
    %565 = vector.broadcast %546 : vector<1x32xf32> to vector<16x32xf32>
    %566 = arith.addf %564, %565 : vector<16x32xf32>
    %c0_182 = arith.constant 0 : index
    %c0_183 = arith.constant 0 : index
    %567 = vector.load %arg6[%c0_182, %c0_183] : memref<16x32xf32, #tpu.memory_space<vmem>>, vector<16x32xf32>
    tpu.vector_store %arg6[%c0_182, %c0_183], %566 {strides = array<i32>} : memref<16x32xf32, #tpu.memory_space<vmem>>, vector<16x32xf32>,
    return
  }
}

</mosaic_0001>

<bundles_post_ra>
// kernel: transformer_decoder.1
= control target key start
LH: loop header
LB: loop body
LE: loop exit
PB: predicated region body
PF: predicated region fallthrough
CT: control target
= control target key end

     0   :  { %vm51_vm0 = vcmask 261120   ;;  %s6604_s10 = smov 32   ;;  %vm207_vm1 = vcmask 64512   ;;  %s6605_s17 = smov 120   ;;  %vm297_vm3 = vcmask 130048   ;;  %vm1049_vm4 = vcmask 195584   ;;  %s7609_s0 = inlined_call_operand.vmem [shape: f32[16,32], index: 0, kind: input, shape index: {}]   ;;  %s7610_s3 = inlined_call_operand.vmem [shape: f32[2,32,256], index: 3, kind: input, shape index: {}]   ;;  %s7611_s5 = inlined_call_operand.vmem [shape: f32[34,64], index: 5, kind: input, shape index: {}]   ;;  %s7612_s2 = inlined_call_operand.vmem [shape: f32[16,32], index: 2, kind: input, shape index: {}]   ;;  %s7613_s1 = inlined_call_operand.vmem [shape: f32[16,32], index: 1, kind: input, shape index: {}]   ;;  %s7614_s4 = inlined_call_operand.vmem [shape: f32[2,96,64], index: 4, kind: input, shape index: {}]   ;;  %s7615_s6 = inlined_call_operand.vmem [shape: f32[16,32], index: 6, kind: output, shape index: {}]  }
   0x1   :  { %v6657_v0 = vld [vmem:[%s7609_s0] sm:$0xff]  ;;  %v6662_v1 = vld [vmem:[%s7609_s0 + $0x8] sm:$0xff]  ;;  %v6680_v15 = vld [vmem:[%s7610_s3 + $0x10] sm:$0xff]  ;;  %s6606_s18 = smov 96   ;;  %s6607_s19 = smov 88   ;;  %vm2486_vm5 = vcmask 523264  }
   0x2   :  { %v52_v2 = vsel %vm51_vm0, %v6657_v0, 0.0  ;;  %v55_v3 = vsel %vm51_vm0, %v6662_v1, 0.0  ;;  %v6675_v14 = vld [vmem:[%s7610_s3] sm:$0xff]  ;;  %v6694_v19 = vld [vmem:[%s7610_s3 + $0x30] sm:$0xff]  ;;  %vm6739_vm2 = vmpackc.low %vm207_vm1, %vm207_vm1  ;;  %s6608_s25 = smov 64   ;;  %s6609_s26 = smov 80  }
   0x3   :  { %53 = vadd.xlane.f32.xlu0 %v52_v2  ;;  %v6685_v16 = vld [vmem:[%s7610_s3 + $0x20] sm:$0xff]  ;;  %v6274_v17 = vpack.i.bf16 %v6680_v15, %v6675_v14  ;;  %v5931_v18 = vpack.c.bf16 %v6680_v15, %v6675_v14  ;;  %v6758_v59 = vld [vmem:[%s7612_s2 + $0x8] sm:$0xff]  ;;  %s6610_s27 = smov 112   ;;  %s6611_s28 = smov 56  }
   0x4   :  { %v5935_v20 = vpack.c.bf16 %v6694_v19, %v6685_v16  ;;  %v5144_v21 = vld [vmem:[%s7611_s5 + $0x3] ss:$0 sm:$0xff]  ;;  %v5139_v29 = vld [vmem:[%s7611_s5] ss:$0 sm:$0xff]  ;;  %v5140_v31 = vld [vmem:[%s7611_s5 + $0x1] ss:$0 sm:$0xff] }
   0x5   :  { %5932 = vmatprep.subr.bf16.mxu1 %v5931_v18  ;;  %v5143_v38 = vld [vmem:[%s7611_s5 + $0x2] ss:$0 sm:$0xff]  ;;  %s6612_s29 = smov 48   ;;  %s6613_s30 = smov 104  }
   0x6   :  { %5934 = vmatpush3.bf16.msra.mxu1 %v5931_v18  ;;  %v6763_v62 = vld [vmem:[%s7612_s2] sm:$0xff]  ;;  %s6614_s7 = smov 72   ;;  %s6615_s8 = smov 40  }
   0x7   :  { %56 = vadd.xlane.f32.xlu0 %v55_v3  ;;  %5936 = vmatprep.subr.bf16.mxu1 %v5935_v20  ;;  %v5145_v18 = vld [vmem:[%s7611_s5 + $0x4] ss:$0 sm:$0xff]  ;;  %s6616_s9 = smov 8   ;;  %s6617_s11 = smov 16  }
   0x8   :  { %s6618_s12 = smov 24  }
   0xa   :  { %5938 = vmatpush3.bf16.msra.mxu1 %v5935_v20 }
  0x1d   :  { %185 = vrot.lane.b32.xlu0 %v5144_v21, %s6604_s10 }
  0x90   :  { %v54_v4 = vpop.xlane.xlu0 %53 }
  0x91   :  { %v59_v5 = vmul.f32 0.03125, %v54_v4 }
  0x93   :  { %v61_v6 = vsub.f32 %v6657_v0, %v59_v5 }
  0x94   :  { %v57_v7 = vpop.xlane.xlu0 %56 }
  0x95   :  { %v60_v8 = vmul.f32 0.03125, %v57_v7  ;;  %v63_v9 = vmul.f32 %v61_v6, %v61_v6 }
  0x97   :  { %v62_v10 = vsub.f32 %v6662_v1, %v60_v8  ;;  %v65_v11 = vsel %vm51_vm0, %v63_v9, 0.0 }
  0x98   :  { %66 = vadd.xlane.f32.xlu1 %v65_v11  ;;  %v186_v39 = vpop.permute.xlu0 %185 }
  0x99   :  { %v64_v12 = vmul.f32 %v62_v10, %v62_v10 }
  0x9b   :  { %v68_v13 = vsel %vm51_vm0, %v64_v12, 0.0 }
  0x9c   :  { %69 = vadd.xlane.f32.xlu1 %v68_v13 }
 0x125   :  { %v67_v22 = vpop.xlane.xlu1 %66 }
 0x126   :  { %v71_v23 = vmul.f32 0.03125, %v67_v22 }
 0x128   :  { %v73_v24 = vadd.f32 1e-05, %v71_v23 }
 0x129   :  { %v70_v25 = vpop.xlane.xlu1 %69 }
 0x12a   :  { %6444 = vrsqrt.f32 %v73_v24  ;;  %v72_v26 = vmul.f32 0.03125, %v70_v25 }
 0x12c   :  { %v74_v27 = vadd.f32 1e-05, %v72_v26 }
 0x12e   :  { %6446 = vrsqrt.f32 %v74_v27 }
 0x134   :  { %v6445_v28 = vpop.eup %6444 }
 0x135   :  { %v77_v30 = vmul.f32 %v6445_v28, %v61_v6 }
 0x137   :  { %v83_v32 = vmul.f32 %v5139_v29, %v77_v30 }
 0x138   :  { %v6447_v33 = vpop.eup %6446 }
 0x139   :  { %v78_v34 = vmul.f32 %v6447_v33, %v62_v10  ;;  %v89_v35 = vadd.f32 %v5140_v31, %v83_v32 }
 0x13b   :  { %v84_v36 = vmul.f32 %v5139_v29, %v78_v34  ;;  %5545 = vmatprep.mubr.msk.f32.mxu1 %vm51_vm0, %v89_v35 }
 0x13d   :  { %v90_v37 = vadd.f32 %v5140_v31, %v84_v36 }
 0x13f   :  { %5546 = vmatmul.mubr.msk.f32.vlgmr.msra.gmra.mrb[0].mxu1 %vm51_vm0, %v90_v37 }
 0x212   :  { %v6713_v40 = vpop.f32.mrb[0].mxu1 }
 0x213   :  { %v6716_v41 = vadd.f32 %v6713_v40, %v5143_v38  ;;  %v189_v42 = vadd.f32 %v6713_v40, %v186_v39  ;;  %v6719_v43 = vpop.f32.mrb[1].mxu1 }
 0x214   :  { %v6722_v44 = vadd.f32 %v5143_v38, %v6719_v43  ;;  %v188_v45 = vadd.f32 %v186_v39, %v6719_v43 }
 0x215   :  { %411 = vrot.lane.b32.xlu0 %v6716_v41, %s6605_s17 }
 0x216   :  { %5552 = vmatprep.mubr.msk.f32.mxu1 %vm207_vm1, %v6722_v44  ;;  %v6729_v46 = vpack.i.bf16 %v189_v42, %v188_v45 }
 0x218   :  { %6235 = vrot.lane.b32.xlu1 %v6729_v46, %s6606_s18 }
 0x21c   :  { %6240 = vrot.lane.b32.xlu1 %v6729_v46, %s6607_s19 }
 0x220   :  { %409 = vrot.lane.b32.xlu1 %v6722_v44, %s6605_s17 }
 0x287   :  { %v412_v57 = vpop.permute.xlu0 %411 }
 0x28a   :  { %v6236_v47 = vpop.permute.xlu1 %6235 }
 0x28b   :  { %v6238_v48 = vunpack.i.h.bf16 %v6236_v47  ;;  %v6237_v49 = vunpack.i.l.bf16 %v6236_v47 }
 0x28d   :  { %v5939_v51 = vpack.c.bf16 %v6238_v48, %v6237_v49 }
 0x28e   :  { %v6241_v52 = vpop.permute.xlu1 %6240 }
 0x28f   :  { %v6243_v53 = vunpack.i.h.bf16 %v6241_v52  ;;  %v6242_v54 = vunpack.i.l.bf16 %v6241_v52  ;;  %5941 = vmatprep.subr.msk.bf16.mxu1 %vm6739_vm2, %v5939_v51 }
 0x290   :  { %5944 = vmatpush3.bf16.xpose.msk.msra.mxu1 %vm6739_vm2, %v5939_v51 }
 0x291   :  { %v5949_v55 = vpack.c.bf16 %v6243_v53, %v6242_v54 }
 0x292   :  { %v410_v56 = vpop.permute.xlu1 %409 }
 0x293   :  { %5951 = vmatprep.subr.msk.bf16.mxu1 %vm6739_vm2, %v5949_v55 }
 0x297   :  { %5553 = vmatmul.mubr.msk.f32.vlgmr.msra.gmra.mrb[2].mxu1 %vm207_vm1, %v6716_v41 }
 0x298   :  { %5954 = vmatpush3.bf16.xpose.msk.msra.mxu1 %vm6739_vm2, %v5949_v55  ;;  %5566 = vmatprep.mubr.msk.f32.mxu1 %vm207_vm1, %v410_v56 }
 0x29f   :  { %5567 = vmatmul.mubr.msk.f32.vlgmr.msra.gmra.mrb[4].mxu1 %vm207_vm1, %v412_v57 }
 0x36a   :  { %v5554_v58 = vpop.f32.mrb[2].mxu1 }
 0x36b   :  { %v294_v60 = vmul.f32 0.35355338, %v5554_v58  ;;  %v284_v61 = vpop.f32.mrb[3].mxu1 }
 0x36c   :  { %v293_v63 = vmul.f32 0.35355338, %v284_v61 }
 0x36d   :  { %v296_v2 = vadd.f32 %v294_v60, %v6758_v59 }
 0x36e   :  { %v295_v3 = vadd.f32 %v293_v63, %v6763_v62 }
 0x36f   :  { %v301_v4 = vsel %vm297_vm3, %v296_v2, -inf }
 0x370   :  { %302 = vmax.xlane.f32.xlu0 %v301_v4  ;;  %v298_v5 = vsel %vm297_vm3, %v295_v3, -inf }
 0x371   :  { %299 = vmax.xlane.f32.xlu1 %v298_v5 }
 0x372   :  { %v5568_v6 = vpop.f32.mrb[4].mxu1 }
 0x373   :  { %v491_v7 = vpop.f32.mrb[5].mxu1  ;;  %v501_v8 = vmul.f32 0.35355338, %v5568_v6 }
 0x374   :  { %v500_v9 = vmul.f32 0.35355338, %v491_v7 }
 0x375   :  { %v503_v12 = vadd.f32 %v501_v8, %v6758_v59 }
 0x376   :  { %v502_v10 = vadd.f32 %v500_v9, %v6763_v62 }
 0x377   :  { %v507_v13 = vsel %vm297_vm3, %v503_v12, -inf }
 0x378   :  { %v504_v11 = vsel %vm297_vm3, %v502_v10, -inf }
 0x379   :  { %505 = vmax.xlane.f32.xlu0 %v504_v11 }
 0x37d   :  { %508 = vmax.xlane.f32.xlu0 %v507_v13 }
 0x382   :  { %196 = vrot.lane.b32.xlu1 %v5145_v18, %s6608_s25 }
 0x3fd   :  { %v303_v20 = vpop.xlane.xlu0 %302 }
 0x3fe   :  { %v305_v21 = vsub.f32 %v296_v2, %v303_v20  ;;  %v300_v22 = vpop.xlane.xlu1 %299 }
 0x3ff   :  { %v304_v23 = vsub.f32 %v295_v3, %v300_v22 }
 0x400   :  { %v308_v24 = vmul.f32 1.442695, %v305_v21 }
 0x401   :  { %v306_v25 = vmul.f32 1.442695, %v304_v23 }
 0x402   :  { %6448 = vpow2.f32 %v308_v24  ;;  %v197_v26 = vpop.permute.xlu1 %196 }
 0x403   :  { %v199_v27 = vadd.f32 %v197_v26, %v6719_v43  ;;  %v200_v28 = vadd.f32 %v6713_v40, %v197_v26  ;;  %6450 = vpow2.f32 %v306_v25 }
 0x405   :  { %v6779_v29 = vpack.i.bf16 %v200_v28, %v199_v27 }
 0x406   :  { %v506_v30 = vpop.xlane.xlu0 %505 }
 0x407   :  { %6245 = vrot.lane.b32.xlu1 %v6779_v29, %s6608_s25  ;;  %v510_v31 = vsub.f32 %v502_v10, %v506_v30 }
 0x409   :  { %v512_v35 = vmul.f32 1.442695, %v510_v31 }
 0x40a   :  { %v509_v32 = vpop.xlane.xlu0 %508 }
 0x40b   :  { %v511_v33 = vsub.f32 %v503_v12, %v509_v32  ;;  %6255 = vrot.lane.b32.xlu1 %v6729_v46, %s6609_s26 }
 0x40c   :  { %v6449_v34 = vpop.eup %6448 }
 0x40d   :  { %v514_v36 = vmul.f32 1.442695, %v511_v33  ;;  %v313_v37 = vsel %vm297_vm3, %v6449_v34, 0.0  ;;  %v6451_v38 = vpop.eup %6450 }
 0x40e   :  { %314 = vadd.xlane.f32.xlu0 %v313_v37  ;;  %v310_v39 = vsel %vm297_vm3, %v6451_v38, 0.0 }
 0x40f   :  { %6452 = vpow2.f32 %v514_v36  ;;  %613 = vrot.lane.b32.xlu1 %v6722_v44, %s6610_s27 }
 0x410   :  { %6454 = vpow2.f32 %v512_v35 }
 0x412   :  { %311 = vadd.xlane.f32.xlu0 %v310_v39 }
 0x413   :  { %615 = vrot.lane.b32.xlu1 %v6716_v41, %s6610_s27 }
 0x419   :  { %v6453_v40 = vpop.eup %6452 }
 0x41a   :  { %v519_v42 = vsel %vm297_vm3, %v6453_v40, 0.0  ;;  %v6455_v43 = vpop.eup %6454 }
 0x41b   :  { %520 = vadd.xlane.f32.xlu0 %v519_v42  ;;  %v516_v45 = vsel %vm297_vm3, %v6455_v43, 0.0 }
 0x41f   :  { %517 = vadd.xlane.f32.xlu0 %v516_v45 }
 0x435   :  { %6250 = vrot.lane.b32.xlu0 %v6779_v29, %s6611_s28 }
 0x479   :  { %v6246_v47 = vpop.permute.xlu1 %6245 }
 0x47a   :  { %v6248_v48 = vunpack.i.h.bf16 %v6246_v47  ;;  %v6247_v49 = vunpack.i.l.bf16 %v6246_v47 }
 0x47c   :  { %v5945_v51 = vpack.c.bf16 %v6248_v48, %v6247_v49 }
 0x47d   :  { %v6256_v61 = vpop.permute.xlu1 %6255 }
 0x47e   :  { %5946 = vmatprep.subr.bf16.mxu0 %v5945_v51  ;;  %v6258_v2 = vunpack.i.h.bf16 %v6256_v61  ;;  %v6257_v3 = vunpack.i.l.bf16 %v6256_v61 }
 0x47f   :  { %5948 = vmatpush3.bf16.msra.mxu0 %v5945_v51 }
 0x480   :  { %v5959_v7 = vpack.c.bf16 %v6258_v2, %v6257_v3 }
 0x481   :  { %v614_v12 = vpop.permute.xlu1 %613 }
 0x485   :  { %v616_v13 = vpop.permute.xlu1 %615 }
 0x49b   :  { %v315_v52 = vpop.xlane.xlu0 %314 }
 0x49c   :  { %6456 = vrcp.f32 %v315_v52 }
 0x49f   :  { %v312_v53 = vpop.xlane.xlu0 %311 }
 0x4a0   :  { %6458 = vrcp.f32 %v312_v53 }
 0x4a6   :  { %v6457_v55 = vpop.eup %6456 }
 0x4a7   :  { %v319_v60 = vmul.f32 %v6457_v55, %v6449_v34 }
 0x4a8   :  { %v521_v54 = vpop.xlane.xlu0 %520 }
 0x4a9   :  { %6460 = vrcp.f32 %v521_v54 }
 0x4aa   :  { %v6459_v56 = vpop.eup %6458 }
 0x4ab   :  { %v318_v57 = vmul.f32 %v6459_v56, %v6451_v38 }
 0x4ac   :  { %v518_v58 = vpop.xlane.xlu0 %517 }
 0x4ad   :  { %6462 = vrcp.f32 %v518_v58  ;;  %5559 = vmatprep.mubr.msk.f32.mxu0 %vm297_vm3, %v318_v57 }
 0x4ae   :  { %5560 = vmatmul.mubr.msk.f32.vlgmr.msra.gmra.mrb[0].mxu0 %vm297_vm3, %v319_v60 }
 0x4b0   :  { %v6251_v63 = vpop.permute.xlu0 %6250 }
 0x4b1   :  { %v6253_v4 = vunpack.i.h.bf16 %v6251_v63  ;;  %v6252_v5 = vunpack.i.l.bf16 %v6251_v63 }
 0x4b3   :  { %v5955_v6 = vpack.c.bf16 %v6253_v4, %v6252_v5  ;;  %v6461_v8 = vpop.eup %6460 }
 0x4b4   :  { %v525_v11 = vmul.f32 %v6461_v8, %v6453_v40 }
 0x4b5   :  { %5956 = vmatprep.subr.bf16.mxu0 %v5955_v6 }
 0x4b6   :  { %5958 = vmatpush3.bf16.msra.mxu0 %v5955_v6 }
 0x4b7   :  { %v6463_v9 = vpop.eup %6462  ;;  %5961 = vmatprep.subr.msk.bf16.mxu0 %vm6739_vm2, %v5959_v7 }
 0x4b8   :  { %v524_v10 = vmul.f32 %v6463_v9, %v6455_v43  ;;  %v6279_v9 = vpack.i.bf16 %v6694_v19, %v6685_v16 }
 0x4ba   :  { %5573 = vmatprep.mubr.msk.f32.mxu0 %vm297_vm3, %v524_v10 }
 0x4bb   :  { %5574 = vmatmul.mubr.msk.f32.vlgmr.msra.gmra.mrb[2].mxu0 %vm297_vm3, %v525_v11 }
 0x4bc   :  { %5580 = vmatprep.mubr.msk.f32.mxu0 %vm207_vm1, %v614_v12 }
 0x4bf   :  { %5964 = vmatpush3.bf16.xpose.msk.msra.mxu0 %vm6739_vm2, %v5959_v7 }
 0x4c6   :  { %5581 = vmatmul.mubr.msk.f32.vlgmr.msra.gmra.mrb[4].mxu0 %vm207_vm1, %v616_v13 }
 0x581   :  { %v6805_v18 = vpop.f32.mrb[0].mxu0 }
 0x582   :  { %v6807_v20 = vpop.f32.mrb[1].mxu0 }
 0x58e   :  { %v6809_v21 = vpop.f32.mrb[2].mxu0 }
 0x58f   :  { %v6811_v22 = vpop.f32.mrb[3].mxu0 }
 0x599   :  { %v5582_v23 = vpop.f32.mrb[4].mxu0 }
 0x59a   :  { %v705_v24 = vmul.f32 0.35355338, %v5582_v23  ;;  %v695_v25 = vpop.f32.mrb[5].mxu0 }
 0x59b   :  { %v704_v26 = vmul.f32 0.35355338, %v695_v25 }
 0x59c   :  { %v707_v27 = vadd.f32 %v705_v24, %v6758_v59 }
 0x59d   :  { %v706_v28 = vadd.f32 %v704_v26, %v6763_v62 }
 0x59e   :  { %v711_v30 = vsel %vm297_vm3, %v707_v27, -inf }
 0x59f   :  { %712 = vmax.xlane.f32.xlu0 %v711_v30  ;;  %v708_v31 = vsel %vm297_vm3, %v706_v28, -inf }
 0x5a0   :  { %709 = vmax.xlane.f32.xlu1 %v708_v31 }
 0x5b1   :  { %6260 = vrot.lane.b32.xlu1 %v6779_v29, %s6612_s29 }
 0x5b5   :  { %817 = vrot.lane.b32.xlu1 %v6722_v44, %s6613_s30 }
 0x62c   :  { %v713_v32 = vpop.xlane.xlu0 %712 }
 0x62d   :  { %v715_v33 = vsub.f32 %v707_v27, %v713_v32  ;;  %v710_v34 = vpop.xlane.xlu1 %709 }
 0x62e   :  { %v714_v35 = vsub.f32 %v706_v28, %v710_v34 }
 0x62f   :  { %v718_v36 = vmul.f32 1.442695, %v715_v33 }
 0x630   :  { %v716_v37 = vmul.f32 1.442695, %v714_v35 }
 0x631   :  { %6464 = vpow2.f32 %v718_v36  ;;  %v6261_v38 = vpop.permute.xlu1 %6260 }
 0x632   :  { %6466 = vpow2.f32 %v716_v37  ;;  %v6263_v39 = vunpack.i.h.bf16 %v6261_v38  ;;  %v6262_v40 = vunpack.i.l.bf16 %v6261_v38 }
 0x634   :  { %v5965_v42 = vpack.c.bf16 %v6263_v39, %v6262_v40 }
 0x635   :  { %v818_v48 = vpop.permute.xlu1 %817 }
 0x636   :  { %5966 = vmatprep.subr.bf16.mxu1 %v5965_v42 }
 0x637   :  { %5968 = vmatpush3.bf16.msra.mxu1 %v5965_v42 }
 0x63b   :  { %v6465_v43 = vpop.eup %6464 }
 0x63c   :  { %v6467_v45 = vpop.eup %6466  ;;  %v723_v47 = vsel %vm297_vm3, %v6465_v43, 0.0 }
 0x63d   :  { %724 = vadd.xlane.f32.xlu0 %v723_v47  ;;  %v720_v44 = vsel %vm297_vm3, %v6467_v45, 0.0 }
 0x63e   :  { %721 = vadd.xlane.f32.xlu1 %v720_v44 }
 0x64f   :  { %819 = vrot.lane.b32.xlu1 %v6716_v41, %s6613_s30 }
 0x653   :  { %6265 = vrot.lane.b32.xlu0 %v6729_v46, %s6614_s7 }
 0x6ca   :  { %v725_v49 = vpop.xlane.xlu0 %724 }
 0x6cb   :  { %6468 = vrcp.f32 %v725_v49  ;;  %v722_v51 = vpop.xlane.xlu1 %721 }
 0x6cc   :  { %6470 = vrcp.f32 %v722_v51 }
 0x6ce   :  { %v6266_v52 = vpop.permute.xlu0 %6265 }
 0x6cf   :  { %v6268_v53 = vunpack.i.h.bf16 %v6266_v52  ;;  %v6267_v54 = vunpack.i.l.bf16 %v6266_v52  ;;  %v820_v46 = vpop.permute.xlu1 %819 }
 0x6d1   :  { %v5969_v55 = vpack.c.bf16 %v6268_v53, %v6267_v54 }
 0x6d3   :  { %5971 = vmatprep.subr.msk.bf16.mxu1 %vm6739_vm2, %v5969_v55 }
 0x6d5   :  { %v6469_v56 = vpop.eup %6468 }
 0x6d6   :  { %v6471_v57 = vpop.eup %6470  ;;  %v729_v41 = vmul.f32 %v6469_v56, %v6465_v43 }
 0x6d7   :  { %v728_v58 = vmul.f32 %v6471_v57, %v6467_v45 }
 0x6d9   :  { %5587 = vmatprep.mubr.msk.f32.mxu1 %vm297_vm3, %v728_v58 }
 0x6da   :  { %5588 = vmatmul.mubr.msk.f32.vlgmr.msra.gmra.mrb[6].mxu1 %vm297_vm3, %v729_v41 }
 0x6db   :  { %5974 = vmatpush3.bf16.xpose.msk.msra.mxu1 %vm6739_vm2, %v5969_v55  ;;  %5594 = vmatprep.mubr.msk.f32.mxu1 %vm207_vm1, %v818_v48 }
 0x6e2   :  { %5595 = vmatmul.mubr.msk.f32.vlgmr.msra.gmra.mrb[8].mxu1 %vm207_vm1, %v820_v46 }
 0x7ad   :  { %v5589_v60 = vpop.f32.mrb[6].mxu1 }
 0x7ae   :  { %v808_v61 = vpop.f32.mrb[7].mxu1 }
 0x7b5   :  { %v5596_v63 = vpop.f32.mrb[8].mxu1 }
 0x7b6   :  { %v909_v2 = vmul.f32 0.35355338, %v5596_v63  ;;  %v899_v3 = vpop.f32.mrb[9].mxu1 }
 0x7b7   :  { %v908_v4 = vmul.f32 0.35355338, %v899_v3 }
 0x7b8   :  { %v911_v5 = vadd.f32 %v909_v2, %v6758_v59  ;;  %v34_v2 = vld [vmem:[%s7610_s3 + $0x28] sm:$0xff] }
 0x7b9   :  { %v910_v6 = vadd.f32 %v908_v4, %v6763_v62 }
 0x7ba   :  { %v915_v7 = vsel %vm297_vm3, %v911_v5, -inf }
 0x7bb   :  { %916 = vmax.xlane.f32.xlu0 %v915_v7  ;;  %v912_v8 = vsel %vm297_vm3, %v910_v6, -inf }
 0x7bc   :  { %913 = vmax.xlane.f32.xlu1 %v912_v8 }
 0x7cd   :  { %6270 = vrot.lane.b32.xlu1 %v6779_v29, %s6615_s8 }
 0x7d1   :  { %6280 = vrot.lane.b32.xlu1 %v6279_v9, %s6604_s10 }
 0x7d5   :  { %1023 = vrot.lane.b32.xlu1 %v6811_v22, %s6616_s9 }
 0x7d9   :  { %1025 = vrot.lane.b32.xlu1 %v6809_v21, %s6616_s9 }
 0x7dd   :  { %1033 = vrot.lane.b32.xlu1 %v5589_v60, %s6617_s11 }
 0x848   :  { %v917_v10 = vpop.xlane.xlu0 %916 }
 0x849   :  { %v919_v11 = vsub.f32 %v911_v5, %v917_v10  ;;  %v914_v12 = vpop.xlane.xlu1 %913 }
 0x84a   :  { %v918_v13 = vsub.f32 %v910_v6, %v914_v12 }
 0x84b   :  { %v922_v29 = vmul.f32 1.442695, %v919_v11 }
 0x84c   :  { %v920_v23 = vmul.f32 1.442695, %v918_v13  ;;  %v30_v13 = vld [vmem:[%s7610_s3 + $0x8] sm:$0xff] }
 0x84d   :  { %v6271_v24 = vpop.permute.xlu1 %6270 }
 0x84e   :  { %6472 = vpow2.f32 %v920_v23  ;;  %v6273_v16 = vunpack.i.h.bf16 %v6271_v24  ;;  %v6272_v19 = vunpack.i.l.bf16 %v6271_v24 }
 0x84f   :  { %6474 = vpow2.f32 %v922_v29  ;;  %v32_v29 = vld [vmem:[%s7610_s3 + $0x18] sm:$0xff] }
 0x850   :  { %v5975_v25 = vpack.c.bf16 %v6273_v16, %v6272_v19  ;;  %v6903_v23 = vpack.i.bf16 %v32_v29, %v30_v13  ;;  %v5987_v24 = vpack.c.bf16 %v32_v29, %v30_v13  ;;  %v25_v16 = vld [vmem:[%s7613_s1] sm:$0xff] }
 0x851   :  { %v6281_v35 = vpop.permute.xlu1 %6280 }
 0x852   :  { %5976 = vmatprep.subr.bf16.mxu0 %v5975_v25  ;;  %v6283_v37 = vunpack.i.h.bf16 %v6281_v35  ;;  %v6282_v38 = vunpack.i.l.bf16 %v6281_v35  ;;  %5988 = vmatprep.subr.bf16.mxu1 %v5987_v24 }
 0x853   :  { %5978 = vmatpush3.bf16.msra.mxu0 %v5975_v25  ;;  %5990 = vmatpush3.bf16.msra.mxu1 %v5987_v24 }
 0x854   :  { %v5983_v39 = vpack.c.bf16 %v6283_v37, %v6282_v38 }
 0x855   :  { %v1024_v43 = vpop.permute.xlu1 %1023 }
 0x856   :  { %v1045_v48 = vsel %vm207_vm1, %v6807_v20, %v1024_v43  ;;  %v5172_v20 = vld [vmem:[%s7611_s5 + $0x5] ss:$0 sm:$0xff]  ;;  %v5174_v43 = vld [vmem:[%s7611_s5 + $0x7] ss:$0 sm:$0xff] }
 0x858   :  { %v6473_v22 = vpop.eup %6472 }
 0x859   :  { %v924_v21 = vsel %vm297_vm3, %v6473_v22, 0.0  ;;  %v6475_v26 = vpop.eup %6474  ;;  %v1026_v45 = vpop.permute.xlu1 %1025 }
 0x85a   :  { %925 = vadd.xlane.f32.xlu0 %v924_v21  ;;  %v927_v27 = vsel %vm297_vm3, %v6475_v26, 0.0  ;;  %v1046_v51 = vsel %vm207_vm1, %v6805_v18, %v1026_v45 }
 0x85d   :  { %v1034_v47 = vpop.permute.xlu1 %1033 }
 0x85e   :  { %928 = vadd.xlane.f32.xlu0 %v927_v27  ;;  %v1048_v54 = vsel %vm297_vm3, %v1046_v51, %v1034_v47 }
 0x874   :  { %6275 = vrot.lane.b32.xlu0 %v6274_v17, %s6604_s10 }
 0x878   :  { %1031 = vrot.lane.b32.xlu0 %v808_v61, %s6617_s11 }
 0x8e7   :  { %v926_v28 = vpop.xlane.xlu0 %925 }
 0x8e8   :  { %6476 = vrcp.f32 %v926_v28 }
 0x8eb   :  { %v929_v30 = vpop.xlane.xlu0 %928 }
 0x8ec   :  { %6478 = vrcp.f32 %v929_v30 }
 0x8ef   :  { %v6276_v36 = vpop.permute.xlu0 %6275 }
 0x8f0   :  { %v6278_v14 = vunpack.i.h.bf16 %v6276_v36  ;;  %v6277_v15 = vunpack.i.l.bf16 %v6276_v36 }
 0x8f2   :  { %v6477_v31 = vpop.eup %6476  ;;  %v5979_v17 = vpack.c.bf16 %v6278_v14, %v6277_v15  ;;  %v26_v15 = vld [vmem:[%s7613_s1 + $0x8] sm:$0xff] }
 0x8f3   :  { %v932_v32 = vmul.f32 %v6477_v31, %v6473_v22  ;;  %v1032_v44 = vpop.permute.xlu0 %1031 }
 0x8f4   :  { %5980 = vmatprep.subr.bf16.mxu0 %v5979_v17  ;;  %v1047_v52 = vsel %vm297_vm3, %v1045_v48, %v1032_v44  ;;  %v5180_v48 = vld [vmem:[%s7611_s5 + $0x9] ss:$0 sm:$0xff] }
 0x8f5   :  { %5601 = vmatprep.mubr.msk.f32.mxu0 %vm297_vm3, %v932_v32 }
 0x8f6   :  { %v6479_v33 = vpop.eup %6478 }
 0x8f7   :  { %v933_v34 = vmul.f32 %v6479_v33, %v6475_v26 }
 0x8f9   :  { %5602 = vmatmul.mubr.msk.f32.vlgmr.msra.gmra.mrb[6].mxu0 %vm297_vm3, %v933_v34 }
 0x8fa   :  { %5982 = vmatpush3.bf16.msra.mxu0 %v5979_v17  ;;  %v5173_v17 = vld [vmem:[%s7611_s5 + $0x6] ss:$0 sm:$0xff] }
 0x8fb   :  { %5984 = vmatprep.subr.bf16.mxu0 %v5983_v39 }
 0x8fe   :  { %5986 = vmatpush3.bf16.msra.mxu0 %v5983_v39 }
 0x9cc   :  { %v5603_v40 = vpop.f32.mrb[6].mxu0 }
 0x9cd   :  { %1041 = vrot.lane.b32.xlu1 %v5603_v40, %s6618_s12  ;;  %v1012_v42 = vpop.f32.mrb[7].mxu0 }
 0x9ce   :  { %1039 = vrot.lane.b32.xlu0 %v1012_v42, %s6618_s12 }
 0xa3f   :  { %v1042_v49 = vpop.permute.xlu1 %1041 }
 0xa40   :  { %v1040_v53 = vpop.permute.xlu0 %1039  ;;  %v1051_v56 = vsel %vm1049_vm4, %v1048_v54, %v1042_v49  ;;  %v5175_v54 = vld [vmem:[%s7611_s5 + $0x8] ss:$0 sm:$0xff] }
 0xa41   :  { %v1050_v55 = vsel %vm1049_vm4, %v1047_v52, %v1040_v53 }
 0xa42   :  { %5612 = vmatprep.mubr.msk.f32.mxu0 %vm51_vm0, %v1050_v55 }
 0xa43   :  { %5613 = vmatmul.mubr.msk.f32.vlgmr.msra.gmra.mrb[8].mxu0 %vm51_vm0, %v1051_v56 }
 0xa44   :  { %5634 = vmatprep.mubr.msk.f32.mxu0 %vm51_vm0, %v25_v16 }
 0xb16   :  { %v5614_v57 = vpop.f32.mrb[8].mxu0 }
 0xb17   :  { %v1150_v18 = vadd.f32 %v5614_v57, %v6662_v1  ;;  %v1140_v58 = vpop.f32.mrb[9].mxu0 }
 0xb18   :  { %v1149_v41 = vadd.f32 %v1140_v58, %v6657_v0  ;;  %v36_v0 = vld [vmem:[%s7610_s3 + $0x38] sm:$0xff] }
 0xb19   :  { %v6875_v46 = vadd.f32 %v5172_v20, %v1150_v18  ;;  %v6889_v1 = vpack.i.bf16 %v36_v0, %v34_v2  ;;  %v5991_v19 = vpack.c.bf16 %v36_v0, %v34_v2 }
 0xb1a   :  { %v6877_v60 = vadd.f32 %v5172_v20, %v1149_v41 }
 0xb1b   :  { %v1163_v61 = vsel %vm51_vm0, %v6875_v46, 0.0  ;;  %5992 = vmatprep.subr.bf16.mxu1 %v5991_v19 }
 0xb1c   :  { %1164 = vadd.xlane.f32.xlu1 %v1163_v61  ;;  %v1160_v63 = vsel %vm51_vm0, %v6877_v60, 0.0  ;;  %5994 = vmatpush3.bf16.msra.mxu1 %v5991_v19 }
 0xb1d   :  { %1161 = vadd.xlane.f32.xlu0 %v1160_v63 }
 0xb2d   :  { %6290 = vrot.lane.b32.xlu1 %v6889_v1, %s6606_s18 }
 0xba9   :  { %v1165_v3 = vpop.xlane.xlu1 %1164 }
 0xbaa   :  { %v1167_v4 = vmul.f32 0.03125, %v1165_v3  ;;  %v1162_v5 = vpop.xlane.xlu0 %1161 }
 0xbab   :  { %v1166_v6 = vmul.f32 0.03125, %v1162_v5 }
 0xbac   :  { %v1169_v7 = vsub.f32 %v6875_v46, %v1167_v4 }
 0xbad   :  { %v1168_v8 = vsub.f32 %v6877_v60, %v1166_v6  ;;  %v6291_v27 = vpop.permute.xlu1 %6290 }
 0xbae   :  { %v1171_v9 = vmul.f32 %v1169_v7, %v1169_v7  ;;  %v6293_v31 = vunpack.i.h.bf16 %v6291_v27  ;;  %v6292_v32 = vunpack.i.l.bf16 %v6291_v27 }
 0xbaf   :  { %v1170_v11 = vmul.f32 %v1168_v8, %v1168_v8 }
 0xbb0   :  { %v1175_v10 = vsel %vm51_vm0, %v1171_v9, 0.0  ;;  %v5999_v37 = vpack.c.bf16 %v6293_v31, %v6292_v32 }
 0xbb1   :  { %1176 = vadd.xlane.f32.xlu0 %v1175_v10  ;;  %v1172_v12 = vsel %vm51_vm0, %v1170_v11, 0.0 }
 0xbb5   :  { %1173 = vadd.xlane.f32.xlu0 %v1172_v12  ;;  %v5181_v12 = vld [vmem:[%s7611_s5 + $0xa] ss:$0 sm:$0xff] }
 0xbcb   :  { %6285 = vrot.lane.b32.xlu0 %v6903_v23, %s6606_s18 }
 0xc3e   :  { %v1177_v25 = vpop.xlane.xlu0 %1176 }
 0xc3f   :  { %v1179_v22 = vmul.f32 0.03125, %v1177_v25 }
 0xc41   :  { %v1181_v21 = vadd.f32 1e-05, %v1179_v22 }
 0xc42   :  { %v1174_v26 = vpop.xlane.xlu0 %1173 }
 0xc43   :  { %6480 = vrsqrt.f32 %v1181_v21  ;;  %v1178_v28 = vmul.f32 0.03125, %v1174_v26 }
 0xc45   :  { %v1180_v30 = vadd.f32 1e-05, %v1178_v28 }
 0xc46   :  { %v6286_v33 = vpop.permute.xlu0 %6285 }
 0xc47   :  { %6482 = vrsqrt.f32 %v1180_v30  ;;  %v6288_v34 = vunpack.i.h.bf16 %v6286_v33  ;;  %v6287_v35 = vunpack.i.l.bf16 %v6286_v33 }
 0xc49   :  { %v5995_v36 = vpack.c.bf16 %v6288_v34, %v6287_v35 }
 0xc4b   :  { %5996 = vmatprep.subr.bf16.mxu0 %v5995_v36 }
 0xc4c   :  { %5998 = vmatpush3.bf16.msra.mxu0 %v5995_v36 }
 0xc4d   :  { %v6481_v38 = vpop.eup %6480  ;;  %6000 = vmatprep.subr.bf16.mxu0 %v5999_v37 }
 0xc4e   :  { %v1185_v14 = vmul.f32 %v6481_v38, %v1169_v7 }
 0xc50   :  { %6002 = vmatpush3.bf16.msra.mxu0 %v5999_v37  ;;  %v1191_v42 = vmul.f32 %v5173_v17, %v1185_v14 }
 0xc51   :  { %v6483_v39 = vpop.eup %6482 }
 0xc52   :  { %v1184_v40 = vmul.f32 %v6483_v39, %v1168_v8  ;;  %v1197_v44 = vadd.f32 %v5174_v43, %v1191_v42 }
 0xc53   :  { %5635 = vmatmul.mubr.msk.f32.vlgmr.msra.gmra.mrb[10].mxu0 %vm51_vm0, %v26_v15 }
 0xc54   :  { %v1190_v45 = vmul.f32 %v5173_v17, %v1184_v40 }
 0xc56   :  { %v1196_v47 = vadd.f32 %v5174_v43, %v1190_v45 }
 0xc58   :  { %5623 = vmatprep.mubr.msk.f32.mxu1 %vm51_vm0, %v1196_v47 }
 0xc59   :  { %5624 = vmatmul.mubr.msk.f32.vlgmr.msra.gmra.mrb[10].mxu1 %vm51_vm0, %v1197_v44 }
 0xd26   :  { %v6926_v49 = vpop.f32.mrb[10].mxu0 }
 0xd27   :  { %v1387_v51 = vadd.f32 %v6926_v49, %v5180_v48  ;;  %v1372_v52 = vpop.f32.mrb[11].mxu0 }
 0xd28   :  { %v1386_v53 = vadd.f32 %v5180_v48, %v1372_v52 }
 0xd2a   :  { %v6932_v55 = vpack.i.bf16 %v1387_v51, %v1386_v53  ;;  %v6003_v56 = vpack.c.bf16 %v1387_v51, %v1386_v53 }
 0xd2c   :  { %v5625_v57 = vpop.f32.mrb[10].mxu1  ;;  %6295 = vrot.lane.b32.xlu1 %v6932_v55, %s6605_s17  ;;  %6005 = vmatprep.subr.msk.bf16.mxu1 %vm6739_vm2, %v6003_v56 }
 0xd2d   :  { %v6938_v20 = vadd.f32 %v5625_v57, %v5175_v54  ;;  %v1275_v18 = vpop.f32.mrb[11].mxu1  ;;  %6008 = vmatpush3.bf16.xpose.msk.msra.mxu1 %vm6739_vm2, %v6003_v56 }
 0xd2e   :  { %v6942_v58 = vadd.f32 %v5175_v54, %v1275_v18 }
 0xd2f   :  { %1611 = vrot.lane.b32.xlu0 %v6938_v20, %s6605_s17 }
 0xd30   :  { %5641 = vmatprep.mubr.msk.f32.mxu1 %vm207_vm1, %v6942_v58  ;;  %1609 = vrot.lane.b32.xlu1 %v6942_v58, %s6605_s17 }
 0xd33   :  { %1492 = vrot.lane.b32.xlu0 %v6758_v59, %s6610_s27 }
 0xd34   :  { %5642 = vmatmul.mubr.msk.f32.vlgmr.msra.gmra.mrb[12].mxu1 %vm207_vm1, %v6938_v20  ;;  %1490 = vrot.lane.b32.xlu1 %v6763_v62, %s6610_s27 }
 0xd9e   :  { %v6296_v41 = vpop.permute.xlu1 %6295 }
 0xd9f   :  { %v6298_v61 = vunpack.i.h.bf16 %v6296_v41  ;;  %v6297_v63 = vunpack.i.l.bf16 %v6296_v41 }
 0xda1   :  { %v6013_v2 = vpack.c.bf16 %v6298_v61, %v6297_v63  ;;  %v1612_v59 = vpop.permute.xlu0 %1611 }
 0xda2   :  { %v1610_v0 = vpop.permute.xlu1 %1609 }
 0xda3   :  { %6015 = vmatprep.subr.msk.bf16.mxu1 %vm6739_vm2, %v6013_v2  ;;  %5655 = vmatprep.mubr.msk.f32.mxu1 %vm207_vm1, %v1610_v0 }
 0xda4   :  { %6018 = vmatpush3.bf16.xpose.msk.msra.mxu1 %vm6739_vm2, %v6013_v2 }
 0xda5   :  { %v6962_v4 = vpop.permute.xlu0 %1492 }
 0xda6   :  { %v6964_v6 = vpop.permute.xlu1 %1490 }
 0xdab   :  { %5656 = vmatmul.mubr.msk.f32.vlgmr.msra.gmra.mrb[14].mxu1 %vm207_vm1, %v1612_v59 }
 0xe07   :  { %v5643_v3 = vpop.f32.mrb[12].mxu1 }
 0xe08   :  { %v1487_v62 = vmul.f32 0.35355338, %v5643_v3  ;;  %v1477_v5 = vpop.f32.mrb[13].mxu1 }
 0xe09   :  { %v1486_v7 = vmul.f32 0.35355338, %v1477_v5 }
 0xe0a   :  { %v1497_v8 = vadd.f32 %v6962_v4, %v1487_v62 }
 0xe0b   :  { %v1496_v9 = vadd.f32 %v6964_v6, %v1486_v7 }
 0xe0c   :  { %v1501_v10 = vsel %vm297_vm3, %v1497_v8, -inf }
 0xe0d   :  { %1502 = vmax.xlane.f32.xlu0 %v1501_v10  ;;  %v1498_v11 = vsel %vm297_vm3, %v1496_v9, -inf }
 0xe0e   :  { %1499 = vmax.xlane.f32.xlu1 %v1498_v11 }
 0xe1f   :  { %1394 = vrot.lane.b32.xlu1 %v5181_v12, %s6604_s10 }
 0xe7e   :  { %v5657_v13 = vpop.f32.mrb[14].mxu1 }
 0xe7f   :  { %v1691_v29 = vpop.f32.mrb[15].mxu1  ;;  %v1701_v24 = vmul.f32 0.35355338, %v5657_v13 }
 0xe80   :  { %v1700_v16 = vmul.f32 0.35355338, %v1691_v29 }
 0xe81   :  { %v1703_v22 = vadd.f32 %v1701_v24, %v6962_v4 }
 0xe82   :  { %v1702_v19 = vadd.f32 %v1700_v16, %v6964_v6 }
 0xe83   :  { %v1707_v21 = vsel %vm297_vm3, %v1703_v22, -inf }
 0xe84   :  { %v1704_v25 = vsel %vm297_vm3, %v1702_v19, -inf }
 0xe85   :  { %1705 = vmax.xlane.f32.xlu0 %v1704_v25 }
 0xe89   :  { %1708 = vmax.xlane.f32.xlu0 %v1707_v21 }
 0xe9a   :  { %v1503_v26 = vpop.xlane.xlu0 %1502 }
 0xe9b   :  { %v1505_v27 = vsub.f32 %v1497_v8, %v1503_v26  ;;  %v1500_v28 = vpop.xlane.xlu1 %1499 }
 0xe9c   :  { %v1504_v30 = vsub.f32 %v1496_v9, %v1500_v28 }
 0xe9d   :  { %v1508_v31 = vmul.f32 1.442695, %v1505_v27 }
 0xe9e   :  { %v1506_v32 = vmul.f32 1.442695, %v1504_v30 }
 0xe9f   :  { %6484 = vpow2.f32 %v1508_v31  ;;  %v1395_v33 = vpop.permute.xlu1 %1394 }
 0xea0   :  { %v1397_v34 = vadd.f32 %v1395_v33, %v1372_v52  ;;  %v1398_v35 = vadd.f32 %v6926_v49, %v1395_v33  ;;  %6486 = vpow2.f32 %v1506_v32 }
 0xea2   :  { %v6979_v36 = vpack.i.bf16 %v1398_v35, %v1397_v34 }
 0xea4   :  { %6300 = vrot.lane.b32.xlu1 %v6979_v36, %s6606_s18 }
 0xea8   :  { %6310 = vrot.lane.b32.xlu1 %v6932_v55, %s6610_s27 }
 0xea9   :  { %v6485_v37 = vpop.eup %6484 }
 0xeaa   :  { %v1513_v38 = vsel %vm297_vm3, %v6485_v37, 0.0  ;;  %v6487_v14 = vpop.eup %6486 }
 0xeab   :  { %1514 = vadd.xlane.f32.xlu0 %v1513_v38  ;;  %v1510_v15 = vsel %vm297_vm3, %v6487_v14, 0.0 }
 0xeac   :  { %1813 = vrot.lane.b32.xlu1 %v6942_v58, %s6610_s27 }
 0xeaf   :  { %1511 = vadd.xlane.f32.xlu0 %v1510_v15 }
 0xeb0   :  { %1815 = vrot.lane.b32.xlu1 %v6938_v20, %s6610_s27 }
 0xf12   :  { %v1706_v17 = vpop.xlane.xlu0 %1705 }
 0xf13   :  { %v1710_v39 = vsub.f32 %v1702_v19, %v1706_v17 }
 0xf15   :  { %v1712_v44 = vmul.f32 1.442695, %v1710_v39 }
 0xf16   :  { %v1709_v40 = vpop.xlane.xlu0 %1708  ;;  %v6301_v42 = vpop.permute.xlu1 %6300 }
 0xf17   :  { %v1711_v43 = vsub.f32 %v1703_v22, %v1709_v40  ;;  %v6303_v45 = vunpack.i.h.bf16 %v6301_v42  ;;  %v6302_v47 = vunpack.i.l.bf16 %v6301_v42 }
 0xf19   :  { %v1714_v48 = vmul.f32 1.442695, %v1711_v43  ;;  %v6009_v49 = vpack.c.bf16 %v6303_v45, %v6302_v47 }
 0xf1a   :  { %v6311_v59 = vpop.permute.xlu1 %6310 }
 0xf1b   :  { %6488 = vpow2.f32 %v1714_v48  ;;  %6010 = vmatprep.subr.bf16.mxu0 %v6009_v49  ;;  %v6313_v62 = vunpack.i.h.bf16 %v6311_v59  ;;  %v6312_v5 = vunpack.i.l.bf16 %v6311_v59 }
 0xf1c   :  { %6012 = vmatpush3.bf16.msra.mxu0 %v6009_v49  ;;  %6490 = vpow2.f32 %v1712_v44 }
 0xf1d   :  { %v6023_v10 = vpack.c.bf16 %v6313_v62, %v6312_v5 }
 0xf1e   :  { %v1814_v24 = vpop.permute.xlu1 %1813 }
 0xf22   :  { %v1816_v16 = vpop.permute.xlu1 %1815 }
 0xf25   :  { %v6489_v51 = vpop.eup %6488 }
 0xf26   :  { %v1719_v52 = vsel %vm297_vm3, %v6489_v51, 0.0  ;;  %v6491_v53 = vpop.eup %6490 }
 0xf27   :  { %1720 = vadd.xlane.f32.xlu0 %v1719_v52  ;;  %v1716_v54 = vsel %vm297_vm3, %v6491_v53, 0.0 }
 0xf2b   :  { %1717 = vadd.xlane.f32.xlu0 %v1716_v54 }
 0xf38   :  { %v1515_v56 = vpop.xlane.xlu0 %1514 }
 0xf39   :  { %6492 = vrcp.f32 %v1515_v56 }
 0xf3c   :  { %v1512_v57 = vpop.xlane.xlu0 %1511 }
 0xf3d   :  { %6494 = vrcp.f32 %v1512_v57 }
 0xf41   :  { %6305 = vrot.lane.b32.xlu0 %v6979_v36, %s6607_s19 }
 0xf43   :  { %v6493_v18 = vpop.eup %6492 }
 0xf44   :  { %v1519_v63 = vmul.f32 %v6493_v18, %v6485_v37 }
 0xf47   :  { %v6495_v41 = vpop.eup %6494 }
 0xf48   :  { %v1518_v61 = vmul.f32 %v6495_v41, %v6487_v14 }
 0xf4a   :  { %5648 = vmatprep.mubr.msk.f32.mxu0 %vm297_vm3, %v1518_v61 }
 0xf4b   :  { %5649 = vmatmul.mubr.msk.f32.vlgmr.msra.gmra.mrb[12].mxu0 %vm297_vm3, %v1519_v63 }
 0xfb4   :  { %v1721_v2 = vpop.xlane.xlu0 %1720 }
 0xfb5   :  { %6496 = vrcp.f32 %v1721_v2 }
 0xfb8   :  { %v1718_v0 = vpop.xlane.xlu0 %1717 }
 0xfb9   :  { %6498 = vrcp.f32 %v1718_v0 }
 0xfbc   :  { %v6306_v3 = vpop.permute.xlu0 %6305 }
 0xfbd   :  { %v6308_v7 = vunpack.i.h.bf16 %v6306_v3  ;;  %v6307_v8 = vunpack.i.l.bf16 %v6306_v3 }
 0xfbf   :  { %v6019_v9 = vpack.c.bf16 %v6308_v7, %v6307_v8  ;;  %v6497_v11 = vpop.eup %6496 }
 0xfc0   :  { %v1725_v29 = vmul.f32 %v6497_v11, %v6489_v51 }
 0xfc1   :  { %6020 = vmatprep.subr.bf16.mxu0 %v6019_v9 }
 0xfc2   :  { %6022 = vmatpush3.bf16.msra.mxu0 %v6019_v9 }
 0xfc3   :  { %v6499_v12 = vpop.eup %6498  ;;  %6025 = vmatprep.subr.msk.bf16.mxu0 %vm6739_vm2, %v6023_v10 }
 0xfc4   :  { %v1724_v13 = vmul.f32 %v6499_v12, %v6491_v53 }
 0xfc6   :  { %5662 = vmatprep.mubr.msk.f32.mxu0 %vm297_vm3, %v1724_v13 }
 0xfc7   :  { %5663 = vmatmul.mubr.msk.f32.vlgmr.msra.gmra.mrb[14].mxu0 %vm297_vm3, %v1725_v29 }
 0xfc8   :  { %5669 = vmatprep.mubr.msk.f32.mxu0 %vm207_vm1, %v1814_v24 }
 0xfcb   :  { %6028 = vmatpush3.bf16.xpose.msk.msra.mxu0 %vm6739_vm2, %v6023_v10 }
 0xfd2   :  { %5670 = vmatmul.mubr.msk.f32.vlgmr.msra.gmra.mrb[16].mxu0 %vm207_vm1, %v1816_v16 }
0x101e   :  { %v7005_v19 = vpop.f32.mrb[12].mxu0 }
0x101f   :  { %v7007_v25 = vpop.f32.mrb[13].mxu0 }
0x109a   :  { %v7009_v22 = vpop.f32.mrb[14].mxu0 }
0x109b   :  { %v7011_v21 = vpop.f32.mrb[15].mxu0 }
0x10a5   :  { %v5671_v26 = vpop.f32.mrb[16].mxu0 }
0x10a6   :  { %v1905_v27 = vmul.f32 0.35355338, %v5671_v26  ;;  %v1895_v28 = vpop.f32.mrb[17].mxu0 }
0x10a7   :  { %v1904_v30 = vmul.f32 0.35355338, %v1895_v28 }
0x10a8   :  { %v1907_v31 = vadd.f32 %v1905_v27, %v6962_v4 }
0x10a9   :  { %v1906_v32 = vadd.f32 %v1904_v30, %v6964_v6 }
0x10aa   :  { %v1911_v33 = vsel %vm297_vm3, %v1907_v31, -inf }
0x10ab   :  { %1912 = vmax.xlane.f32.xlu0 %v1911_v33  ;;  %v1908_v34 = vsel %vm297_vm3, %v1906_v32, -inf }
0x10ac   :  { %1909 = vmax.xlane.f32.xlu1 %v1908_v34 }
0x10bd   :  { %6315 = vrot.lane.b32.xlu1 %v6979_v36, %s6609_s26 }
0x10c1   :  { %2017 = vrot.lane.b32.xlu1 %v6942_v58, %s6613_s30 }
0x1138   :  { %v1913_v35 = vpop.xlane.xlu0 %1912 }
0x1139   :  { %v1915_v37 = vsub.f32 %v1907_v31, %v1913_v35  ;;  %v1910_v38 = vpop.xlane.xlu1 %1909 }
0x113a   :  { %v1914_v14 = vsub.f32 %v1906_v32, %v1910_v38 }
0x113b   :  { %v1918_v15 = vmul.f32 1.442695, %v1915_v37 }
0x113c   :  { %v1916_v17 = vmul.f32 1.442695, %v1914_v14 }
0x113d   :  { %6500 = vpow2.f32 %v1918_v15  ;;  %v6316_v39 = vpop.permute.xlu1 %6315 }
0x113e   :  { %6502 = vpow2.f32 %v1916_v17  ;;  %v6318_v40 = vunpack.i.h.bf16 %v6316_v39  ;;  %v6317_v42 = vunpack.i.l.bf16 %v6316_v39 }
0x1140   :  { %v6029_v43 = vpack.c.bf16 %v6318_v40, %v6317_v42 }
0x1141   :  { %v2018_v48 = vpop.permute.xlu1 %2017 }
0x1142   :  { %6030 = vmatprep.subr.bf16.mxu1 %v6029_v43 }
0x1143   :  { %6032 = vmatpush3.bf16.msra.mxu1 %v6029_v43 }
0x1147   :  { %v6501_v45 = vpop.eup %6500 }
0x1148   :  { %v6503_v47 = vpop.eup %6502  ;;  %v1923_v44 = vsel %vm297_vm3, %v6501_v45, 0.0 }
0x1149   :  { %1924 = vadd.xlane.f32.xlu0 %v1923_v44  ;;  %v1920_v58 = vsel %vm297_vm3, %v6503_v47, 0.0 }
0x114a   :  { %1921 = vadd.xlane.f32.xlu1 %v1920_v58 }
0x115b   :  { %2019 = vrot.lane.b32.xlu1 %v6938_v20, %s6613_s30 }
0x115f   :  { %6320 = vrot.lane.b32.xlu0 %v6932_v55, %s6613_s30 }
0x11d6   :  { %v1925_v49 = vpop.xlane.xlu0 %1924 }
0x11d7   :  { %6504 = vrcp.f32 %v1925_v49  ;;  %v1922_v51 = vpop.xlane.xlu1 %1921 }
0x11d8   :  { %6506 = vrcp.f32 %v1922_v51 }
0x11da   :  { %v6321_v52 = vpop.permute.xlu0 %6320 }
0x11db   :  { %v6323_v53 = vunpack.i.h.bf16 %v6321_v52  ;;  %v6322_v54 = vunpack.i.l.bf16 %v6321_v52  ;;  %v2020_v55 = vpop.permute.xlu1 %2019 }
0x11dd   :  { %v6033_v56 = vpack.c.bf16 %v6323_v53, %v6322_v54 }
0x11df   :  { %6035 = vmatprep.subr.msk.bf16.mxu1 %vm6739_vm2, %v6033_v56 }
0x11e1   :  { %v6505_v57 = vpop.eup %6504 }
0x11e2   :  { %v6507_v18 = vpop.eup %6506  ;;  %v1929_v61 = vmul.f32 %v6505_v57, %v6501_v45 }
0x11e3   :  { %v1928_v41 = vmul.f32 %v6507_v18, %v6503_v47 }
0x11e5   :  { %5676 = vmatprep.mubr.msk.f32.mxu1 %vm297_vm3, %v1928_v41 }
0x11e6   :  { %5677 = vmatmul.mubr.msk.f32.vlgmr.msra.gmra.mrb[16].mxu1 %vm297_vm3, %v1929_v61 }
0x11e7   :  { %6038 = vmatpush3.bf16.xpose.msk.msra.mxu1 %vm6739_vm2, %v6033_v56  ;;  %5683 = vmatprep.mubr.msk.f32.mxu1 %vm207_vm1, %v2018_v48 }
0x11ee   :  { %5684 = vmatmul.mubr.msk.f32.vlgmr.msra.gmra.mrb[18].mxu1 %vm207_vm1, %v2020_v55 }
0x12b9   :  { %v5678_v20 = vpop.f32.mrb[16].mxu1 }
0x12ba   :  { %v2008_v63 = vpop.f32.mrb[17].mxu1 }
0x12c1   :  { %v5685_v2 = vpop.f32.mrb[18].mxu1 }
0x12c2   :  { %v2109_v0 = vmul.f32 0.35355338, %v5685_v2  ;;  %v2099_v59 = vpop.f32.mrb[19].mxu1 }
0x12c3   :  { %v2108_v3 = vmul.f32 0.35355338, %v2099_v59 }
0x12c4   :  { %v2111_v62 = vadd.f32 %v2109_v0, %v6962_v4 }
0x12c5   :  { %v2110_v5 = vadd.f32 %v2108_v3, %v6964_v6 }
0x12c6   :  { %v2115_v7 = vsel %vm297_vm3, %v2111_v62, -inf }
0x12c7   :  { %2116 = vmax.xlane.f32.xlu0 %v2115_v7  ;;  %v2112_v8 = vsel %vm297_vm3, %v2110_v5, -inf }
0x12c8   :  { %2113 = vmax.xlane.f32.xlu1 %v2112_v8 }
0x12d9   :  { %6325 = vrot.lane.b32.xlu1 %v6979_v36, %s6614_s7 }
0x12dd   :  { %6335 = vrot.lane.b32.xlu1 %v6889_v1, %s6604_s10 }
0x12e1   :  { %2223 = vrot.lane.b32.xlu1 %v7011_v21, %s6616_s9 }
0x12e5   :  { %2225 = vrot.lane.b32.xlu1 %v7009_v22, %s6616_s9 }
0x12e9   :  { %2233 = vrot.lane.b32.xlu1 %v5678_v20, %s6617_s11 }
0x1354   :  { %v2117_v9 = vpop.xlane.xlu0 %2116 }
0x1355   :  { %v2119_v10 = vsub.f32 %v2111_v62, %v2117_v9  ;;  %v2114_v11 = vpop.xlane.xlu1 %2113  ;;  %v37_v9 = vld [vmem:[%s7614_s4] sm:$0xff] }
0x1356   :  { %v2118_v12 = vsub.f32 %v2110_v5, %v2114_v11 }
0x1357   :  { %v2122_v13 = vmul.f32 1.442695, %v2119_v10  ;;  %v38_v10 = vld [vmem:[%s7614_s4 + $0x8] sm:$0xff] }
0x1358   :  { %v2120_v29 = vmul.f32 1.442695, %v2118_v12  ;;  %v6051_v11 = vpack.c.bf16 %v38_v10, %v37_v9  ;;  %v39_v12 = vld [vmem:[%s7614_s4 + $0x10] sm:$0xff] }
0x1359   :  { %v6326_v24 = vpop.permute.xlu1 %6325  ;;  %v7158_v9 = vld [vmem:[%s7610_s3 + $0x50] sm:$0xff] }
0x135a   :  { %6508 = vpow2.f32 %v2120_v29  ;;  %v6328_v36 = vunpack.i.h.bf16 %v6326_v24  ;;  %v6327_v16 = vunpack.i.l.bf16 %v6326_v24  ;;  %6052 = vmatprep.subr.bf16.mxu1 %v6051_v11  ;;  %v41_v24 = vld [vmem:[%s7614_s4 + $0x20] sm:$0xff] }
0x135b   :  { %6510 = vpow2.f32 %v2122_v13  ;;  %6054 = vmatpush3.bf16.msra.mxu1 %v6051_v11  ;;  %v40_v13 = vld [vmem:[%s7614_s4 + $0x18] sm:$0xff] }
0x135c   :  { %v6039_v1 = vpack.c.bf16 %v6328_v36, %v6327_v16  ;;  %v6055_v29 = vpack.c.bf16 %v40_v13, %v39_v12  ;;  %v42_v36 = vld [vmem:[%s7614_s4 + $0x28] sm:$0xff]  ;;  %v43_v16 = vld [vmem:[%s7614_s4 + $0x30] sm:$0xff]  ;;  %v7167_v12 = vld [vmem:[%s7610_s3 + $0x60] sm:$0xff] }
0x135d   :  { %v6336_v35 = vpop.permute.xlu1 %6335  ;;  %v7172_v13 = vld [vmem:[%s7610_s3 + $0x70] sm:$0xff] }
0x135e   :  { %6040 = vmatprep.subr.bf16.mxu0 %v6039_v1  ;;  %v6338_v38 = vunpack.i.h.bf16 %v6336_v35  ;;  %v6337_v14 = vunpack.i.l.bf16 %v6336_v35  ;;  %6056 = vmatprep.subr.bf16.mxu1 %v6055_v29 }
0x135f   :  { %6042 = vmatpush3.bf16.msra.mxu0 %v6039_v1  ;;  %6058 = vmatpush3.bf16.msra.mxu1 %v6055_v29  ;;  %v6059_v1 = vpack.c.bf16 %v42_v36, %v41_v24  ;;  %v6384_v29 = vpack.i.bf16 %v7172_v13, %v7167_v12  ;;  %v6079_v24 = vpack.c.bf16 %v7172_v13, %v7167_v12  ;;  %v5242_v36 = vld [vmem:[%s7611_s5 + $0x13] ss:$0 sm:$0xff] }
0x1360   :  { %v6047_v39 = vpack.c.bf16 %v6338_v38, %v6337_v14  ;;  %v5209_v38 = vld [vmem:[%s7611_s5 + $0xc] ss:$0 sm:$0xff] }
0x1361   :  { %v2224_v43 = vpop.permute.xlu1 %2223 }
0x1362   :  { %v2245_v58 = vsel %vm207_vm1, %v7007_v25, %v2224_v43  ;;  %v5208_v25 = vld [vmem:[%s7611_s5 + $0xb] ss:$0 sm:$0xff] }
0x1364   :  { %v6509_v21 = vpop.eup %6508 }
0x1365   :  { %v2124_v26 = vsel %vm297_vm3, %v6509_v21, 0.0  ;;  %v6511_v22 = vpop.eup %6510  ;;  %v2226_v45 = vpop.permute.xlu1 %2225 }
0x1366   :  { %2125 = vadd.xlane.f32.xlu0 %v2124_v26  ;;  %v2127_v27 = vsel %vm297_vm3, %v6511_v22, 0.0  ;;  %v2246_v49 = vsel %vm207_vm1, %v7005_v19, %v2226_v45  ;;  %v47_v45 = vld [vmem:[%s7614_s4 + $0x50] sm:$0xff] }
0x1369   :  { %v2234_v47 = vpop.permute.xlu1 %2233 }
0x136a   :  { %2128 = vadd.xlane.f32.xlu0 %v2127_v27  ;;  %v2248_v53 = vsel %vm297_vm3, %v2246_v49, %v2234_v47  ;;  %v46_v27 = vld [vmem:[%s7614_s4 + $0x48] sm:$0xff]  ;;  %v48_v47 = vld [vmem:[%s7614_s4 + $0x58] sm:$0xff] }
0x1380   :  { %6330 = vrot.lane.b32.xlu0 %v6903_v23, %s6604_s10 }
0x1384   :  { %2231 = vrot.lane.b32.xlu0 %v2008_v63, %s6617_s11 }
0x13f3   :  { %v2126_v28 = vpop.xlane.xlu0 %2125 }
0x13f4   :  { %6512 = vrcp.f32 %v2126_v28 }
0x13f7   :  { %v2129_v30 = vpop.xlane.xlu0 %2128 }
0x13f8   :  { %6514 = vrcp.f32 %v2129_v30 }
0x13fb   :  { %v6331_v37 = vpop.permute.xlu0 %6330 }
0x13fc   :  { %v6333_v15 = vunpack.i.h.bf16 %v6331_v37  ;;  %v6332_v23 = vunpack.i.l.bf16 %v6331_v37 }
0x13fe   :  { %v6513_v31 = vpop.eup %6512  ;;  %v6043_v17 = vpack.c.bf16 %v6333_v15, %v6332_v23  ;;  %v5210_v15 = vld [vmem:[%s7611_s5 + $0xd] ss:$0 sm:$0xff] }
0x13ff   :  { %v2132_v32 = vmul.f32 %v6513_v31, %v6509_v21  ;;  %v2232_v44 = vpop.permute.xlu0 %2231  ;;  %v44_v21 = vld [vmem:[%s7614_s4 + $0x38] sm:$0xff] }
0x1400   :  { %6044 = vmatprep.subr.bf16.mxu0 %v6043_v17  ;;  %v2247_v51 = vsel %vm297_vm3, %v2245_v58, %v2232_v44  ;;  %v6063_v26 = vpack.c.bf16 %v44_v21, %v43_v16  ;;  %v6071_v44 = vpack.c.bf16 %v48_v47, %v47_v45  ;;  %v5211_v58 = vld [vmem:[%s7611_s5 + $0xe] ss:$0 sm:$0xff] }
0x1401   :  { %5690 = vmatprep.mubr.msk.f32.mxu0 %vm297_vm3, %v2132_v32 }
0x1402   :  { %v6515_v33 = vpop.eup %6514 }
0x1403   :  { %v2133_v34 = vmul.f32 %v6515_v33, %v6511_v22  ;;  %v45_v22 = vld [vmem:[%s7614_s4 + $0x40] sm:$0xff] }
0x1404   :  { %v6067_v28 = vpack.c.bf16 %v46_v27, %v45_v22 }
0x1405   :  { %5691 = vmatmul.mubr.msk.f32.vlgmr.msra.gmra.mrb[18].mxu0 %vm297_vm3, %v2133_v34 }
0x1406   :  { %6046 = vmatpush3.bf16.msra.mxu0 %v6043_v17 }
0x1407   :  { %6048 = vmatprep.subr.bf16.mxu0 %v6047_v39 }
0x140a   :  { %6050 = vmatpush3.bf16.msra.mxu0 %v6047_v39 }
0x140b   :  { %6060 = vmatprep.subr.bf16.mxu0 %v6059_v1 }
0x14d8   :  { %v5692_v40 = vpop.f32.mrb[18].mxu0 }
0x14d9   :  { %2241 = vrot.lane.b32.xlu1 %v5692_v40, %s6618_s12  ;;  %v2212_v42 = vpop.f32.mrb[19].mxu0 }
0x14da   :  { %2239 = vrot.lane.b32.xlu0 %v2212_v42, %s6618_s12 }
0x154b   :  { %v2242_v48 = vpop.permute.xlu1 %2241 }
0x154c   :  { %v2240_v52 = vpop.permute.xlu0 %2239  ;;  %v2250_v56 = vsel %vm1049_vm4, %v2248_v53, %v2242_v48 }
0x154d   :  { %v2249_v54 = vsel %vm1049_vm4, %v2247_v51, %v2240_v52 }
0x154e   :  { %5701 = vmatprep.mubr.msk.f32.mxu0 %vm51_vm0, %v2249_v54 }
0x154f   :  { %5702 = vmatmul.mubr.msk.f32.vlgmr.msra.gmra.mrb[20].mxu0 %vm51_vm0, %v2250_v56  ;;  %v5214_v56 = vld [vmem:[%s7611_s5 + $0xf] ss:$0 sm:$0xff] }
0x1550   :  { %6062 = vmatpush3.bf16.msra.mxu0 %v6059_v1 }
0x1551   :  { %6064 = vmatprep.subr.bf16.mxu0 %v6063_v26 }
0x1554   :  { %6066 = vmatpush3.bf16.msra.mxu0 %v6063_v26 }
0x1555   :  { %6068 = vmatprep.subr.bf16.mxu0 %v6067_v28 }
0x1558   :  { %6070 = vmatpush3.bf16.msra.mxu0 %v6067_v28 }
0x1559   :  { %6072 = vmatprep.subr.bf16.mxu0 %v6071_v44 }
0x155c   :  { %6074 = vmatpush3.bf16.msra.mxu0 %v6071_v44 }
0x1622   :  { %v5703_v57 = vpop.f32.mrb[20].mxu0 }
0x1623   :  { %v2345_v19 = vadd.f32 %v5703_v57, %v6875_v46  ;;  %v2335_v18 = vpop.f32.mrb[21].mxu0 }
0x1624   :  { %v2344_v41 = vadd.f32 %v2335_v18, %v6877_v60 }
0x1625   :  { %v7072_v61 = vadd.f32 %v5208_v25, %v2345_v19 }
0x1626   :  { %v7074_v55 = vadd.f32 %v5208_v25, %v2344_v41 }
0x1627   :  { %v2358_v20 = vsel %vm51_vm0, %v7072_v61, 0.0 }
0x1628   :  { %2359 = vadd.xlane.f32.xlu1 %v2358_v20  ;;  %v2355_v63 = vsel %vm51_vm0, %v7074_v55, 0.0 }
0x1629   :  { %2356 = vadd.xlane.f32.xlu0 %v2355_v63 }
0x16b5   :  { %v2360_v2 = vpop.xlane.xlu1 %2359 }
0x16b6   :  { %v2362_v0 = vmul.f32 0.03125, %v2360_v2  ;;  %v2357_v59 = vpop.xlane.xlu0 %2356 }
0x16b7   :  { %v2361_v3 = vmul.f32 0.03125, %v2357_v59 }
0x16b8   :  { %v2364_v46 = vsub.f32 %v7072_v61, %v2362_v0 }
0x16b9   :  { %v2363_v60 = vsub.f32 %v7074_v55, %v2361_v3 }
0x16ba   :  { %v2366_v7 = vmul.f32 %v2364_v46, %v2364_v46 }
0x16bb   :  { %v2365_v62 = vmul.f32 %v2363_v60, %v2363_v60 }
0x16bc   :  { %v2370_v8 = vsel %vm51_vm0, %v2366_v7, 0.0 }
0x16bd   :  { %v2367_v5 = vsel %vm51_vm0, %v2365_v62, 0.0 }
0x16be   :  { %2368 = vadd.xlane.f32.xlu0 %v2367_v5 }
0x16c2   :  { %2371 = vadd.xlane.f32.xlu0 %v2370_v8  ;;  %v7153_v8 = vld [vmem:[%s7610_s3 + $0x40] sm:$0xff] }
0x16c3   :  { %v6075_v10 = vpack.c.bf16 %v7158_v9, %v7153_v8  ;;  %v6379_v11 = vpack.i.bf16 %v7158_v9, %v7153_v8 }
0x16c5   :  { %6076 = vmatprep.subr.bf16.mxu1 %v6075_v10 }
0x174b   :  { %v2369_v30 = vpop.xlane.xlu0 %2368 }
0x174c   :  { %v2373_v31 = vmul.f32 0.03125, %v2369_v30  ;;  %v5237_v30 = vld [vmem:[%s7611_s5 + $0x10] ss:$0 sm:$0xff] }
0x174e   :  { %v2375_v32 = vadd.f32 1e-05, %v2373_v31 }
0x174f   :  { %v2372_v33 = vpop.xlane.xlu0 %2371 }
0x1750   :  { %6516 = vrsqrt.f32 %v2375_v32  ;;  %v2374_v34 = vmul.f32 0.03125, %v2372_v33 }
0x1752   :  { %v2376_v35 = vadd.f32 1e-05, %v2374_v34  ;;  %v5238_v34 = vld [vmem:[%s7611_s5 + $0x11] ss:$0 sm:$0xff] }
0x1754   :  { %6518 = vrsqrt.f32 %v2376_v35 }
0x175a   :  { %v6517_v37 = vpop.eup %6516 }
0x175b   :  { %v2379_v14 = vmul.f32 %v6517_v37, %v2363_v60 }
0x175d   :  { %v2385_v23 = vmul.f32 %v5209_v38, %v2379_v14 }
0x175e   :  { %v6519_v17 = vpop.eup %6518 }
0x175f   :  { %v2380_v39 = vmul.f32 %v6519_v17, %v2364_v46  ;;  %v2391_v40 = vadd.f32 %v5210_v15, %v2385_v23 }
0x1761   :  { %v2386_v42 = vmul.f32 %v5209_v38, %v2380_v39  ;;  %5712 = vmatprep.mubr.msk.f32.mxu1 %vm51_vm0, %v2391_v40 }
0x1763   :  { %v2392_v43 = vadd.f32 %v5210_v15, %v2386_v42  ;;  %v5241_v15 = vld [vmem:[%s7611_s5 + $0x12] ss:$0 sm:$0xff] }
0x1765   :  { %5713 = vmatmul.mubr.msk.f32.vlgmr.msra.gmra.mrb[20].mxu1 %vm51_vm0, %v2392_v43 }
0x1766   :  { %6078 = vmatpush3.bf16.msra.mxu1 %v6075_v10 }
0x1767   :  { %6080 = vmatprep.subr.bf16.mxu1 %v6079_v24 }
0x176a   :  { %6082 = vmatpush3.bf16.msra.mxu1 %v6079_v24 }
0x1838   :  { %v5714_v48 = vpop.f32.mrb[20].mxu1 }
0x1839   :  { %v2476_v49 = vadd.f32 %v5714_v48, %v5211_v58  ;;  %v2470_v51 = vpop.f32.mrb[21].mxu1 }
0x183a   :  { %v2471_v52 = vadd.f32 %v5211_v58, %v2470_v51 }
0x183b   :  { %v2480_v54 = vmax.f32 %v2476_v49, 0.0 }
0x183c   :  { %v2479_v53 = vmax.f32 %v2471_v52, 0.0 }
0x183e   :  { %5731 = vmatprep.mubr.msk.f32.mxu0 %vm2486_vm5, %v2479_v53 }
0x183f   :  { %5732 = vmatmul.mubr.msk.f32.vlgmr.msra.gmra.mrb[22].mxu0 %vm2486_vm5, %v2480_v54 }
0x1912   :  { %v5733_v57 = vpop.f32.mrb[22].mxu0 }
0x1913   :  { %v2565_v25 = vadd.f32 %v5733_v57, %v5214_v56  ;;  %v2559_v19 = vpop.f32.mrb[23].mxu0 }
0x1914   :  { %v2560_v18 = vadd.f32 %v5214_v56, %v2559_v19 }
0x1915   :  { %v7137_v41 = vadd.f32 %v2565_v25, %v7072_v61 }
0x1916   :  { %v7140_v20 = vadd.f32 %v2560_v18, %v7074_v55 }
0x1917   :  { %v2597_v63 = vsel %vm51_vm0, %v7137_v41, 0.0 }
0x1918   :  { %2598 = vadd.xlane.f32.xlu1 %v2597_v63  ;;  %v2594_v2 = vsel %vm51_vm0, %v7140_v20, 0.0 }
0x1919   :  { %2595 = vadd.xlane.f32.xlu0 %v2594_v2  ;;  %v7224_v2 = vld [vmem:[%s7612_s2 + $0x8] sm:$0xff] }
0x19a5   :  { %v2599_v0 = vpop.xlane.xlu1 %2598 }
0x19a6   :  { %v2601_v59 = vmul.f32 0.03125, %v2599_v0  ;;  %v2596_v3 = vpop.xlane.xlu0 %2595 }
0x19a7   :  { %v2600_v46 = vmul.f32 0.03125, %v2596_v3 }
0x19a8   :  { %v2603_v60 = vsub.f32 %v7137_v41, %v2601_v59  ;;  %v7230_v59 = vld [vmem:[%s7612_s2] sm:$0xff] }
0x19a9   :  { %v2602_v61 = vsub.f32 %v7140_v20, %v2600_v46 }
0x19aa   :  { %v2605_v62 = vmul.f32 %v2603_v60, %v2603_v60 }
0x19ab   :  { %v2604_v5 = vmul.f32 %v2602_v61, %v2602_v61 }
0x19ac   :  { %v2609_v55 = vsel %vm51_vm0, %v2605_v62, 0.0 }
0x19ad   :  { %2610 = vadd.xlane.f32.xlu1 %v2609_v55  ;;  %v2606_v7 = vsel %vm51_vm0, %v2604_v5, 0.0 }
0x19ae   :  { %2607 = vadd.xlane.f32.xlu0 %v2606_v7 }
0x19c4   :  { %2726 = vrot.lane.b32.xlu0 %v5242_v36, %s6604_s10 }
0x1a3a   :  { %v2611_v16 = vpop.xlane.xlu1 %2610 }
0x1a3b   :  { %v2613_v1 = vmul.f32 0.03125, %v2611_v16  ;;  %v2608_v21 = vpop.xlane.xlu0 %2607  ;;  %v5243_v16 = vld [vmem:[%s7611_s5 + $0x14] ss:$0 sm:$0xff] }
0x1a3c   :  { %v2612_v26 = vmul.f32 0.03125, %v2608_v21 }
0x1a3d   :  { %v2615_v22 = vadd.f32 1e-05, %v2613_v1 }
0x1a3e   :  { %v2614_v27 = vadd.f32 1e-05, %v2612_v26 }
0x1a3f   :  { %6520 = vrsqrt.f32 %v2615_v22  ;;  %v2727_v23 = vpop.permute.xlu0 %2726 }
0x1a40   :  { %6522 = vrsqrt.f32 %v2614_v27 }
0x1a49   :  { %v6521_v28 = vpop.eup %6520 }
0x1a4a   :  { %v6523_v31 = vpop.eup %6522  ;;  %v2619_v32 = vmul.f32 %v6521_v28, %v2603_v60 }
0x1a4b   :  { %v2618_v33 = vmul.f32 %v6523_v31, %v2602_v61 }
0x1a4c   :  { %v2625_v35 = vmul.f32 %v5237_v30, %v2619_v32 }
0x1a4d   :  { %v2624_v37 = vmul.f32 %v5237_v30, %v2618_v33 }
0x1a4e   :  { %v2631_v14 = vadd.f32 %v5238_v34, %v2625_v35 }
0x1a4f   :  { %v2630_v38 = vadd.f32 %v5238_v34, %v2624_v37 }
0x1a51   :  { %5742 = vmatprep.mubr.msk.f32.mxu1 %vm51_vm0, %v2630_v38 }
0x1a52   :  { %5743 = vmatmul.mubr.msk.f32.vlgmr.msra.gmra.mrb[22].mxu1 %vm51_vm0, %v2631_v14 }
0x1b25   :  { %v5744_v17 = vpop.f32.mrb[22].mxu1 }
0x1b26   :  { %v7193_v39 = vadd.f32 %v5744_v17, %v5241_v15  ;;  %v2730_v40 = vadd.f32 %v5744_v17, %v2727_v23  ;;  %v2704_v42 = vpop.f32.mrb[23].mxu1 }
0x1b27   :  { %v7195_v43 = vadd.f32 %v5241_v15, %v2704_v42  ;;  %v2729_v45 = vadd.f32 %v2727_v23, %v2704_v42 }
0x1b28   :  { %2950 = vrot.lane.b32.xlu0 %v7193_v39, %s6605_s17 }
0x1b29   :  { %5749 = vmatprep.mubr.msk.f32.mxu1 %vm207_vm1, %v7195_v43  ;;  %v7201_v47 = vpack.i.bf16 %v2730_v40, %v2729_v45 }
0x1b2b   :  { %6340 = vrot.lane.b32.xlu1 %v7201_v47, %s6606_s18 }
0x1b2f   :  { %6345 = vrot.lane.b32.xlu1 %v7201_v47, %s6607_s19 }
0x1b33   :  { %2948 = vrot.lane.b32.xlu1 %v7195_v43, %s6605_s17 }
0x1b9a   :  { %v2951_v57 = vpop.permute.xlu0 %2950 }
0x1b9d   :  { %v6341_v44 = vpop.permute.xlu1 %6340 }
0x1b9e   :  { %v6343_v58 = vunpack.i.h.bf16 %v6341_v44  ;;  %v6342_v48 = vunpack.i.l.bf16 %v6341_v44 }
0x1ba0   :  { %v6083_v49 = vpack.c.bf16 %v6343_v58, %v6342_v48 }
0x1ba1   :  { %v6346_v51 = vpop.permute.xlu1 %6345 }
0x1ba2   :  { %v6348_v52 = vunpack.i.h.bf16 %v6346_v51  ;;  %v6347_v53 = vunpack.i.l.bf16 %v6346_v51  ;;  %6085 = vmatprep.subr.msk.bf16.mxu1 %vm6739_vm2, %v6083_v49 }
0x1ba3   :  { %6088 = vmatpush3.bf16.xpose.msk.msra.mxu1 %vm6739_vm2, %v6083_v49 }
0x1ba4   :  { %v6093_v54 = vpack.c.bf16 %v6348_v52, %v6347_v53 }
0x1ba5   :  { %v2949_v56 = vpop.permute.xlu1 %2948 }
0x1ba6   :  { %6095 = vmatprep.subr.msk.bf16.mxu1 %vm6739_vm2, %v6093_v54 }
0x1baa   :  { %5750 = vmatmul.mubr.msk.f32.vlgmr.msra.gmra.mrb[24].mxu1 %vm207_vm1, %v7193_v39 }
0x1bab   :  { %6098 = vmatpush3.bf16.xpose.msk.msra.mxu1 %vm6739_vm2, %v6093_v54  ;;  %5763 = vmatprep.mubr.msk.f32.mxu1 %vm207_vm1, %v2949_v56 }
0x1bb2   :  { %5764 = vmatmul.mubr.msk.f32.vlgmr.msra.gmra.mrb[26].mxu1 %vm207_vm1, %v2951_v57 }
0x1c7d   :  { %v5751_v25 = vpop.f32.mrb[24].mxu1 }
0x1c7e   :  { %v2834_v19 = vmul.f32 0.35355338, %v5751_v25  ;;  %v2824_v18 = vpop.f32.mrb[25].mxu1 }
0x1c7f   :  { %v2833_v63 = vmul.f32 0.35355338, %v2824_v18 }
0x1c80   :  { %v2836_v0 = vadd.f32 %v7224_v2, %v2834_v19 }
0x1c81   :  { %v2835_v3 = vadd.f32 %v7230_v59, %v2833_v63 }
0x1c82   :  { %v2840_v46 = vsel %vm297_vm3, %v2836_v0, -inf }
0x1c83   :  { %2841 = vmax.xlane.f32.xlu0 %v2840_v46  ;;  %v2837_v60 = vsel %vm297_vm3, %v2835_v3, -inf }
0x1c84   :  { %2838 = vmax.xlane.f32.xlu1 %v2837_v60 }
0x1c85   :  { %v5765_v61 = vpop.f32.mrb[26].mxu1 }
0x1c86   :  { %v3030_v62 = vpop.f32.mrb[27].mxu1  ;;  %v3040_v5 = vmul.f32 0.35355338, %v5765_v61 }
0x1c87   :  { %v3039_v55 = vmul.f32 0.35355338, %v3030_v62 }
0x1c88   :  { %v3042_v10 = vadd.f32 %v7224_v2, %v3040_v5 }
0x1c89   :  { %v3041_v7 = vadd.f32 %v7230_v59, %v3039_v55 }
0x1c8a   :  { %v3046_v36 = vsel %vm297_vm3, %v3042_v10, -inf }
0x1c8b   :  { %v3043_v24 = vsel %vm297_vm3, %v3041_v7, -inf }
0x1c8c   :  { %3044 = vmax.xlane.f32.xlu0 %v3043_v24 }
0x1c90   :  { %3047 = vmax.xlane.f32.xlu0 %v3046_v36 }
0x1c95   :  { %2737 = vrot.lane.b32.xlu1 %v5243_v16, %s6608_s25 }
0x1d10   :  { %v2842_v1 = vpop.xlane.xlu0 %2841 }
0x1d11   :  { %v2844_v21 = vsub.f32 %v2836_v0, %v2842_v1  ;;  %v2839_v26 = vpop.xlane.xlu1 %2838 }
0x1d12   :  { %v2843_v22 = vsub.f32 %v2835_v3, %v2839_v26 }
0x1d13   :  { %v2847_v27 = vmul.f32 1.442695, %v2844_v21 }
0x1d14   :  { %v2845_v28 = vmul.f32 1.442695, %v2843_v22 }
0x1d15   :  { %6524 = vpow2.f32 %v2847_v27  ;;  %v2738_v30 = vpop.permute.xlu1 %2737 }
0x1d16   :  { %v2740_v31 = vadd.f32 %v2738_v30, %v2704_v42  ;;  %v2741_v32 = vadd.f32 %v5744_v17, %v2738_v30  ;;  %6526 = vpow2.f32 %v2845_v28 }
0x1d18   :  { %v7243_v33 = vpack.i.bf16 %v2741_v32, %v2740_v31 }
0x1d19   :  { %v3045_v34 = vpop.xlane.xlu0 %3044 }
0x1d1a   :  { %6350 = vrot.lane.b32.xlu1 %v7243_v33, %s6608_s25  ;;  %v3049_v35 = vsub.f32 %v3041_v7, %v3045_v34 }
0x1d1c   :  { %v3051_v15 = vmul.f32 1.442695, %v3049_v35 }
0x1d1d   :  { %v3048_v37 = vpop.xlane.xlu0 %3047 }
0x1d1e   :  { %v3050_v38 = vsub.f32 %v3042_v10, %v3048_v37  ;;  %6360 = vrot.lane.b32.xlu1 %v7201_v47, %s6609_s26 }
0x1d1f   :  { %v6525_v14 = vpop.eup %6524 }
0x1d20   :  { %v3053_v23 = vmul.f32 1.442695, %v3050_v38  ;;  %v2852_v40 = vsel %vm297_vm3, %v6525_v14, 0.0  ;;  %v6527_v42 = vpop.eup %6526 }
0x1d21   :  { %2853 = vadd.xlane.f32.xlu0 %v2852_v40  ;;  %v2849_v17 = vsel %vm297_vm3, %v6527_v42, 0.0 }
0x1d22   :  { %6528 = vpow2.f32 %v3053_v23  ;;  %3152 = vrot.lane.b32.xlu1 %v7195_v43, %s6610_s27 }
0x1d23   :  { %6530 = vpow2.f32 %v3051_v15 }
0x1d25   :  { %2850 = vadd.xlane.f32.xlu0 %v2849_v17 }
0x1d26   :  { %3154 = vrot.lane.b32.xlu1 %v7193_v39, %s6610_s27 }
0x1d2c   :  { %v6529_v45 = vpop.eup %6528 }
0x1d2d   :  { %v3058_v44 = vsel %vm297_vm3, %v6529_v45, 0.0  ;;  %v6531_v58 = vpop.eup %6530 }
0x1d2e   :  { %3059 = vadd.xlane.f32.xlu0 %v3058_v44  ;;  %v3055_v48 = vsel %vm297_vm3, %v6531_v58, 0.0 }
0x1d32   :  { %3056 = vadd.xlane.f32.xlu0 %v3055_v48 }
0x1d48   :  { %6355 = vrot.lane.b32.xlu0 %v7243_v33, %s6611_s28 }
0x1d8c   :  { %v6351_v49 = vpop.permute.xlu1 %6350 }
0x1d8d   :  { %v6353_v51 = vunpack.i.h.bf16 %v6351_v49  ;;  %v6352_v52 = vunpack.i.l.bf16 %v6351_v49 }
0x1d8f   :  { %v6089_v53 = vpack.c.bf16 %v6353_v51, %v6352_v52 }
0x1d90   :  { %v6361_v3 = vpop.permute.xlu1 %6360 }
0x1d91   :  { %6090 = vmatprep.subr.bf16.mxu0 %v6089_v53  ;;  %v6363_v60 = vunpack.i.h.bf16 %v6361_v3  ;;  %v6362_v61 = vunpack.i.l.bf16 %v6361_v3 }
0x1d92   :  { %6092 = vmatpush3.bf16.msra.mxu0 %v6089_v53 }
0x1d93   :  { %v6103_v7 = vpack.c.bf16 %v6363_v60, %v6362_v61 }
0x1d94   :  { %v3153_v1 = vpop.permute.xlu1 %3152 }
0x1d98   :  { %v3155_v21 = vpop.permute.xlu1 %3154 }
0x1dae   :  { %v2854_v54 = vpop.xlane.xlu0 %2853 }
0x1daf   :  { %6532 = vrcp.f32 %v2854_v54 }
0x1db2   :  { %v2851_v56 = vpop.xlane.xlu0 %2850 }
0x1db3   :  { %6534 = vrcp.f32 %v2851_v56 }
0x1db9   :  { %v6533_v25 = vpop.eup %6532 }
0x1dba   :  { %v2858_v63 = vmul.f32 %v6533_v25, %v6525_v14 }
0x1dbb   :  { %v3060_v57 = vpop.xlane.xlu0 %3059 }
0x1dbc   :  { %6536 = vrcp.f32 %v3060_v57 }
0x1dbd   :  { %v6535_v19 = vpop.eup %6534 }
0x1dbe   :  { %v2857_v18 = vmul.f32 %v6535_v19, %v6527_v42 }
0x1dbf   :  { %v3057_v0 = vpop.xlane.xlu0 %3056 }
0x1dc0   :  { %6538 = vrcp.f32 %v3057_v0  ;;  %5756 = vmatprep.mubr.msk.f32.mxu0 %vm297_vm3, %v2857_v18 }
0x1dc1   :  { %5757 = vmatmul.mubr.msk.f32.vlgmr.msra.gmra.mrb[24].mxu0 %vm297_vm3, %v2858_v63 }
0x1dc3   :  { %v6356_v46 = vpop.permute.xlu0 %6355 }
0x1dc4   :  { %v6358_v62 = vunpack.i.h.bf16 %v6356_v46  ;;  %v6357_v5 = vunpack.i.l.bf16 %v6356_v46 }
0x1dc6   :  { %v6099_v55 = vpack.c.bf16 %v6358_v62, %v6357_v5  ;;  %v6537_v10 = vpop.eup %6536 }
0x1dc7   :  { %v3064_v16 = vmul.f32 %v6537_v10, %v6529_v45 }
0x1dc8   :  { %6100 = vmatprep.subr.bf16.mxu0 %v6099_v55 }
0x1dc9   :  { %6102 = vmatpush3.bf16.msra.mxu0 %v6099_v55 }
0x1dca   :  { %v6539_v24 = vpop.eup %6538  ;;  %6105 = vmatprep.subr.msk.bf16.mxu0 %vm6739_vm2, %v6103_v7 }
0x1dcb   :  { %v3063_v36 = vmul.f32 %v6539_v24, %v6531_v58 }
0x1dcd   :  { %5770 = vmatprep.mubr.msk.f32.mxu0 %vm297_vm3, %v3063_v36 }
0x1dce   :  { %5771 = vmatmul.mubr.msk.f32.vlgmr.msra.gmra.mrb[26].mxu0 %vm297_vm3, %v3064_v16 }
0x1dcf   :  { %5777 = vmatprep.mubr.msk.f32.mxu0 %vm207_vm1, %v3153_v1 }
0x1dd2   :  { %6108 = vmatpush3.bf16.xpose.msk.msra.mxu0 %vm6739_vm2, %v6103_v7 }
0x1dd9   :  { %5778 = vmatmul.mubr.msk.f32.vlgmr.msra.gmra.mrb[28].mxu0 %vm207_vm1, %v3155_v21 }
0x1e94   :  { %v7269_v26 = vpop.f32.mrb[24].mxu0 }
0x1e95   :  { %v7271_v22 = vpop.f32.mrb[25].mxu0 }
0x1ea1   :  { %v7273_v27 = vpop.f32.mrb[26].mxu0 }
0x1ea2   :  { %v7275_v28 = vpop.f32.mrb[27].mxu0 }
0x1eac   :  { %v5779_v30 = vpop.f32.mrb[28].mxu0 }
0x1ead   :  { %v3244_v31 = vmul.f32 0.35355338, %v5779_v30  ;;  %v3234_v32 = vpop.f32.mrb[29].mxu0 }
0x1eae   :  { %v3243_v34 = vmul.f32 0.35355338, %v3234_v32 }
0x1eaf   :  { %v3246_v35 = vadd.f32 %v7224_v2, %v3244_v31 }
0x1eb0   :  { %v3245_v37 = vadd.f32 %v7230_v59, %v3243_v34 }
0x1eb1   :  { %v3250_v38 = vsel %vm297_vm3, %v3246_v35, -inf }
0x1eb2   :  { %3251 = vmax.xlane.f32.xlu0 %v3250_v38  ;;  %v3247_v14 = vsel %vm297_vm3, %v3245_v37, -inf }
0x1eb3   :  { %3248 = vmax.xlane.f32.xlu1 %v3247_v14 }
0x1ec4   :  { %6365 = vrot.lane.b32.xlu1 %v7243_v33, %s6612_s29 }
0x1ec8   :  { %3356 = vrot.lane.b32.xlu1 %v7195_v43, %s6613_s30 }
0x1f3f   :  { %v3252_v15 = vpop.xlane.xlu0 %3251 }
0x1f40   :  { %v3254_v23 = vsub.f32 %v3246_v35, %v3252_v15  ;;  %v3249_v40 = vpop.xlane.xlu1 %3248 }
0x1f41   :  { %v3253_v42 = vsub.f32 %v3245_v37, %v3249_v40 }
0x1f42   :  { %v3257_v17 = vmul.f32 1.442695, %v3254_v23 }
0x1f43   :  { %v3255_v45 = vmul.f32 1.442695, %v3253_v42 }
0x1f44   :  { %6540 = vpow2.f32 %v3257_v17  ;;  %v6366_v44 = vpop.permute.xlu1 %6365 }
0x1f45   :  { %6542 = vpow2.f32 %v3255_v45  ;;  %v6368_v58 = vunpack.i.h.bf16 %v6366_v44  ;;  %v6367_v48 = vunpack.i.l.bf16 %v6366_v44 }
0x1f47   :  { %v6109_v49 = vpack.c.bf16 %v6368_v58, %v6367_v48 }
0x1f48   :  { %v3357_v54 = vpop.permute.xlu1 %3356 }
0x1f49   :  { %6110 = vmatprep.subr.bf16.mxu1 %v6109_v49 }
0x1f4a   :  { %6112 = vmatpush3.bf16.msra.mxu1 %v6109_v49 }
0x1f4e   :  { %v6541_v51 = vpop.eup %6540 }
0x1f4f   :  { %v6543_v52 = vpop.eup %6542  ;;  %v3262_v53 = vsel %vm297_vm3, %v6541_v51, 0.0 }
0x1f50   :  { %3263 = vadd.xlane.f32.xlu0 %v3262_v53  ;;  %v3259_v43 = vsel %vm297_vm3, %v6543_v52, 0.0 }
0x1f51   :  { %3260 = vadd.xlane.f32.xlu1 %v3259_v43 }
0x1f62   :  { %3358 = vrot.lane.b32.xlu1 %v7193_v39, %s6613_s30 }
0x1f66   :  { %6370 = vrot.lane.b32.xlu0 %v7201_v47, %s6614_s7 }
0x1fdd   :  { %v3264_v56 = vpop.xlane.xlu0 %3263 }
0x1fde   :  { %6544 = vrcp.f32 %v3264_v56  ;;  %v3261_v57 = vpop.xlane.xlu1 %3260 }
0x1fdf   :  { %6546 = vrcp.f32 %v3261_v57 }
0x1fe1   :  { %v6371_v25 = vpop.permute.xlu0 %6370 }
0x1fe2   :  { %v6373_v19 = vunpack.i.h.bf16 %v6371_v25  ;;  %v6372_v18 = vunpack.i.l.bf16 %v6371_v25  ;;  %v3359_v39 = vpop.permute.xlu1 %3358 }
0x1fe4   :  { %v6113_v63 = vpack.c.bf16 %v6373_v19, %v6372_v18 }
0x1fe6   :  { %6115 = vmatprep.subr.msk.bf16.mxu1 %vm6739_vm2, %v6113_v63 }
0x1fe8   :  { %v6545_v0 = vpop.eup %6544 }
0x1fe9   :  { %v6547_v3 = vpop.eup %6546  ;;  %v3268_v60 = vmul.f32 %v6545_v0, %v6541_v51  ;;  %v5270_v0 = vld [vmem:[%s7611_s5 + $0x15] ss:$0 sm:$0xff] }
0x1fea   :  { %v3267_v46 = vmul.f32 %v6547_v3, %v6543_v52 }
0x1fec   :  { %5784 = vmatprep.mubr.msk.f32.mxu1 %vm297_vm3, %v3267_v46 }
0x1fed   :  { %5785 = vmatmul.mubr.msk.f32.vlgmr.msra.gmra.mrb[28].mxu1 %vm297_vm3, %v3268_v60 }
0x1fee   :  { %6118 = vmatpush3.bf16.xpose.msk.msra.mxu1 %vm6739_vm2, %v6113_v63  ;;  %5791 = vmatprep.mubr.msk.f32.mxu1 %vm207_vm1, %v3357_v54 }
0x1ff5   :  { %5792 = vmatmul.mubr.msk.f32.vlgmr.msra.gmra.mrb[30].mxu1 %vm207_vm1, %v3359_v39 }
0x20c0   :  { %v5786_v47 = vpop.f32.mrb[28].mxu1 }
0x20c1   :  { %v3347_v61 = vpop.f32.mrb[29].mxu1 }
0x20c8   :  { %v5793_v62 = vpop.f32.mrb[30].mxu1 }
0x20c9   :  { %v3448_v5 = vmul.f32 0.35355338, %v5793_v62  ;;  %v3438_v55 = vpop.f32.mrb[31].mxu1 }
0x20ca   :  { %v3447_v7 = vmul.f32 0.35355338, %v3438_v55 }
0x20cb   :  { %v3450_v10 = vadd.f32 %v7224_v2, %v3448_v5  ;;  %v5222_v5 = vld [vmem:[%s7610_s3 + $0x68] sm:$0xff] }
0x20cc   :  { %v3449_v24 = vadd.f32 %v7230_v59, %v3447_v7 }
0x20cd   :  { %v3454_v36 = vsel %vm297_vm3, %v3450_v10, -inf }
0x20ce   :  { %3455 = vmax.xlane.f32.xlu0 %v3454_v36  ;;  %v3451_v16 = vsel %vm297_vm3, %v3449_v24, -inf }
0x20cf   :  { %3452 = vmax.xlane.f32.xlu1 %v3451_v16 }
0x20e0   :  { %6375 = vrot.lane.b32.xlu1 %v7243_v33, %s6615_s8 }
0x20e4   :  { %6385 = vrot.lane.b32.xlu1 %v6384_v29, %s6604_s10 }
0x20e8   :  { %3562 = vrot.lane.b32.xlu1 %v7275_v28, %s6616_s9 }
0x20ec   :  { %3564 = vrot.lane.b32.xlu1 %v7273_v27, %s6616_s9 }
0x20f0   :  { %3572 = vrot.lane.b32.xlu1 %v5786_v47, %s6617_s11 }
0x215b   :  { %v3456_v2 = vpop.xlane.xlu0 %3455 }
0x215c   :  { %v3458_v59 = vsub.f32 %v3450_v10, %v3456_v2  ;;  %v3453_v1 = vpop.xlane.xlu1 %3452 }
0x215d   :  { %v3457_v21 = vsub.f32 %v3449_v24, %v3453_v1 }
0x215e   :  { %v3461_v30 = vmul.f32 1.442695, %v3458_v59 }
0x215f   :  { %v3459_v31 = vmul.f32 1.442695, %v3457_v21 }
0x2160   :  { %v6376_v33 = vpop.permute.xlu1 %6375 }
0x2161   :  { %6548 = vpow2.f32 %v3459_v31  ;;  %v6378_v32 = vunpack.i.h.bf16 %v6376_v33  ;;  %v6377_v34 = vunpack.i.l.bf16 %v6376_v33  ;;  %v5220_v31 = vld [vmem:[%s7610_s3 + $0x58] sm:$0xff] }
0x2162   :  { %6550 = vpow2.f32 %v3461_v30  ;;  %v5218_v30 = vld [vmem:[%s7610_s3 + $0x48] sm:$0xff] }
0x2163   :  { %v6119_v12 = vpack.c.bf16 %v6378_v32, %v6377_v34  ;;  %v7372_v33 = vpack.i.bf16 %v5220_v31, %v5218_v30  ;;  %v6131_v32 = vpack.c.bf16 %v5220_v31, %v5218_v30 }
0x2164   :  { %v6386_v40 = vpop.permute.xlu1 %6385 }
0x2165   :  { %6120 = vmatprep.subr.bf16.mxu0 %v6119_v12  ;;  %v6388_v17 = vunpack.i.h.bf16 %v6386_v40  ;;  %v6387_v45 = vunpack.i.l.bf16 %v6386_v40  ;;  %6132 = vmatprep.subr.bf16.mxu1 %v6131_v32 }
0x2166   :  { %6122 = vmatpush3.bf16.msra.mxu0 %v6119_v12  ;;  %6134 = vmatpush3.bf16.msra.mxu1 %v6131_v32 }
0x2167   :  { %v6127_v9 = vpack.c.bf16 %v6388_v17, %v6387_v45 }
0x2168   :  { %v3563_v49 = vpop.permute.xlu1 %3562 }
0x2169   :  { %v3584_v43 = vsel %vm207_vm1, %v7271_v22, %v3563_v49  ;;  %v6602_v22 = vld [vmem:[%s7613_s1] sm:$0xff]  ;;  %v5272_v49 = vld [vmem:[%s7611_s5 + $0x17] ss:$0 sm:$0xff] }
0x216b   :  { %v6549_v13 = vpop.eup %6548 }
0x216c   :  { %v3463_v29 = vsel %vm297_vm3, %v6549_v13, 0.0  ;;  %v6551_v27 = vpop.eup %6550  ;;  %v3565_v51 = vpop.permute.xlu1 %3564 }
0x216d   :  { %3464 = vadd.xlane.f32.xlu0 %v3463_v29  ;;  %v3466_v28 = vsel %vm297_vm3, %v6551_v27, 0.0  ;;  %v3585_v56 = vsel %vm207_vm1, %v7269_v26, %v3565_v51 }
0x2170   :  { %v3573_v52 = vpop.permute.xlu1 %3572 }
0x2171   :  { %3467 = vadd.xlane.f32.xlu0 %v3466_v28  ;;  %v3587_v19 = vsel %vm297_vm3, %v3585_v56, %v3573_v52 }
0x2187   :  { %6380 = vrot.lane.b32.xlu0 %v6379_v11, %s6604_s10 }
0x218b   :  { %3570 = vrot.lane.b32.xlu0 %v3347_v61, %s6617_s11 }
0x21fa   :  { %v3465_v35 = vpop.xlane.xlu0 %3464 }
0x21fb   :  { %6552 = vrcp.f32 %v3465_v35 }
0x21fe   :  { %v3468_v37 = vpop.xlane.xlu0 %3467 }
0x21ff   :  { %6554 = vrcp.f32 %v3468_v37 }
0x2202   :  { %v6381_v38 = vpop.permute.xlu0 %6380 }
0x2203   :  { %v6383_v14 = vunpack.i.h.bf16 %v6381_v38  ;;  %v6382_v15 = vunpack.i.l.bf16 %v6381_v38 }
0x2205   :  { %v6553_v23 = vpop.eup %6552  ;;  %v6123_v42 = vpack.c.bf16 %v6383_v14, %v6382_v15 }
0x2206   :  { %v3471_v44 = vmul.f32 %v6553_v23, %v6549_v13  ;;  %v3571_v53 = vpop.permute.xlu0 %3570 }
0x2207   :  { %6124 = vmatprep.subr.bf16.mxu0 %v6123_v42  ;;  %v3586_v57 = vsel %vm297_vm3, %v3584_v43, %v3571_v53  ;;  %v5278_v43 = vld [vmem:[%s7611_s5 + $0x19] ss:$0 sm:$0xff] }
0x2208   :  { %5798 = vmatprep.mubr.msk.f32.mxu0 %vm297_vm3, %v3471_v44 }
0x2209   :  { %v6555_v8 = vpop.eup %6554 }
0x220a   :  { %v3472_v11 = vmul.f32 %v6555_v8, %v6551_v27  ;;  %v5271_v8 = vld [vmem:[%s7611_s5 + $0x16] ss:$0 sm:$0xff] }
0x220c   :  { %5799 = vmatmul.mubr.msk.f32.vlgmr.msra.gmra.mrb[30].mxu0 %vm297_vm3, %v3472_v11 }
0x220d   :  { %6126 = vmatpush3.bf16.msra.mxu0 %v6123_v42 }
0x220e   :  { %6128 = vmatprep.subr.bf16.mxu0 %v6127_v9 }
0x2211   :  { %6130 = vmatpush3.bf16.msra.mxu0 %v6127_v9 }
0x22df   :  { %v5800_v58 = vpop.f32.mrb[30].mxu0 }
0x22e0   :  { %3580 = vrot.lane.b32.xlu1 %v5800_v58, %s6618_s12  ;;  %v3551_v48 = vpop.f32.mrb[31].mxu0  ;;  %v6603_v58 = vld [vmem:[%s7613_s1 + $0x8] sm:$0xff] }
0x22e1   :  { %3578 = vrot.lane.b32.xlu0 %v3551_v48, %s6618_s12 }
0x2352   :  { %v3581_v54 = vpop.permute.xlu1 %3580 }
0x2353   :  { %v3579_v25 = vpop.permute.xlu0 %3578  ;;  %v3589_v63 = vsel %vm1049_vm4, %v3587_v19, %v3581_v54  ;;  %v5273_v19 = vld [vmem:[%s7611_s5 + $0x18] ss:$0 sm:$0xff] }
0x2354   :  { %v3588_v18 = vsel %vm1049_vm4, %v3586_v57, %v3579_v25 }
0x2355   :  { %5809 = vmatprep.mubr.msk.f32.mxu0 %vm51_vm0, %v3588_v18 }
0x2356   :  { %5810 = vmatmul.mubr.msk.f32.vlgmr.msra.gmra.mrb[32].mxu0 %vm51_vm0, %v3589_v63 }
0x2357   :  { %5831 = vmatprep.mubr.msk.f32.mxu0 %vm51_vm0, %v6602_v22 }
0x2429   :  { %v5811_v26 = vpop.f32.mrb[32].mxu0 }
0x242a   :  { %v3688_v3 = vadd.f32 %v5811_v26, %v7137_v41  ;;  %v3678_v46 = vpop.f32.mrb[33].mxu0  ;;  %v5224_v41 = vld [vmem:[%s7610_s3 + $0x78] sm:$0xff] }
0x242b   :  { %v3687_v60 = vadd.f32 %v3678_v46, %v7140_v20  ;;  %v7358_v20 = vpack.i.bf16 %v5224_v41, %v5222_v5  ;;  %v6135_v34 = vpack.c.bf16 %v5224_v41, %v5222_v5 }
0x242c   :  { %v7344_v39 = vadd.f32 %v5270_v0, %v3688_v3 }
0x242d   :  { %v7346_v47 = vadd.f32 %v5270_v0, %v3687_v60  ;;  %6136 = vmatprep.subr.bf16.mxu1 %v6135_v34 }
0x242e   :  { %v3701_v61 = vsel %vm51_vm0, %v7344_v39, 0.0  ;;  %6138 = vmatpush3.bf16.msra.mxu1 %v6135_v34 }
0x242f   :  { %3702 = vadd.xlane.f32.xlu1 %v3701_v61  ;;  %v3698_v62 = vsel %vm51_vm0, %v7346_v47, 0.0 }
0x2430   :  { %3699 = vadd.xlane.f32.xlu0 %v3698_v62 }
0x2440   :  { %6395 = vrot.lane.b32.xlu1 %v7358_v20, %s6606_s18 }
0x24bc   :  { %v3703_v55 = vpop.xlane.xlu1 %3702 }
0x24bd   :  { %v3705_v7 = vmul.f32 0.03125, %v3703_v55  ;;  %v3700_v10 = vpop.xlane.xlu0 %3699 }
0x24be   :  { %v3704_v24 = vmul.f32 0.03125, %v3700_v10 }
0x24bf   :  { %v3707_v36 = vsub.f32 %v7344_v39, %v3705_v7 }
0x24c0   :  { %v3706_v16 = vsub.f32 %v7346_v47, %v3704_v24  ;;  %v6396_v28 = vpop.permute.xlu1 %6395 }
0x24c1   :  { %v3709_v2 = vmul.f32 %v3707_v36, %v3707_v36  ;;  %v6398_v38 = vunpack.i.h.bf16 %v6396_v28  ;;  %v6397_v14 = vunpack.i.l.bf16 %v6396_v28 }
0x24c2   :  { %v3708_v1 = vmul.f32 %v3706_v16, %v3706_v16 }
0x24c3   :  { %v3713_v59 = vsel %vm51_vm0, %v3709_v2, 0.0  ;;  %v6143_v17 = vpack.c.bf16 %v6398_v38, %v6397_v14 }
0x24c4   :  { %3714 = vadd.xlane.f32.xlu0 %v3713_v59  ;;  %v3710_v21 = vsel %vm51_vm0, %v3708_v1, 0.0  ;;  %v5279_v1 = vld [vmem:[%s7611_s5 + $0x1a] ss:$0 sm:$0xff] }
0x24c8   :  { %3711 = vadd.xlane.f32.xlu0 %v3710_v21 }
0x24de   :  { %6390 = vrot.lane.b32.xlu0 %v7372_v33, %s6606_s18 }
0x2551   :  { %v3715_v12 = vpop.xlane.xlu0 %3714 }
0x2552   :  { %v3717_v13 = vmul.f32 0.03125, %v3715_v12 }
0x2554   :  { %v3719_v29 = vadd.f32 1e-05, %v3717_v13 }
0x2555   :  { %v3712_v27 = vpop.xlane.xlu0 %3711 }
0x2556   :  { %6556 = vrsqrt.f32 %v3719_v29  ;;  %v3716_v35 = vmul.f32 0.03125, %v3712_v27 }
0x2558   :  { %v3718_v37 = vadd.f32 1e-05, %v3716_v35 }
0x2559   :  { %v6391_v15 = vpop.permute.xlu0 %6390 }
0x255a   :  { %6558 = vrsqrt.f32 %v3718_v37  ;;  %v6393_v23 = vunpack.i.h.bf16 %v6391_v15  ;;  %v6392_v40 = vunpack.i.l.bf16 %v6391_v15 }
0x255c   :  { %v6139_v42 = vpack.c.bf16 %v6393_v23, %v6392_v40 }
0x255e   :  { %6140 = vmatprep.subr.bf16.mxu0 %v6139_v42 }
0x255f   :  { %6142 = vmatpush3.bf16.msra.mxu0 %v6139_v42 }
0x2560   :  { %v6557_v45 = vpop.eup %6556  ;;  %6144 = vmatprep.subr.bf16.mxu0 %v6143_v17 }
0x2561   :  { %v3723_v44 = vmul.f32 %v6557_v45, %v3707_v36 }
0x2563   :  { %6146 = vmatpush3.bf16.msra.mxu0 %v6143_v17  ;;  %v3729_v48 = vmul.f32 %v5271_v8, %v3723_v44 }
0x2564   :  { %v6559_v9 = vpop.eup %6558 }
0x2565   :  { %v3722_v11 = vmul.f32 %v6559_v9, %v3706_v16  ;;  %v3735_v53 = vadd.f32 %v5272_v49, %v3729_v48 }
0x2566   :  { %5832 = vmatmul.mubr.msk.f32.vlgmr.msra.gmra.mrb[34].mxu0 %vm51_vm0, %v6603_v58 }
0x2567   :  { %v3728_v51 = vmul.f32 %v5271_v8, %v3722_v11 }
0x2569   :  { %v3734_v52 = vadd.f32 %v5272_v49, %v3728_v51 }
0x256b   :  { %5820 = vmatprep.mubr.msk.f32.mxu1 %vm51_vm0, %v3734_v52 }
0x256c   :  { %5821 = vmatmul.mubr.msk.f32.vlgmr.msra.gmra.mrb[32].mxu1 %vm51_vm0, %v3735_v53 }
0x2639   :  { %v5833_v54 = vpop.f32.mrb[34].mxu0 }
0x263a   :  { %v3919_v56 = vadd.f32 %v5833_v54, %v5278_v43  ;;  %v3904_v57 = vpop.f32.mrb[35].mxu0 }
0x263b   :  { %v3918_v25 = vadd.f32 %v5278_v43, %v3904_v57 }
0x263d   :  { %v7394_v18 = vpack.i.bf16 %v3919_v56, %v3918_v25  ;;  %v6147_v63 = vpack.c.bf16 %v3919_v56, %v3918_v25 }
0x263f   :  { %v5822_v22 = vpop.f32.mrb[32].mxu1  ;;  %6400 = vrot.lane.b32.xlu1 %v7394_v18, %s6605_s17  ;;  %6149 = vmatprep.subr.msk.bf16.mxu1 %vm6739_vm2, %v6147_v63 }
0x2640   :  { %v7400_v26 = vadd.f32 %v5822_v22, %v5273_v19  ;;  %v3813_v0 = vpop.f32.mrb[33].mxu1  ;;  %6152 = vmatpush3.bf16.xpose.msk.msra.mxu1 %vm6739_vm2, %v6147_v63 }
0x2641   :  { %v7404_v3 = vadd.f32 %v5273_v19, %v3813_v0 }
0x2642   :  { %4135 = vrot.lane.b32.xlu0 %v7400_v26, %s6605_s17 }
0x2643   :  { %5838 = vmatprep.mubr.msk.f32.mxu1 %vm207_vm1, %v7404_v3  ;;  %4133 = vrot.lane.b32.xlu1 %v7404_v3, %s6605_s17 }
0x2647   :  { %5839 = vmatmul.mubr.msk.f32.vlgmr.msra.gmra.mrb[34].mxu1 %vm207_vm1, %v7400_v26 }
0x26b1   :  { %v6401_v46 = vpop.permute.xlu1 %6400 }
0x26b2   :  { %v6403_v60 = vunpack.i.h.bf16 %v6401_v46  ;;  %v6402_v61 = vunpack.i.l.bf16 %v6401_v46 }
0x26b4   :  { %v6157_v62 = vpack.c.bf16 %v6403_v60, %v6402_v61  ;;  %v4136_v41 = vpop.permute.xlu0 %4135 }
0x26b5   :  { %v4134_v5 = vpop.permute.xlu1 %4133 }
0x26b6   :  { %6159 = vmatprep.subr.msk.bf16.mxu1 %vm6739_vm2, %v6157_v62  ;;  %5852 = vmatprep.mubr.msk.f32.mxu1 %vm207_vm1, %v4134_v5 }
0x26b7   :  { %6162 = vmatpush3.bf16.xpose.msk.msra.mxu1 %vm6739_vm2, %v6157_v62 }
0x26be   :  { %5853 = vmatmul.mubr.msk.f32.vlgmr.msra.gmra.mrb[36].mxu1 %vm207_vm1, %v4136_v41 }
0x271a   :  { %v5840_v55 = vpop.f32.mrb[34].mxu1 }
0x271b   :  { %v4019_v7 = vmul.f32 0.35355338, %v5840_v55  ;;  %v4009_v10 = vpop.f32.mrb[35].mxu1 }
0x271c   :  { %v4018_v24 = vmul.f32 0.35355338, %v4009_v10 }
0x271d   :  { %v4021_v36 = vadd.f32 %v4019_v7, %v6962_v4 }
0x271e   :  { %v4020_v16 = vadd.f32 %v4018_v24, %v6964_v6 }
0x271f   :  { %v4025_v2 = vsel %vm297_vm3, %v4021_v36, -inf }
0x2720   :  { %4026 = vmax.xlane.f32.xlu0 %v4025_v2  ;;  %v4022_v59 = vsel %vm297_vm3, %v4020_v16, -inf }
0x2721   :  { %4023 = vmax.xlane.f32.xlu1 %v4022_v59 }
0x2732   :  { %3926 = vrot.lane.b32.xlu1 %v5279_v1, %s6604_s10 }
0x2791   :  { %v5854_v21 = vpop.f32.mrb[36].mxu1 }
0x2792   :  { %v4215_v30 = vpop.f32.mrb[37].mxu1  ;;  %v4225_v31 = vmul.f32 0.35355338, %v5854_v21 }
0x2793   :  { %v4224_v32 = vmul.f32 0.35355338, %v4215_v30 }
0x2794   :  { %v4227_v12 = vadd.f32 %v4225_v31, %v6962_v4 }
0x2795   :  { %v4226_v34 = vadd.f32 %v4224_v32, %v6964_v6 }
0x2796   :  { %v4231_v29 = vsel %vm297_vm3, %v4227_v12, -inf }
0x2797   :  { %v4228_v13 = vsel %vm297_vm3, %v4226_v34, -inf }
0x2798   :  { %4229 = vmax.xlane.f32.xlu0 %v4228_v13 }
0x279c   :  { %4232 = vmax.xlane.f32.xlu0 %v4231_v29 }
0x27ad   :  { %v4027_v27 = vpop.xlane.xlu0 %4026 }
0x27ae   :  { %v4029_v28 = vsub.f32 %v4021_v36, %v4027_v27  ;;  %v4024_v35 = vpop.xlane.xlu1 %4023 }
0x27af   :  { %v4028_v37 = vsub.f32 %v4020_v16, %v4024_v35 }
0x27b0   :  { %v4032_v38 = vmul.f32 1.442695, %v4029_v28 }
0x27b1   :  { %v4030_v14 = vmul.f32 1.442695, %v4028_v37 }
0x27b2   :  { %6560 = vpow2.f32 %v4032_v38  ;;  %v3927_v15 = vpop.permute.xlu1 %3926 }
0x27b3   :  { %v3929_v23 = vadd.f32 %v3927_v15, %v3904_v57  ;;  %v3930_v40 = vadd.f32 %v5833_v54, %v3927_v15  ;;  %6562 = vpow2.f32 %v4030_v14 }
0x27b5   :  { %v7432_v42 = vpack.i.bf16 %v3930_v40, %v3929_v23 }
0x27b7   :  { %6405 = vrot.lane.b32.xlu1 %v7432_v42, %s6606_s18 }
0x27bb   :  { %6415 = vrot.lane.b32.xlu1 %v7394_v18, %s6610_s27 }
0x27bc   :  { %v6561_v17 = vpop.eup %6560 }
0x27bd   :  { %v4037_v45 = vsel %vm297_vm3, %v6561_v17, 0.0  ;;  %v6563_v44 = vpop.eup %6562 }
0x27be   :  { %4038 = vadd.xlane.f32.xlu0 %v4037_v45  ;;  %v4034_v8 = vsel %vm297_vm3, %v6563_v44, 0.0 }
0x27bf   :  { %4337 = vrot.lane.b32.xlu1 %v7404_v3, %s6610_s27 }
0x27c2   :  { %4035 = vadd.xlane.f32.xlu0 %v4034_v8 }
0x27c3   :  { %4339 = vrot.lane.b32.xlu1 %v7400_v26, %s6610_s27 }
0x2825   :  { %v4230_v9 = vpop.xlane.xlu0 %4229 }
0x2826   :  { %v4234_v11 = vsub.f32 %v4226_v34, %v4230_v9 }
0x2828   :  { %v4236_v53 = vmul.f32 1.442695, %v4234_v11 }
0x2829   :  { %v4233_v58 = vpop.xlane.xlu0 %4232  ;;  %v6406_v48 = vpop.permute.xlu1 %6405 }
0x282a   :  { %v4235_v49 = vsub.f32 %v4227_v12, %v4233_v58  ;;  %v6408_v51 = vunpack.i.h.bf16 %v6406_v48  ;;  %v6407_v52 = vunpack.i.l.bf16 %v6406_v48 }
0x282c   :  { %v4238_v43 = vmul.f32 1.442695, %v4235_v49  ;;  %v6153_v54 = vpack.c.bf16 %v6408_v51, %v6407_v52 }
0x282d   :  { %v6416_v41 = vpop.permute.xlu1 %6415 }
0x282e   :  { %6564 = vpow2.f32 %v4238_v43  ;;  %6154 = vmatprep.subr.bf16.mxu0 %v6153_v54  ;;  %v6418_v7 = vunpack.i.h.bf16 %v6416_v41  ;;  %v6417_v10 = vunpack.i.l.bf16 %v6416_v41 }
0x282f   :  { %6156 = vmatpush3.bf16.msra.mxu0 %v6153_v54  ;;  %6566 = vpow2.f32 %v4236_v53 }
0x2830   :  { %v6167_v2 = vpack.c.bf16 %v6418_v7, %v6417_v10 }
0x2831   :  { %v4338_v31 = vpop.permute.xlu1 %4337 }
0x2835   :  { %v4340_v32 = vpop.permute.xlu1 %4339 }
0x2838   :  { %v6565_v56 = vpop.eup %6564 }
0x2839   :  { %v4243_v57 = vsel %vm297_vm3, %v6565_v56, 0.0  ;;  %v6567_v25 = vpop.eup %6566 }
0x283a   :  { %4244 = vadd.xlane.f32.xlu0 %v4243_v57  ;;  %v4240_v19 = vsel %vm297_vm3, %v6567_v25, 0.0 }
0x283e   :  { %4241 = vadd.xlane.f32.xlu0 %v4240_v19 }
0x284b   :  { %v4039_v63 = vpop.xlane.xlu0 %4038 }
0x284c   :  { %6568 = vrcp.f32 %v4039_v63 }
0x284f   :  { %v4036_v22 = vpop.xlane.xlu0 %4035 }
0x2850   :  { %6570 = vrcp.f32 %v4036_v22 }
0x2854   :  { %6410 = vrot.lane.b32.xlu0 %v7432_v42, %s6607_s19 }
0x2856   :  { %v6569_v0 = vpop.eup %6568 }
0x2857   :  { %v4043_v61 = vmul.f32 %v6569_v0, %v6561_v17 }
0x285a   :  { %v6571_v46 = vpop.eup %6570 }
0x285b   :  { %v4042_v60 = vmul.f32 %v6571_v46, %v6563_v44 }
0x285d   :  { %5845 = vmatprep.mubr.msk.f32.mxu0 %vm297_vm3, %v4042_v60 }
0x285e   :  { %5846 = vmatmul.mubr.msk.f32.vlgmr.msra.gmra.mrb[36].mxu0 %vm297_vm3, %v4043_v61 }
0x28c7   :  { %v4245_v62 = vpop.xlane.xlu0 %4244 }
0x28c8   :  { %6572 = vrcp.f32 %v4245_v62 }
0x28cb   :  { %v4242_v5 = vpop.xlane.xlu0 %4241 }
0x28cc   :  { %6574 = vrcp.f32 %v4242_v5 }
0x28cf   :  { %v6411_v55 = vpop.permute.xlu0 %6410 }
0x28d0   :  { %v6413_v24 = vunpack.i.h.bf16 %v6411_v55  ;;  %v6412_v36 = vunpack.i.l.bf16 %v6411_v55 }
0x28d2   :  { %v6163_v16 = vpack.c.bf16 %v6413_v24, %v6412_v36  ;;  %v6573_v59 = vpop.eup %6572 }
0x28d3   :  { %v4249_v30 = vmul.f32 %v6573_v59, %v6565_v56 }
0x28d4   :  { %6164 = vmatprep.subr.bf16.mxu0 %v6163_v16 }
0x28d5   :  { %6166 = vmatpush3.bf16.msra.mxu0 %v6163_v16 }
0x28d6   :  { %v6575_v1 = vpop.eup %6574  ;;  %6169 = vmatprep.subr.msk.bf16.mxu0 %vm6739_vm2, %v6167_v2 }
0x28d7   :  { %v4248_v21 = vmul.f32 %v6575_v1, %v6567_v25 }
0x28d9   :  { %5859 = vmatprep.mubr.msk.f32.mxu0 %vm297_vm3, %v4248_v21 }
0x28da   :  { %5860 = vmatmul.mubr.msk.f32.vlgmr.msra.gmra.mrb[38].mxu0 %vm297_vm3, %v4249_v30 }
0x28db   :  { %5866 = vmatprep.mubr.msk.f32.mxu0 %vm207_vm1, %v4338_v31 }
0x28de   :  { %6172 = vmatpush3.bf16.xpose.msk.msra.mxu0 %vm6739_vm2, %v6167_v2 }
0x28e5   :  { %5867 = vmatmul.mubr.msk.f32.vlgmr.msra.gmra.mrb[40].mxu0 %vm207_vm1, %v4340_v32 }
0x2931   :  { %v7458_v34 = vpop.f32.mrb[36].mxu0 }
0x2932   :  { %v7460_v12 = vpop.f32.mrb[37].mxu0 }
0x29ad   :  { %v7462_v13 = vpop.f32.mrb[38].mxu0 }
0x29ae   :  { %v7464_v29 = vpop.f32.mrb[39].mxu0 }
0x29b8   :  { %v5868_v27 = vpop.f32.mrb[40].mxu0 }
0x29b9   :  { %v4429_v28 = vmul.f32 0.35355338, %v5868_v27  ;;  %v4419_v35 = vpop.f32.mrb[41].mxu0 }
0x29ba   :  { %v4428_v37 = vmul.f32 0.35355338, %v4419_v35 }
0x29bb   :  { %v4431_v38 = vadd.f32 %v4429_v28, %v6962_v4 }
0x29bc   :  { %v4430_v14 = vadd.f32 %v4428_v37, %v6964_v6 }
0x29bd   :  { %v4435_v15 = vsel %vm297_vm3, %v4431_v38, -inf }
0x29be   :  { %4436 = vmax.xlane.f32.xlu0 %v4435_v15  ;;  %v4432_v23 = vsel %vm297_vm3, %v4430_v14, -inf }
0x29bf   :  { %4433 = vmax.xlane.f32.xlu1 %v4432_v23 }
0x29d0   :  { %6420 = vrot.lane.b32.xlu1 %v7432_v42, %s6609_s26 }
0x29d4   :  { %4541 = vrot.lane.b32.xlu1 %v7404_v3, %s6613_s30 }
0x2a4b   :  { %v4437_v40 = vpop.xlane.xlu0 %4436 }
0x2a4c   :  { %v4439_v17 = vsub.f32 %v4431_v38, %v4437_v40  ;;  %v4434_v45 = vpop.xlane.xlu1 %4433 }
0x2a4d   :  { %v4438_v44 = vsub.f32 %v4430_v14, %v4434_v45 }
0x2a4e   :  { %v4442_v8 = vmul.f32 1.442695, %v4439_v17 }
0x2a4f   :  { %v4440_v9 = vmul.f32 1.442695, %v4438_v44 }
0x2a50   :  { %6576 = vpow2.f32 %v4442_v8  ;;  %v6421_v11 = vpop.permute.xlu1 %6420 }
0x2a51   :  { %6578 = vpow2.f32 %v4440_v9  ;;  %v6423_v58 = vunpack.i.h.bf16 %v6421_v11  ;;  %v6422_v48 = vunpack.i.l.bf16 %v6421_v11 }
0x2a53   :  { %v6173_v49 = vpack.c.bf16 %v6423_v58, %v6422_v48 }
0x2a54   :  { %v4542_v43 = vpop.permute.xlu1 %4541 }
0x2a55   :  { %6174 = vmatprep.subr.bf16.mxu1 %v6173_v49 }
0x2a56   :  { %6176 = vmatpush3.bf16.msra.mxu1 %v6173_v49 }
0x2a5a   :  { %v6577_v51 = vpop.eup %6576 }
0x2a5b   :  { %v6579_v52 = vpop.eup %6578  ;;  %v4447_v53 = vsel %vm297_vm3, %v6577_v51, 0.0 }
0x2a5c   :  { %4448 = vadd.xlane.f32.xlu0 %v4447_v53  ;;  %v4444_v3 = vsel %vm297_vm3, %v6579_v52, 0.0 }
0x2a5d   :  { %4445 = vadd.xlane.f32.xlu1 %v4444_v3 }
0x2a6e   :  { %4543 = vrot.lane.b32.xlu1 %v7400_v26, %s6613_s30 }
0x2a72   :  { %6425 = vrot.lane.b32.xlu0 %v7394_v18, %s6613_s30 }
0x2ae9   :  { %v4449_v54 = vpop.xlane.xlu0 %4448 }
0x2aea   :  { %6580 = vrcp.f32 %v4449_v54  ;;  %v4446_v56 = vpop.xlane.xlu1 %4445 }
0x2aeb   :  { %6582 = vrcp.f32 %v4446_v56 }
0x2aed   :  { %v6426_v57 = vpop.permute.xlu0 %6425 }
0x2aee   :  { %v6428_v25 = vunpack.i.h.bf16 %v6426_v57  ;;  %v6427_v19 = vunpack.i.l.bf16 %v6426_v57  ;;  %v4544_v18 = vpop.permute.xlu1 %4543 }
0x2af0   :  { %v6177_v63 = vpack.c.bf16 %v6428_v25, %v6427_v19 }
0x2af2   :  { %6179 = vmatprep.subr.msk.bf16.mxu1 %vm6739_vm2, %v6177_v63 }
0x2af4   :  { %v6581_v22 = vpop.eup %6580 }
0x2af5   :  { %v6583_v0 = vpop.eup %6582  ;;  %v4453_v60 = vmul.f32 %v6581_v22, %v6577_v51 }
0x2af6   :  { %v4452_v46 = vmul.f32 %v6583_v0, %v6579_v52 }
0x2af8   :  { %5873 = vmatprep.mubr.msk.f32.mxu1 %vm297_vm3, %v4452_v46 }
0x2af9   :  { %5874 = vmatmul.mubr.msk.f32.vlgmr.msra.gmra.mrb[38].mxu1 %vm297_vm3, %v4453_v60 }
0x2afa   :  { %6182 = vmatpush3.bf16.xpose.msk.msra.mxu1 %vm6739_vm2, %v6177_v63  ;;  %5880 = vmatprep.mubr.msk.f32.mxu1 %vm207_vm1, %v4542_v43 }
0x2b01   :  { %5881 = vmatmul.mubr.msk.f32.vlgmr.msra.gmra.mrb[40].mxu1 %vm207_vm1, %v4544_v18 }
0x2bcc   :  { %v5875_v26 = vpop.f32.mrb[38].mxu1 }
0x2bcd   :  { %v4532_v61 = vpop.f32.mrb[39].mxu1 }
0x2bd4   :  { %v5882_v62 = vpop.f32.mrb[40].mxu1 }
0x2bd5   :  { %v4633_v5 = vmul.f32 0.35355338, %v5882_v62  ;;  %v4623_v41 = vpop.f32.mrb[41].mxu1 }
0x2bd6   :  { %v4632_v55 = vmul.f32 0.35355338, %v4623_v41 }
0x2bd7   :  { %v4635_v7 = vadd.f32 %v4633_v5, %v6962_v4 }
0x2bd8   :  { %v4634_v10 = vadd.f32 %v4632_v55, %v6964_v6 }
0x2bd9   :  { %v4639_v24 = vsel %vm297_vm3, %v4635_v7, -inf }
0x2bda   :  { %4640 = vmax.xlane.f32.xlu0 %v4639_v24  ;;  %v4636_v50 = vsel %vm297_vm3, %v4634_v10, -inf  ;;  %v5226_v24 = vld [vmem:[%s7614_s4 + $0x68] sm:$0xff] }
0x2bdb   :  { %4637 = vmax.xlane.f32.xlu1 %v4636_v50 }
0x2bec   :  { %6430 = vrot.lane.b32.xlu1 %v7432_v42, %s6614_s7 }
0x2bf0   :  { %6440 = vrot.lane.b32.xlu1 %v7358_v20, %s6604_s10 }
0x2bf4   :  { %4747 = vrot.lane.b32.xlu1 %v7464_v29, %s6616_s9 }
0x2bf8   :  { %4749 = vrot.lane.b32.xlu1 %v7462_v13, %s6616_s9 }
0x2bfc   :  { %4757 = vrot.lane.b32.xlu1 %v5875_v26, %s6617_s11 }
0x2c67   :  { %v4641_v4 = vpop.xlane.xlu0 %4640 }
0x2c68   :  { %v4643_v6 = vsub.f32 %v4635_v7, %v4641_v4  ;;  %v4638_v36 = vpop.xlane.xlu1 %4637  ;;  %v5227_v4 = vld [vmem:[%s7614_s4 + $0x70] sm:$0xff] }
0x2c69   :  { %v4642_v16 = vsub.f32 %v4634_v10, %v4638_v36  ;;  %v5225_v10 = vld [vmem:[%s7614_s4 + $0x60] sm:$0xff] }
0x2c6a   :  { %v4646_v2 = vmul.f32 1.442695, %v4643_v6  ;;  %v6195_v50 = vpack.c.bf16 %v5226_v24, %v5225_v10  ;;  %v5228_v6 = vld [vmem:[%s7614_s4 + $0x78] sm:$0xff] }
0x2c6b   :  { %v4644_v59 = vmul.f32 1.442695, %v4642_v16  ;;  %v6199_v36 = vpack.c.bf16 %v5228_v6, %v5227_v4  ;;  %v5229_v16 = vld [vmem:[%s7614_s4 + $0x80] sm:$0xff] }
0x2c6c   :  { %v6431_v1 = vpop.permute.xlu1 %6430  ;;  %6196 = vmatprep.subr.bf16.mxu1 %v6195_v50  ;;  %v5315_v4 = vld [vmem:[%s7611_s5 + $0x20] ss:$0 sm:$0xff] }
0x2c6d   :  { %6584 = vpow2.f32 %v4644_v59  ;;  %v6433_v42 = vunpack.i.h.bf16 %v6431_v1  ;;  %v6432_v21 = vunpack.i.l.bf16 %v6431_v1  ;;  %6198 = vmatpush3.bf16.msra.mxu1 %v6195_v50  ;;  %v5231_v59 = vld [vmem:[%s7614_s4 + $0x90] sm:$0xff] }
0x2c6e   :  { %6586 = vpow2.f32 %v4646_v2  ;;  %6200 = vmatprep.subr.bf16.mxu1 %v6199_v36  ;;  %v5230_v2 = vld [vmem:[%s7614_s4 + $0x88] sm:$0xff] }
0x2c6f   :  { %v6183_v20 = vpack.c.bf16 %v6433_v42, %v6432_v21  ;;  %v6203_v1 = vpack.c.bf16 %v5230_v2, %v5229_v16  ;;  %v5232_v42 = vld [vmem:[%s7614_s4 + $0x98] sm:$0xff]  ;;  %v5316_v16 = vld [vmem:[%s7611_s5 + $0x21] ss:$0 sm:$0xff] }
0x2c70   :  { %v6441_v14 = vpop.permute.xlu1 %6440  ;;  %v6207_v21 = vpack.c.bf16 %v5232_v42, %v5231_v59 }
0x2c71   :  { %6184 = vmatprep.subr.bf16.mxu0 %v6183_v20  ;;  %v6443_v23 = vunpack.i.h.bf16 %v6441_v14  ;;  %v6442_v40 = vunpack.i.l.bf16 %v6441_v14  ;;  %6202 = vmatpush3.bf16.msra.mxu1 %v6199_v36 }
0x2c72   :  { %6186 = vmatpush3.bf16.msra.mxu0 %v6183_v20  ;;  %v5233_v20 = vld [vmem:[%s7614_s4 + $0xa0] sm:$0xff] }
0x2c74   :  { %v4748_v11 = vpop.permute.xlu1 %4747 }
0x2c75   :  { %v4769_v51 = vsel %vm207_vm1, %v7460_v12, %v4748_v11  ;;  %v5306_v12 = vld [vmem:[%s7611_s5 + $0x1b] ss:$0 sm:$0xff] }
0x2c77   :  { %v6585_v30 = vpop.eup %6584 }
0x2c78   :  { %v4648_v31 = vsel %vm297_vm3, %v6585_v30, 0.0  ;;  %v6587_v32 = vpop.eup %6586  ;;  %v4750_v58 = vpop.permute.xlu1 %4749 }
0x2c79   :  { %4649 = vadd.xlane.f32.xlu0 %v4648_v31  ;;  %v4651_v13 = vsel %vm297_vm3, %v6587_v32, 0.0  ;;  %v4770_v53 = vsel %vm207_vm1, %v7458_v34, %v4750_v58  ;;  %v5309_v58 = vld [vmem:[%s7611_s5 + $0x1e] ss:$0 sm:$0xff] }
0x2c7c   :  { %v4758_v48 = vpop.permute.xlu1 %4757 }
0x2c7d   :  { %4652 = vadd.xlane.f32.xlu0 %v4651_v13  ;;  %v4772_v54 = vsel %vm297_vm3, %v4770_v53, %v4758_v48 }
0x2c93   :  { %6435 = vrot.lane.b32.xlu0 %v7372_v33, %s6604_s10  ;;  %v6191_v33 = vpack.c.bf16 %v6443_v23, %v6442_v40 }
0x2c97   :  { %4755 = vrot.lane.b32.xlu0 %v4532_v61, %s6617_s11 }
0x2d06   :  { %v4650_v29 = vpop.xlane.xlu0 %4649 }
0x2d07   :  { %6588 = vrcp.f32 %v4650_v29 }
0x2d0a   :  { %v4653_v27 = vpop.xlane.xlu0 %4652 }
0x2d0b   :  { %6590 = vrcp.f32 %v4653_v27 }
0x2d0e   :  { %v6436_v28 = vpop.permute.xlu0 %6435 }
0x2d0f   :  { %v6438_v35 = vunpack.i.h.bf16 %v6436_v28  ;;  %v6437_v37 = vunpack.i.l.bf16 %v6436_v28 }
0x2d11   :  { %v6589_v38 = vpop.eup %6588  ;;  %v6187_v15 = vpack.c.bf16 %v6438_v35, %v6437_v37 }
0x2d12   :  { %v4656_v17 = vmul.f32 %v6589_v38, %v6585_v30  ;;  %v4756_v49 = vpop.permute.xlu0 %4755  ;;  %v5234_v30 = vld [vmem:[%s7614_s4 + $0xa8] sm:$0xff]  ;;  %v5307_v38 = vld [vmem:[%s7611_s5 + $0x1c] ss:$0 sm:$0xff] }
0x2d13   :  { %6188 = vmatprep.subr.bf16.mxu0 %v6187_v15  ;;  %v4771_v3 = vsel %vm297_vm3, %v4769_v51, %v4756_v49  ;;  %v6211_v31 = vpack.c.bf16 %v5234_v30, %v5233_v20 }
0x2d14   :  { %5887 = vmatprep.mubr.msk.f32.mxu0 %vm297_vm3, %v4656_v17 }
0x2d15   :  { %v6591_v45 = vpop.eup %6590 }
0x2d16   :  { %v4657_v44 = vmul.f32 %v6591_v45, %v6587_v32 }
0x2d18   :  { %5888 = vmatmul.mubr.msk.f32.vlgmr.msra.gmra.mrb[42].mxu0 %vm297_vm3, %v4657_v44 }
0x2d19   :  { %6190 = vmatpush3.bf16.msra.mxu0 %v6187_v15  ;;  %v5308_v15 = vld [vmem:[%s7611_s5 + $0x1d] ss:$0 sm:$0xff] }
0x2d1a   :  { %6192 = vmatprep.subr.bf16.mxu0 %v6191_v33 }
0x2d1d   :  { %6194 = vmatpush3.bf16.msra.mxu0 %v6191_v33 }
0x2d1e   :  { %6204 = vmatprep.subr.bf16.mxu0 %v6203_v1 }
0x2deb   :  { %v5889_v8 = vpop.f32.mrb[42].mxu0 }
0x2dec   :  { %4765 = vrot.lane.b32.xlu1 %v5889_v8, %s6618_s12  ;;  %v4736_v9 = vpop.f32.mrb[43].mxu0  ;;  %v5235_v8 = vld [vmem:[%s7614_s4 + $0xb0] sm:$0xff] }
0x2ded   :  { %4763 = vrot.lane.b32.xlu0 %v4736_v9, %s6618_s12  ;;  %v5236_v9 = vld [vmem:[%s7614_s4 + $0xb8] sm:$0xff] }
0x2dee   :  { %v6215_v11 = vpack.c.bf16 %v5236_v9, %v5235_v8 }
0x2e5e   :  { %v4766_v52 = vpop.permute.xlu1 %4765 }
0x2e5f   :  { %v4764_v43 = vpop.permute.xlu0 %4763  ;;  %v4774_v57 = vsel %vm1049_vm4, %v4772_v54, %v4766_v52 }
0x2e60   :  { %v4773_v56 = vsel %vm1049_vm4, %v4771_v3, %v4764_v43  ;;  %v5312_v43 = vld [vmem:[%s7611_s5 + $0x1f] ss:$0 sm:$0xff] }
0x2e61   :  { %5898 = vmatprep.mubr.msk.f32.mxu0 %vm51_vm0, %v4773_v56 }
0x2e62   :  { %5899 = vmatmul.mubr.msk.f32.vlgmr.msra.gmra.mrb[44].mxu0 %vm51_vm0, %v4774_v57 }
0x2e63   :  { %6206 = vmatpush3.bf16.msra.mxu0 %v6203_v1 }
0x2e64   :  { %6208 = vmatprep.subr.bf16.mxu0 %v6207_v21 }
0x2e67   :  { %6210 = vmatpush3.bf16.msra.mxu0 %v6207_v21 }
0x2e68   :  { %6212 = vmatprep.subr.bf16.mxu0 %v6211_v31 }
0x2e6b   :  { %6214 = vmatpush3.bf16.msra.mxu0 %v6211_v31 }
0x2e6c   :  { %6216 = vmatprep.subr.bf16.mxu0 %v6215_v11 }
0x2e6f   :  { %6218 = vmatpush3.bf16.msra.mxu0 %v6215_v11 }
0x2f35   :  { %v5900_v25 = vpop.f32.mrb[44].mxu0 }
0x2f36   :  { %v4869_v34 = vadd.f32 %v5900_v25, %v7344_v39  ;;  %v4859_v19 = vpop.f32.mrb[45].mxu0 }
0x2f37   :  { %v4868_v63 = vadd.f32 %v4859_v19, %v7346_v47 }
0x2f38   :  { %v7525_v22 = vadd.f32 %v5306_v12, %v4869_v34 }
0x2f39   :  { %v7527_v0 = vadd.f32 %v5306_v12, %v4868_v63 }
0x2f3a   :  { %v4882_v46 = vsel %vm51_vm0, %v7525_v22, 0.0 }
0x2f3b   :  { %4883 = vadd.xlane.f32.xlu1 %v4882_v46  ;;  %v4879_v60 = vsel %vm51_vm0, %v7527_v0, 0.0 }
0x2f3c   :  { %4880 = vadd.xlane.f32.xlu0 %v4879_v60 }
0x2fc8   :  { %v4884_v18 = vpop.xlane.xlu1 %4883 }
0x2fc9   :  { %v4886_v26 = vmul.f32 0.03125, %v4884_v18  ;;  %v4881_v61 = vpop.xlane.xlu0 %4880 }
0x2fca   :  { %v4885_v62 = vmul.f32 0.03125, %v4881_v61 }
0x2fcb   :  { %v4888_v39 = vsub.f32 %v7525_v22, %v4886_v26 }
0x2fcc   :  { %v4887_v47 = vsub.f32 %v7527_v0, %v4885_v62 }
0x2fcd   :  { %v4890_v55 = vmul.f32 %v4888_v39, %v4888_v39 }
0x2fce   :  { %v4889_v5 = vmul.f32 %v4887_v47, %v4887_v47 }
0x2fcf   :  { %v4894_v7 = vsel %vm51_vm0, %v4890_v55, 0.0 }
0x2fd0   :  { %v4891_v41 = vsel %vm51_vm0, %v4889_v5, 0.0 }
0x2fd1   :  { %4892 = vadd.xlane.f32.xlu0 %v4891_v41 }
0x2fd5   :  { %4895 = vadd.xlane.f32.xlu0 %v4894_v7 }
0x305e   :  { %v4893_v32 = vpop.xlane.xlu0 %4892 }
0x305f   :  { %v4897_v13 = vmul.f32 0.03125, %v4893_v32 }
0x3061   :  { %v4899_v29 = vadd.f32 1e-05, %v4897_v13 }
0x3062   :  { %v4896_v27 = vpop.xlane.xlu0 %4895 }
0x3063   :  { %6592 = vrsqrt.f32 %v4899_v29  ;;  %v4898_v28 = vmul.f32 0.03125, %v4896_v27 }
0x3065   :  { %v4900_v35 = vadd.f32 1e-05, %v4898_v28 }
0x3067   :  { %6594 = vrsqrt.f32 %v4900_v35 }
0x306d   :  { %v6593_v37 = vpop.eup %6592 }
0x306e   :  { %v4903_v14 = vmul.f32 %v6593_v37, %v4887_v47 }
0x3070   :  { %v4909_v23 = vmul.f32 %v5307_v38, %v4903_v14 }
0x3071   :  { %v6595_v40 = vpop.eup %6594 }
0x3072   :  { %v4904_v17 = vmul.f32 %v6595_v40, %v4888_v39  ;;  %v4915_v45 = vadd.f32 %v5308_v15, %v4909_v23 }
0x3074   :  { %v4910_v33 = vmul.f32 %v5307_v38, %v4904_v17  ;;  %5909 = vmatprep.mubr.msk.f32.mxu1 %vm51_vm0, %v4915_v45 }
0x3076   :  { %v4916_v44 = vadd.f32 %v5308_v15, %v4910_v33 }
0x3078   :  { %5910 = vmatmul.mubr.msk.f32.vlgmr.msra.gmra.mrb[42].mxu1 %vm51_vm0, %v4916_v44 }
0x314b   :  { %v5911_v48 = vpop.f32.mrb[42].mxu1 }
0x314c   :  { %v5000_v49 = vadd.f32 %v5911_v48, %v5309_v58  ;;  %v4994_v51 = vpop.f32.mrb[43].mxu1 }
0x314d   :  { %v4995_v52 = vadd.f32 %v5309_v58, %v4994_v51 }
0x314e   :  { %v5004_v3 = vmax.f32 %v5000_v49, 0.0 }
0x314f   :  { %v5003_v53 = vmax.f32 %v4995_v52, 0.0 }
0x3151   :  { %5928 = vmatprep.mubr.msk.f32.mxu0 %vm2486_vm5, %v5003_v53 }
0x3152   :  { %5929 = vmatmul.mubr.msk.f32.vlgmr.msra.gmra.mrb[46].mxu0 %vm2486_vm5, %v5004_v3 }
0x3225   :  { %v5930_v54 = vpop.f32.mrb[46].mxu0 }
0x3226   :  { %v5088_v56 = vadd.f32 %v5930_v54, %v5312_v43  ;;  %v5082_v57 = vpop.f32.mrb[47].mxu0 }
0x3227   :  { %v5083_v25 = vadd.f32 %v5312_v43, %v5082_v57 }
0x3228   :  { %v5092_v12 = vadd.f32 %v5088_v56, %v7525_v22 }
0x3229   :  { %v5091_v34 = vadd.f32 %v5083_v25, %v7527_v0 }
0x322a   :  { %v5098_v19 = vsel %vm51_vm0, %v5092_v12, 0.0 }
0x322b   :  { %5099 = vadd.xlane.f32.xlu1 %v5098_v19  ;;  %v5095_v63 = vsel %vm51_vm0, %v5091_v34, 0.0 }
0x322c   :  { %5096 = vadd.xlane.f32.xlu0 %v5095_v63 }
0x32b8   :  { %v5100_v46 = vpop.xlane.xlu1 %5099 }
0x32b9   :  { %v5102_v60 = vmul.f32 0.03125, %v5100_v46  ;;  %v5097_v18 = vpop.xlane.xlu0 %5096 }
0x32ba   :  { %v5101_v26 = vmul.f32 0.03125, %v5097_v18 }
0x32bb   :  { %v5104_v61 = vsub.f32 %v5092_v12, %v5102_v60 }
0x32bc   :  { %v5103_v62 = vsub.f32 %v5091_v34, %v5101_v26 }
0x32bd   :  { %v5106_v39 = vmul.f32 %v5104_v61, %v5104_v61 }
0x32be   :  { %v5105_v47 = vmul.f32 %v5103_v62, %v5103_v62 }
0x32bf   :  { %v5110_v5 = vsel %vm51_vm0, %v5106_v39, 0.0 }
0x32c0   :  { %5111 = vadd.xlane.f32.xlu1 %v5110_v5  ;;  %v5107_v22 = vsel %vm51_vm0, %v5105_v47, 0.0 }
0x32c1   :  { %5108 = vadd.xlane.f32.xlu0 %v5107_v22 }
0x334d   :  { %v5112_v0 = vpop.xlane.xlu1 %5111 }
0x334e   :  { %v5114_v41 = vmul.f32 0.03125, %v5112_v0  ;;  %v5109_v55 = vpop.xlane.xlu0 %5108 }
0x334f   :  { %v5113_v7 = vmul.f32 0.03125, %v5109_v55 }
0x3350   :  { %v5116_v10 = vadd.f32 1e-05, %v5114_v41 }
0x3351   :  { %v5115_v24 = vadd.f32 1e-05, %v5113_v7 }
0x3352   :  { %6596 = vrsqrt.f32 %v5116_v10 }
0x3353   :  { %6598 = vrsqrt.f32 %v5115_v24 }
0x335c   :  { %v6597_v50 = vpop.eup %6596 }
0x335d   :  { %v6599_v6 = vpop.eup %6598  ;;  %v5120_v36 = vmul.f32 %v6597_v50, %v5104_v61 }
0x335e   :  { %v5119_v2 = vmul.f32 %v6599_v6, %v5103_v62 }
0x335f   :  { %v5126_v59 = vmul.f32 %v5315_v4, %v5120_v36 }
0x3360   :  { %v5125_v1 = vmul.f32 %v5315_v4, %v5119_v2 }
0x3361   :  { %v5132_v42 = vadd.f32 %v5316_v16, %v5126_v59 }
0x3362   :  { %v5131_v21 = vadd.f32 %v5316_v16, %v5125_v1 }
0x3363   :  { %5134 = vst.msk [vmem:[%s7615_s6 + $0x8] sm:$0xff] %vm51_vm0, %v5132_v42 }
0x3364   :  { %5133 = vst.msk [vmem:[%s7615_s6] sm:$0xff] %vm51_vm0, %v5131_v21 }

</bundles_post_ra>
